<compile_context>
chip_gen: v7x
topology: tpu7x:2x2x1
jax: 0.10.0
libtpu: 0.0.40
codegen_flags: <defaults>
</compile_context>

<pallas_src>
import functools

import jax
import jax.numpy as jnp
from jax.experimental import pallas as pl
from jax.experimental.pallas import tpu as pltpu

# Explicit scoped-VMEM budget (review: don't rely on the 32 MiB default).
# Raise toward 128 MiB on v5e/v6e at production sizes; keep headroom on v7x.
VMEM_LIMIT_BYTES = 64 * 1024 * 1024


# ----------------------------------------------------------------------------
# Fused kernel: per grid step (one time chunk of TB steps)
#   1) input half of the gates for both directions (off the serial chain),
#   2) TB recurrent steps, fwd & bwd interleaved, one block-diag MXU issue
#      per step, h/c carried in VMEM scratch,
#   3) K-tiled partial of the Linear head into a VMEM f32 accumulator.
# ----------------------------------------------------------------------------
def _bilstm_linear_kernel(x_f_ref, x_b_ref, w_ih_ref, w_hhd_ref, b_ref,
                          wlf_ref, wlb_ref, b_lin_ref, y_ref,
                          hf_sc, cf_sc, hb_sc, cb_sc, acc_sc,
                          *, hidden, time_block):
    s = pl.program_id(0)
    H = hidden
    TB = time_block

    @pl.when(s == 0)
    def _():
        hf_sc[...] = jnp.zeros_like(hf_sc)
        cf_sc[...] = jnp.zeros_like(cf_sc)
        hb_sc[...] = jnp.zeros_like(hb_sc)
        cb_sc[...] = jnp.zeros_like(cb_sc)
        acc_sc[...] = jnp.zeros_like(acc_sc)

    w_ih_f = w_ih_ref[0]                  # (I, 4H) bf16
    w_ih_b = w_ih_ref[1]
    w_hhd = w_hhd_ref[...]                # (2H, 8H) bf16, block-diagonal
    b_f = b_ref[0]                        # (1, 4H) f32 (= b_ih + b_hh)
    b_b = b_ref[1]

    # Input half of the gates for the whole chunk.  These depend only on x, so
    # their MXU issues sit off the serial h-dependency chain and overlap it.
    gin_f = [jnp.dot(x_f_ref[:, j, :].astype(jnp.bfloat16), w_ih_f,
                     preferred_element_type=jnp.float32) + b_f
             for j in range(TB)]
    gin_b = [jnp.dot(x_b_ref[:, j, :].astype(jnp.bfloat16), w_ih_b,
                     preferred_element_type=jnp.float32) + b_b
             for j in range(TB)]

    h_f, c_f = hf_sc[...], cf_sc[...]     # (B, H) f32 carries
    h_b, c_b = hb_sc[...], cb_sc[...]

    def gate_act(gates, c):
        # PyTorch gate order: [i, f, g, o].
        i_g = jax.nn.sigmoid(gates[:, 0 * H:1 * H])
        f_g = jax.nn.sigmoid(gates[:, 1 * H:2 * H])
        g_g = jnp.tanh(gates[:, 2 * H:3 * H])
        o_g = jax.nn.sigmoid(gates[:, 3 * H:4 * H])
        c_new = f_g * c + i_g * g_g
        h_new = o_g * jnp.tanh(c_new)
        return h_new, c_new

    hs_f = [None] * TB
    hs_b = [None] * TB
    # Static unroll: fwd & bwd share ONE block-diagonal MXU issue per timestep
    # and their independent chains interleave for ILP on a single TensorCore.
    # TODO(synk): for large H / TB switch to lax.fori_loop(..., unroll=True)
    # to bound vreg live ranges.
    for j in range(TB):
        tb = TB - 1 - j                   # bwd walks its chunk in reverse
        hh = jnp.dot(
            jnp.concatenate([h_f, h_b], axis=-1).astype(jnp.bfloat16),
            w_hhd, preferred_element_type=jnp.float32)        # (B, 8H)
        h_f, c_f = gate_act(gin_f[j] + hh[:, :4 * H], c_f)
        h_b, c_b = gate_act(gin_b[tb] + hh[:, 4 * H:], c_b)
        hs_f[j] = h_f
        hs_b[tb] = h_b

    hf_sc[...], cf_sc[...] = h_f, c_f
    hb_sc[...], cb_sc[...] = h_b, c_b

    # Lane-dense (B, TB*H) chunk activations -> K-tiled partial of the Linear.
    out_f = jnp.concatenate(hs_f, axis=-1).astype(jnp.bfloat16)
    out_b = jnp.concatenate(hs_b, axis=-1).astype(jnp.bfloat16)
    acc_sc[...] += (
        jnp.dot(out_f, wlf_ref[...], preferred_element_type=jnp.float32)
        + jnp.dot(out_b, wlb_ref[...], preferred_element_type=jnp.float32))

    @pl.when(s == pl.num_programs(0) - 1)
    def _():
        y_ref[...] = acc_sc[...] + b_lin_ref[...]


def rnn_forward(x, params, *, hidden, time_block):
    """x: (B, T, I) batch_first f32, like the PyTorch module.  Returns (B, O)."""
    B, T, I = x.shape
    H = hidden
    TB = time_block
    assert T % TB == 0
    assert TB % 8 == 0 or TB == T          # sublane-aligned x time blocks
    assert (TB * H) % 128 == 0             # lane-dense chunk / W_lin tiles
    nc = T // TB
    O = params["b_lin"].shape[-1]
    G = 4 * H

    kernel = functools.partial(_bilstm_linear_kernel, hidden=H, time_block=TB)
    return pl.pallas_call(
        kernel,
        out_shape=jax.ShapeDtypeStruct((B, O), jnp.float32),
        grid_spec=pltpu.PrefetchScalarGridSpec(
            num_scalar_prefetch=0,
            grid=(nc,),
            in_specs=[
                # x passed twice: fwd reads time chunk s, bwd reads chunk nc-1-s.
                pl.BlockSpec((B, TB, I), lambda s: (0, s, 0)),
                pl.BlockSpec((B, TB, I), lambda s: (0, nc - 1 - s, 0)),
                pl.BlockSpec((2, I, G), lambda s: (0, 0, 0)),       # resident W_ih^T
                pl.BlockSpec((2 * H, 8 * H), lambda s: (0, 0)),     # resident blkdiag W_hh^T
                pl.BlockSpec((2, 1, G), lambda s: (0, 0, 0)),       # resident bias
                pl.BlockSpec((TB * H, O), lambda s: (s, 0)),        # Linear K-tile (fwd)
                pl.BlockSpec((TB * H, O), lambda s: (nc - 1 - s, 0)),  # Linear K-tile (bwd)
                pl.BlockSpec((1, O), lambda s: (0, 0)),             # Linear bias
            ],
            out_specs=pl.BlockSpec((B, O), lambda s: (0, 0)),
            scratch_shapes=[pltpu.VMEM((B, H), jnp.float32)] * 4
                           + [pltpu.VMEM((B, O), jnp.float32)],
        ),
        compiler_params=pltpu.CompilerParams(
            dimension_semantics=("arbitrary",),
            vmem_limit_bytes=VMEM_LIMIT_BYTES),
    )(x, x, params["w_ihT"], params["w_hh_bd"], params["b_lstm"],
      params["w_lin_f"], params["w_lin_b"], params["b_lin"])


# ----------------------------------------------------------------------------
# Parameters: PyTorch layout -> kernel layout.
# ----------------------------------------------------------------------------
def init_torch_params(key, input_size, hidden, seq_len, output_size):
    k = jax.random.split(key, 6)
    s_lstm = 1.0 / (hidden ** 0.5)
    fan_in = hidden * 2 * seq_len
    s_lin = 1.0 / (fan_in ** 0.5)
    u = lambda kk, shape, s: jax.random.uniform(kk, shape, jnp.float32, -s, s)
    return {
        "w_ih": u(k[0], (2, 4 * hidden, input_size), s_lstm),   # (4H, I) / dir
        "w_hh": u(k[1], (2, 4 * hidden, hidden), s_lstm),       # (4H, H) / dir
        "b_ih": u(k[2], (2, 4 * hidden), s_lstm),
        "b_hh": u(k[3], (2, 4 * hidden), s_lstm),
        "w_lin": u(k[4], (output_size, fan_in), s_lin),          # (O, T*2H)
        "b_lin": u(k[5], (output_size,), s_lin),
    }


def convert_params(p, hidden, seq_len):
    H = hidden
    O = p["w_lin"].shape[0]
    # Block-diagonal recurrent weight: [h_f | h_b] @ diag(W_hh_f^T, W_hh_b^T).
    w_hh_bd = jnp.zeros((2 * H, 8 * H), jnp.float32)
    w_hh_bd = w_hh_bd.at[:H, :4 * H].set(p["w_hh"][0].T)
    w_hh_bd = w_hh_bd.at[H:, 4 * H:].set(p["w_hh"][1].T)
    # Linear weight: flat index in PyTorch .view(B, -1) is t*2H + d*H + h.
    w4 = p["w_lin"].reshape(O, seq_len, 2, H)
    w_lin_f = jnp.transpose(w4[:, :, 0, :].reshape(O, -1))      # (T*H, O)
    w_lin_b = jnp.transpose(w4[:, :, 1, :].reshape(O, -1))      # (T*H, O)
    return {
        "w_ihT": jnp.transpose(p["w_ih"], (0, 2, 1)).astype(jnp.bfloat16),  # (2, I, 4H)
        "w_hh_bd": w_hh_bd.astype(jnp.bfloat16),                            # (2H, 8H)
        "b_lstm": (p["b_ih"] + p["b_hh"]).reshape(2, 1, 4 * H),             # f32
        "w_lin_f": w_lin_f.astype(jnp.bfloat16),
        "w_lin_b": w_lin_b.astype(jnp.bfloat16),
        "b_lin": p["b_lin"].reshape(1, O),                                  # f32
    }


# ----------------------------------------------------------------------------
# Pure-JAX f32 reference (PyTorch semantics) for validation.
# ----------------------------------------------------------------------------
def rnn_reference(x, p, hidden):
    B, T, I = x.shape
    H = hidden

    def run_dir(d, xs):
        w_ih, w_hh = p["w_ih"][d], p["w_hh"][d]
        b = p["b_ih"][d] + p["b_hh"][d]

        def step(carry, x_t):
            h, c = carry
            g = x_t @ w_ih.T + h @ w_hh.T + b
            i_g = jax.nn.sigmoid(g[:, 0 * H:1 * H])
            f_g = jax.nn.sigmoid(g[:, 1 * H:2 * H])
            g_g = jnp.tanh(g[:, 2 * H:3 * H])
            o_g = jax.nn.sigmoid(g[:, 3 * H:4 * H])
            c = f_g * c + i_g * g_g
            h = o_g * jnp.tanh(c)
            return (h, c), h

        init = (jnp.zeros((B, H), jnp.float32), jnp.zeros((B, H), jnp.float32))
        return jax.lax.scan(step, init, xs)[1]               # (T, B, H)

    xs = jnp.transpose(x, (1, 0, 2))                         # time-major
    hs_f = run_dir(0, xs)
    hs_b = run_dir(1, xs[::-1])[::-1]
    out = jnp.concatenate([hs_f, hs_b], axis=-1)             # (T, B, 2H)
    out = jnp.transpose(out, (1, 0, 2)).reshape(B, -1)       # (B, T*2H)
    return out @ p["w_lin"].T + p["b_lin"]


if __name__ == "__main__":
    # Small stand-ins for the original constants (BATCH_SIZE=128, EMBEDDING_SIZE=1024)
    BATCH = 8        # batch size
    SEQ = 16         # sequence length (== EMBEDDING_SIZE in the original module)
    INPUT = 16       # input_size
    HIDDEN = 32      # hidden_size  (4H = 128, lane-aligned)
    OUTPUT = 4       # output_size
    TIME_BLOCK = 8   # timesteps per grid step (multiple of 8; TB*H = 256 lanes)

    key = jax.random.PRNGKey(0)
    k_x, k_p = jax.random.split(key)
    x = jax.random.normal(k_x, (BATCH, SEQ, INPUT), jnp.float32)
    tparams = init_torch_params(k_p, INPUT, HIDDEN, SEQ, OUTPUT)
    kparams = convert_params(tparams, HIDDEN, SEQ)

    fwd = jax.jit(functools.partial(rnn_forward, hidden=HIDDEN,
                                    time_block=TIME_BLOCK))
    y = fwd(x, kparams)
    jax.block_until_ready(y)
    assert y.shape == (BATCH, OUTPUT)

    # Validate against the f32 reference (bf16 matmul inputs -> loose tolerance).
    y_ref = rnn_reference(x, tparams, HIDDEN)
    max_err = float(jnp.max(jnp.abs(y - y_ref)))
    assert jnp.allclose(y, y_ref, atol=5e-2, rtol=5e-2), max_err
    print("KERNEL_OK")
</pallas_src>

<mosaic_0001>
module attributes {stable_mosaic.version = 11 : i64} {
  func.func @_bilstm_linear_kernel(%arg0: i32, %arg1: memref<8x8x16xf32, #tpu.memory_space<vmem>>, %arg2: memref<8x8x16xf32, #tpu.memory_space<vmem>>, %arg3: memref<2x16x128xbf16, #tpu.memory_space<vmem>>, %arg4: memref<64x256xbf16, #tpu.memory_space<vmem>>, %arg5: memref<2x1x128xf32, #tpu.memory_space<vmem>>, %arg6: memref<256x4xbf16, #tpu.memory_space<vmem>>, %arg7: memref<256x4xbf16, #tpu.memory_space<vmem>>, %arg8: memref<1x4xf32, #tpu.memory_space<vmem>>, %arg9: memref<8x4xf32, #tpu.memory_space<vmem>>, %arg10: memref<8x32xf32, #tpu.memory_space<vmem>>, %arg11: memref<8x32xf32, #tpu.memory_space<vmem>>, %arg12: memref<8x32xf32, #tpu.memory_space<vmem>>, %arg13: memref<8x32xf32, #tpu.memory_space<vmem>>, %arg14: memref<8x4xf32, #tpu.memory_space<vmem>>) attributes {dimension_semantics = [#tpu.dimension_semantics<arbitrary>], iteration_bounds = array<i64: 2>, scalar_prefetch = 0 : i64, scratch_operands = 5 : i64, tpu.core_type = #tpu.core_type<tc>, window_params = [{transform_indices = @transform_0, window_bounds = array<i64: 8, 8, 16>}, {transform_indices = @transform_1, window_bounds = array<i64: 8, 8, 16>}, {pipeline_mode = #tpu.pipeline_mode<synchronous>, transform_indices = @transform_2, window_bounds = array<i64: 2, 16, 128>}, {pipeline_mode = #tpu.pipeline_mode<synchronous>, transform_indices = @transform_3, window_bounds = array<i64: 64, 256>}, {pipeline_mode = #tpu.pipeline_mode<synchronous>, transform_indices = @transform_4, window_bounds = array<i64: 2, 1, 128>}, {transform_indices = @transform_5, window_bounds = array<i64: 256, 4>}, {transform_indices = @transform_6, window_bounds = array<i64: 256, 4>}, {pipeline_mode = #tpu.pipeline_mode<synchronous>, transform_indices = @transform_7, window_bounds = array<i64: 1, 4>}, {pipeline_mode = #tpu.pipeline_mode<synchronous>, transform_indices = @transform_8, window_bounds = array<i64: 8, 4>}]} {
    %c0_i32 = arith.constant 0 : i32
    %0 = arith.cmpi eq, %arg0, %c0_i32 : i32
    %1 = arith.extui %0 : i1 to i32
    %c0_i32_0 = arith.constant 0 : i32
    %2 = arith.cmpi ne, %1, %c0_i32_0 : i32
    scf.if %2 {
      %cst_153 = arith.constant 0.000000e+00 : f32
      %587 = vector.broadcast %cst_153 : f32 to vector<8x32xf32>
      %c0_154 = arith.constant 0 : index
      %c0_155 = arith.constant 0 : index
      %588 = vector.load %arg10[%c0_154, %c0_155] : memref<8x32xf32, #tpu.memory_space<vmem>>, vector<8x32xf32>
      tpu.vector_store %arg10[%c0_154, %c0_155], %587 {strides = array<i32>} : memref<8x32xf32, #tpu.memory_space<vmem>>, vector<8x32xf32>,
      %cst_156 = arith.constant 0.000000e+00 : f32
      %589 = vector.broadcast %cst_156 : f32 to vector<8x32xf32>
      %c0_157 = arith.constant 0 : index
      %c0_158 = arith.constant 0 : index
      %590 = vector.load %arg11[%c0_157, %c0_158] : memref<8x32xf32, #tpu.memory_space<vmem>>, vector<8x32xf32>
      tpu.vector_store %arg11[%c0_157, %c0_158], %589 {strides = array<i32>} : memref<8x32xf32, #tpu.memory_space<vmem>>, vector<8x32xf32>,
      %cst_159 = arith.constant 0.000000e+00 : f32
      %591 = vector.broadcast %cst_159 : f32 to vector<8x32xf32>
      %c0_160 = arith.constant 0 : index
      %c0_161 = arith.constant 0 : index
      %592 = vector.load %arg12[%c0_160, %c0_161] : memref<8x32xf32, #tpu.memory_space<vmem>>, vector<8x32xf32>
      tpu.vector_store %arg12[%c0_160, %c0_161], %591 {strides = array<i32>} : memref<8x32xf32, #tpu.memory_space<vmem>>, vector<8x32xf32>,
      %cst_162 = arith.constant 0.000000e+00 : f32
      %593 = vector.broadcast %cst_162 : f32 to vector<8x32xf32>
      %c0_163 = arith.constant 0 : index
      %c0_164 = arith.constant 0 : index
      %594 = vector.load %arg13[%c0_163, %c0_164] : memref<8x32xf32, #tpu.memory_space<vmem>>, vector<8x32xf32>
      tpu.vector_store %arg13[%c0_163, %c0_164], %593 {strides = array<i32>} : memref<8x32xf32, #tpu.memory_space<vmem>>, vector<8x32xf32>,
      %cst_165 = arith.constant 0.000000e+00 : f32
      %595 = vector.broadcast %cst_165 : f32 to vector<8x4xf32>
      %c0_166 = arith.constant 0 : index
      %c0_167 = arith.constant 0 : index
      %596 = vector.load %arg14[%c0_166, %c0_167] : memref<8x4xf32, #tpu.memory_space<vmem>>, vector<8x4xf32>
      tpu.vector_store %arg14[%c0_166, %c0_167], %595 {strides = array<i32>} : memref<8x4xf32, #tpu.memory_space<vmem>>, vector<8x4xf32>,
    } else {
    }
    %c0 = arith.constant 0 : index
    %c0_1 = arith.constant 0 : index
    %c0_2 = arith.constant 0 : index
    %3 = vector.load %arg3[%c0, %c0_1, %c0_2] : memref<2x16x128xbf16, #tpu.memory_space<vmem>>, vector<1x16x128xbf16>
    %4 = vector.shape_cast %3 : vector<1x16x128xbf16> to vector<16x128xbf16>
    %c1 = arith.constant 1 : index
    %c0_3 = arith.constant 0 : index
    %c0_4 = arith.constant 0 : index
    %5 = vector.load %arg3[%c1, %c0_3, %c0_4] : memref<2x16x128xbf16, #tpu.memory_space<vmem>>, vector<1x16x128xbf16>
    %6 = vector.shape_cast %5 : vector<1x16x128xbf16> to vector<16x128xbf16>
    %c0_5 = arith.constant 0 : index
    %c0_6 = arith.constant 0 : index
    %7 = vector.load %arg4[%c0_5, %c0_6] : memref<64x256xbf16, #tpu.memory_space<vmem>>, vector<64x256xbf16>
    %c0_7 = arith.constant 0 : index
    %c0_8 = arith.constant 0 : index
    %c0_9 = arith.constant 0 : index
    %8 = vector.load %arg5[%c0_7, %c0_8, %c0_9] : memref<2x1x128xf32, #tpu.memory_space<vmem>>, vector<1x1x128xf32>
    %9 = vector.shape_cast %8 : vector<1x1x128xf32> to vector<1x128xf32>
    %c1_10 = arith.constant 1 : index
    %c0_11 = arith.constant 0 : index
    %c0_12 = arith.constant 0 : index
    %10 = vector.load %arg5[%c1_10, %c0_11, %c0_12] : memref<2x1x128xf32, #tpu.memory_space<vmem>>, vector<1x1x128xf32>
    %11 = vector.shape_cast %10 : vector<1x1x128xf32> to vector<1x128xf32>
    %c0_13 = arith.constant 0 : index
    %c0_14 = arith.constant 0 : index
    %c0_15 = arith.constant 0 : index
    %12 = vector.load %arg1[%c0_13, %c0_14, %c0_15] : memref<8x8x16xf32, #tpu.memory_space<vmem>>, vector<8x1x16xf32>
    %13 = vector.shape_cast %12 : vector<8x1x16xf32> to vector<8x16xf32>
    %14 = arith.truncf %13 : vector<8x16xf32> to vector<8x16xbf16>
    %cst = arith.constant dense<0.000000e+00> : vector<8x128xf32>
    %15 = tpu.matmul %14, %4, %cst {dimension_numbers = #tpu.dot_dimension_numbers<[1], [0], [0], [1], [0, 0, 1, 1], [], []>} : vector<8x16xbf16>, vector<16x128xbf16>, vector<8x128xf32> -> vector<8x128xf32>
    %16 = vector.broadcast %9 : vector<1x128xf32> to vector<8x128xf32>
    %17 = arith.addf %15, %16 : vector<8x128xf32>
    %c0_16 = arith.constant 0 : index
    %c1_17 = arith.constant 1 : index
    %c0_18 = arith.constant 0 : index
    %18 = vector.load %arg1[%c0_16, %c1_17, %c0_18] : memref<8x8x16xf32, #tpu.memory_space<vmem>>, vector<8x1x16xf32>
    %19 = vector.shape_cast %18 : vector<8x1x16xf32> to vector<8x16xf32>
    %20 = arith.truncf %19 : vector<8x16xf32> to vector<8x16xbf16>
    %cst_19 = arith.constant dense<0.000000e+00> : vector<8x128xf32>
    %21 = tpu.matmul %20, %4, %cst_19 {dimension_numbers = #tpu.dot_dimension_numbers<[1], [0], [0], [1], [0, 0, 1, 1], [], []>} : vector<8x16xbf16>, vector<16x128xbf16>, vector<8x128xf32> -> vector<8x128xf32>
    %22 = vector.broadcast %9 : vector<1x128xf32> to vector<8x128xf32>
    %23 = arith.addf %21, %22 : vector<8x128xf32>
    %c0_20 = arith.constant 0 : index
    %c2 = arith.constant 2 : index
    %c0_21 = arith.constant 0 : index
    %24 = vector.load %arg1[%c0_20, %c2, %c0_21] : memref<8x8x16xf32, #tpu.memory_space<vmem>>, vector<8x1x16xf32>
    %25 = vector.shape_cast %24 : vector<8x1x16xf32> to vector<8x16xf32>
    %26 = arith.truncf %25 : vector<8x16xf32> to vector<8x16xbf16>
    %cst_22 = arith.constant dense<0.000000e+00> : vector<8x128xf32>
    %27 = tpu.matmul %26, %4, %cst_22 {dimension_numbers = #tpu.dot_dimension_numbers<[1], [0], [0], [1], [0, 0, 1, 1], [], []>} : vector<8x16xbf16>, vector<16x128xbf16>, vector<8x128xf32> -> vector<8x128xf32>
    %28 = vector.broadcast %9 : vector<1x128xf32> to vector<8x128xf32>
    %29 = arith.addf %27, %28 : vector<8x128xf32>
    %c0_23 = arith.constant 0 : index
    %c3 = arith.constant 3 : index
    %c0_24 = arith.constant 0 : index
    %30 = vector.load %arg1[%c0_23, %c3, %c0_24] : memref<8x8x16xf32, #tpu.memory_space<vmem>>, vector<8x1x16xf32>
    %31 = vector.shape_cast %30 : vector<8x1x16xf32> to vector<8x16xf32>
    %32 = arith.truncf %31 : vector<8x16xf32> to vector<8x16xbf16>
    %cst_25 = arith.constant dense<0.000000e+00> : vector<8x128xf32>
    %33 = tpu.matmul %32, %4, %cst_25 {dimension_numbers = #tpu.dot_dimension_numbers<[1], [0], [0], [1], [0, 0, 1, 1], [], []>} : vector<8x16xbf16>, vector<16x128xbf16>, vector<8x128xf32> -> vector<8x128xf32>
    %34 = vector.broadcast %9 : vector<1x128xf32> to vector<8x128xf32>
    %35 = arith.addf %33, %34 : vector<8x128xf32>
    %c0_26 = arith.constant 0 : index
    %c4 = arith.constant 4 : index
    %c0_27 = arith.constant 0 : index
    %36 = vector.load %arg1[%c0_26, %c4, %c0_27] : memref<8x8x16xf32, #tpu.memory_space<vmem>>, vector<8x1x16xf32>
    %37 = vector.shape_cast %36 : vector<8x1x16xf32> to vector<8x16xf32>
    %38 = arith.truncf %37 : vector<8x16xf32> to vector<8x16xbf16>
    %cst_28 = arith.constant dense<0.000000e+00> : vector<8x128xf32>
    %39 = tpu.matmul %38, %4, %cst_28 {dimension_numbers = #tpu.dot_dimension_numbers<[1], [0], [0], [1], [0, 0, 1, 1], [], []>} : vector<8x16xbf16>, vector<16x128xbf16>, vector<8x128xf32> -> vector<8x128xf32>
    %40 = vector.broadcast %9 : vector<1x128xf32> to vector<8x128xf32>
    %41 = arith.addf %39, %40 : vector<8x128xf32>
    %c0_29 = arith.constant 0 : index
    %c5 = arith.constant 5 : index
    %c0_30 = arith.constant 0 : index
    %42 = vector.load %arg1[%c0_29, %c5, %c0_30] : memref<8x8x16xf32, #tpu.memory_space<vmem>>, vector<8x1x16xf32>
    %43 = vector.shape_cast %42 : vector<8x1x16xf32> to vector<8x16xf32>
    %44 = arith.truncf %43 : vector<8x16xf32> to vector<8x16xbf16>
    %cst_31 = arith.constant dense<0.000000e+00> : vector<8x128xf32>
    %45 = tpu.matmul %44, %4, %cst_31 {dimension_numbers = #tpu.dot_dimension_numbers<[1], [0], [0], [1], [0, 0, 1, 1], [], []>} : vector<8x16xbf16>, vector<16x128xbf16>, vector<8x128xf32> -> vector<8x128xf32>
    %46 = vector.broadcast %9 : vector<1x128xf32> to vector<8x128xf32>
    %47 = arith.addf %45, %46 : vector<8x128xf32>
    %c0_32 = arith.constant 0 : index
    %c6 = arith.constant 6 : index
    %c0_33 = arith.constant 0 : index
    %48 = vector.load %arg1[%c0_32, %c6, %c0_33] : memref<8x8x16xf32, #tpu.memory_space<vmem>>, vector<8x1x16xf32>
    %49 = vector.shape_cast %48 : vector<8x1x16xf32> to vector<8x16xf32>
    %50 = arith.truncf %49 : vector<8x16xf32> to vector<8x16xbf16>
    %cst_34 = arith.constant dense<0.000000e+00> : vector<8x128xf32>
    %51 = tpu.matmul %50, %4, %cst_34 {dimension_numbers = #tpu.dot_dimension_numbers<[1], [0], [0], [1], [0, 0, 1, 1], [], []>} : vector<8x16xbf16>, vector<16x128xbf16>, vector<8x128xf32> -> vector<8x128xf32>
    %52 = vector.broadcast %9 : vector<1x128xf32> to vector<8x128xf32>
    %53 = arith.addf %51, %52 : vector<8x128xf32>
    %c0_35 = arith.constant 0 : index
    %c7 = arith.constant 7 : index
    %c0_36 = arith.constant 0 : index
    %54 = vector.load %arg1[%c0_35, %c7, %c0_36] : memref<8x8x16xf32, #tpu.memory_space<vmem>>, vector<8x1x16xf32>
    %55 = vector.shape_cast %54 : vector<8x1x16xf32> to vector<8x16xf32>
    %56 = arith.truncf %55 : vector<8x16xf32> to vector<8x16xbf16>
    %cst_37 = arith.constant dense<0.000000e+00> : vector<8x128xf32>
    %57 = tpu.matmul %56, %4, %cst_37 {dimension_numbers = #tpu.dot_dimension_numbers<[1], [0], [0], [1], [0, 0, 1, 1], [], []>} : vector<8x16xbf16>, vector<16x128xbf16>, vector<8x128xf32> -> vector<8x128xf32>
    %58 = vector.broadcast %9 : vector<1x128xf32> to vector<8x128xf32>
    %59 = arith.addf %57, %58 : vector<8x128xf32>
    %c0_38 = arith.constant 0 : index
    %c0_39 = arith.constant 0 : index
    %c0_40 = arith.constant 0 : index
    %60 = vector.load %arg2[%c0_38, %c0_39, %c0_40] : memref<8x8x16xf32, #tpu.memory_space<vmem>>, vector<8x1x16xf32>
    %61 = vector.shape_cast %60 : vector<8x1x16xf32> to vector<8x16xf32>
    %62 = arith.truncf %61 : vector<8x16xf32> to vector<8x16xbf16>
    %cst_41 = arith.constant dense<0.000000e+00> : vector<8x128xf32>
    %63 = tpu.matmul %62, %6, %cst_41 {dimension_numbers = #tpu.dot_dimension_numbers<[1], [0], [0], [1], [0, 0, 1, 1], [], []>} : vector<8x16xbf16>, vector<16x128xbf16>, vector<8x128xf32> -> vector<8x128xf32>
    %64 = vector.broadcast %11 : vector<1x128xf32> to vector<8x128xf32>
    %65 = arith.addf %63, %64 : vector<8x128xf32>
    %c0_42 = arith.constant 0 : index
    %c1_43 = arith.constant 1 : index
    %c0_44 = arith.constant 0 : index
    %66 = vector.load %arg2[%c0_42, %c1_43, %c0_44] : memref<8x8x16xf32, #tpu.memory_space<vmem>>, vector<8x1x16xf32>
    %67 = vector.shape_cast %66 : vector<8x1x16xf32> to vector<8x16xf32>
    %68 = arith.truncf %67 : vector<8x16xf32> to vector<8x16xbf16>
    %cst_45 = arith.constant dense<0.000000e+00> : vector<8x128xf32>
    %69 = tpu.matmul %68, %6, %cst_45 {dimension_numbers = #tpu.dot_dimension_numbers<[1], [0], [0], [1], [0, 0, 1, 1], [], []>} : vector<8x16xbf16>, vector<16x128xbf16>, vector<8x128xf32> -> vector<8x128xf32>
    %70 = vector.broadcast %11 : vector<1x128xf32> to vector<8x128xf32>
    %71 = arith.addf %69, %70 : vector<8x128xf32>
    %c0_46 = arith.constant 0 : index
    %c2_47 = arith.constant 2 : index
    %c0_48 = arith.constant 0 : index
    %72 = vector.load %arg2[%c0_46, %c2_47, %c0_48] : memref<8x8x16xf32, #tpu.memory_space<vmem>>, vector<8x1x16xf32>
    %73 = vector.shape_cast %72 : vector<8x1x16xf32> to vector<8x16xf32>
    %74 = arith.truncf %73 : vector<8x16xf32> to vector<8x16xbf16>
    %cst_49 = arith.constant dense<0.000000e+00> : vector<8x128xf32>
    %75 = tpu.matmul %74, %6, %cst_49 {dimension_numbers = #tpu.dot_dimension_numbers<[1], [0], [0], [1], [0, 0, 1, 1], [], []>} : vector<8x16xbf16>, vector<16x128xbf16>, vector<8x128xf32> -> vector<8x128xf32>
    %76 = vector.broadcast %11 : vector<1x128xf32> to vector<8x128xf32>
    %77 = arith.addf %75, %76 : vector<8x128xf32>
    %c0_50 = arith.constant 0 : index
    %c3_51 = arith.constant 3 : index
    %c0_52 = arith.constant 0 : index
    %78 = vector.load %arg2[%c0_50, %c3_51, %c0_52] : memref<8x8x16xf32, #tpu.memory_space<vmem>>, vector<8x1x16xf32>
    %79 = vector.shape_cast %78 : vector<8x1x16xf32> to vector<8x16xf32>
    %80 = arith.truncf %79 : vector<8x16xf32> to vector<8x16xbf16>
    %cst_53 = arith.constant dense<0.000000e+00> : vector<8x128xf32>
    %81 = tpu.matmul %80, %6, %cst_53 {dimension_numbers = #tpu.dot_dimension_numbers<[1], [0], [0], [1], [0, 0, 1, 1], [], []>} : vector<8x16xbf16>, vector<16x128xbf16>, vector<8x128xf32> -> vector<8x128xf32>
    %82 = vector.broadcast %11 : vector<1x128xf32> to vector<8x128xf32>
    %83 = arith.addf %81, %82 : vector<8x128xf32>
    %c0_54 = arith.constant 0 : index
    %c4_55 = arith.constant 4 : index
    %c0_56 = arith.constant 0 : index
    %84 = vector.load %arg2[%c0_54, %c4_55, %c0_56] : memref<8x8x16xf32, #tpu.memory_space<vmem>>, vector<8x1x16xf32>
    %85 = vector.shape_cast %84 : vector<8x1x16xf32> to vector<8x16xf32>
    %86 = arith.truncf %85 : vector<8x16xf32> to vector<8x16xbf16>
    %cst_57 = arith.constant dense<0.000000e+00> : vector<8x128xf32>
    %87 = tpu.matmul %86, %6, %cst_57 {dimension_numbers = #tpu.dot_dimension_numbers<[1], [0], [0], [1], [0, 0, 1, 1], [], []>} : vector<8x16xbf16>, vector<16x128xbf16>, vector<8x128xf32> -> vector<8x128xf32>
    %88 = vector.broadcast %11 : vector<1x128xf32> to vector<8x128xf32>
    %89 = arith.addf %87, %88 : vector<8x128xf32>
    %c0_58 = arith.constant 0 : index
    %c5_59 = arith.constant 5 : index
    %c0_60 = arith.constant 0 : index
    %90 = vector.load %arg2[%c0_58, %c5_59, %c0_60] : memref<8x8x16xf32, #tpu.memory_space<vmem>>, vector<8x1x16xf32>
    %91 = vector.shape_cast %90 : vector<8x1x16xf32> to vector<8x16xf32>
    %92 = arith.truncf %91 : vector<8x16xf32> to vector<8x16xbf16>
    %cst_61 = arith.constant dense<0.000000e+00> : vector<8x128xf32>
    %93 = tpu.matmul %92, %6, %cst_61 {dimension_numbers = #tpu.dot_dimension_numbers<[1], [0], [0], [1], [0, 0, 1, 1], [], []>} : vector<8x16xbf16>, vector<16x128xbf16>, vector<8x128xf32> -> vector<8x128xf32>
    %94 = vector.broadcast %11 : vector<1x128xf32> to vector<8x128xf32>
    %95 = arith.addf %93, %94 : vector<8x128xf32>
    %c0_62 = arith.constant 0 : index
    %c6_63 = arith.constant 6 : index
    %c0_64 = arith.constant 0 : index
    %96 = vector.load %arg2[%c0_62, %c6_63, %c0_64] : memref<8x8x16xf32, #tpu.memory_space<vmem>>, vector<8x1x16xf32>
    %97 = vector.shape_cast %96 : vector<8x1x16xf32> to vector<8x16xf32>
    %98 = arith.truncf %97 : vector<8x16xf32> to vector<8x16xbf16>
    %cst_65 = arith.constant dense<0.000000e+00> : vector<8x128xf32>
    %99 = tpu.matmul %98, %6, %cst_65 {dimension_numbers = #tpu.dot_dimension_numbers<[1], [0], [0], [1], [0, 0, 1, 1], [], []>} : vector<8x16xbf16>, vector<16x128xbf16>, vector<8x128xf32> -> vector<8x128xf32>
    %100 = vector.broadcast %11 : vector<1x128xf32> to vector<8x128xf32>
    %101 = arith.addf %99, %100 : vector<8x128xf32>
    %c0_66 = arith.constant 0 : index
    %c7_67 = arith.constant 7 : index
    %c0_68 = arith.constant 0 : index
    %102 = vector.load %arg2[%c0_66, %c7_67, %c0_68] : memref<8x8x16xf32, #tpu.memory_space<vmem>>, vector<8x1x16xf32>
    %103 = vector.shape_cast %102 : vector<8x1x16xf32> to vector<8x16xf32>
    %104 = arith.truncf %103 : vector<8x16xf32> to vector<8x16xbf16>
    %cst_69 = arith.constant dense<0.000000e+00> : vector<8x128xf32>
    %105 = tpu.matmul %104, %6, %cst_69 {dimension_numbers = #tpu.dot_dimension_numbers<[1], [0], [0], [1], [0, 0, 1, 1], [], []>} : vector<8x16xbf16>, vector<16x128xbf16>, vector<8x128xf32> -> vector<8x128xf32>
    %106 = vector.broadcast %11 : vector<1x128xf32> to vector<8x128xf32>
    %107 = arith.addf %105, %106 : vector<8x128xf32>
    %c0_70 = arith.constant 0 : index
    %c0_71 = arith.constant 0 : index
    %108 = vector.load %arg10[%c0_70, %c0_71] : memref<8x32xf32, #tpu.memory_space<vmem>>, vector<8x32xf32>
    %c0_72 = arith.constant 0 : index
    %c0_73 = arith.constant 0 : index
    %109 = vector.load %arg11[%c0_72, %c0_73] : memref<8x32xf32, #tpu.memory_space<vmem>>, vector<8x32xf32>
    %c0_74 = arith.constant 0 : index
    %c0_75 = arith.constant 0 : index
    %110 = vector.load %arg12[%c0_74, %c0_75] : memref<8x32xf32, #tpu.memory_space<vmem>>, vector<8x32xf32>
    %c0_76 = arith.constant 0 : index
    %c0_77 = arith.constant 0 : index
    %111 = vector.load %arg13[%c0_76, %c0_77] : memref<8x32xf32, #tpu.memory_space<vmem>>, vector<8x32xf32>
    %112 = tpu.concatenate %108, %110 in 1 : vector<8x32xf32>, vector<8x32xf32> -> vector<8x64xf32>
    %113 = arith.truncf %112 : vector<8x64xf32> to vector<8x64xbf16>
    %cst_78 = arith.constant dense<0.000000e+00> : vector<8x256xf32>
    %114 = tpu.matmul %113, %7, %cst_78 {dimension_numbers = #tpu.dot_dimension_numbers<[1], [0], [0], [1], [0, 0, 1, 1], [], []>} : vector<8x64xbf16>, vector<64x256xbf16>, vector<8x256xf32> -> vector<8x256xf32>
    %115 = vector.extract_strided_slice %114 {offsets = [0, 0], sizes = [8, 128], strides = [1, 1]} : vector<8x256xf32> to vector<8x128xf32>
    %116 = arith.addf %17, %115 : vector<8x128xf32>
    %117 = vector.extract_strided_slice %116 {offsets = [0, 0], sizes = [8, 32], strides = [1, 1]} : vector<8x128xf32> to vector<8x32xf32>
    %118 = arith.negf %117 : vector<8x32xf32>
    %119 = math.exp %118 : vector<8x32xf32>
    %cst_79 = arith.constant 1.000000e+00 : f32
    %120 = vector.broadcast %cst_79 : f32 to vector<8x32xf32>
    %121 = arith.addf %120, %119 : vector<8x32xf32>
    %122 = arith.divf %120, %121 : vector<8x32xf32>
    %123 = vector.extract_strided_slice %116 {offsets = [0, 32], sizes = [8, 32], strides = [1, 1]} : vector<8x128xf32> to vector<8x32xf32>
    %124 = arith.negf %123 : vector<8x32xf32>
    %125 = math.exp %124 : vector<8x32xf32>
    %cst_80 = arith.constant 1.000000e+00 : f32
    %126 = vector.broadcast %cst_80 : f32 to vector<8x32xf32>
    %127 = arith.addf %126, %125 : vector<8x32xf32>
    %128 = arith.divf %126, %127 : vector<8x32xf32>
    %129 = vector.extract_strided_slice %116 {offsets = [0, 64], sizes = [8, 32], strides = [1, 1]} : vector<8x128xf32> to vector<8x32xf32>
    %130 = math.tanh %129 : vector<8x32xf32>
    %131 = vector.extract_strided_slice %116 {offsets = [0, 96], sizes = [8, 32], strides = [1, 1]} : vector<8x128xf32> to vector<8x32xf32>
    %132 = arith.negf %131 : vector<8x32xf32>
    %133 = math.exp %132 : vector<8x32xf32>
    %cst_81 = arith.constant 1.000000e+00 : f32
    %134 = vector.broadcast %cst_81 : f32 to vector<8x32xf32>
    %135 = arith.addf %134, %133 : vector<8x32xf32>
    %136 = arith.divf %134, %135 : vector<8x32xf32>
    %137 = arith.mulf %128, %109 : vector<8x32xf32>
    %138 = arith.mulf %122, %130 : vector<8x32xf32>
    %139 = arith.addf %137, %138 : vector<8x32xf32>
    %140 = math.tanh %139 : vector<8x32xf32>
    %141 = arith.mulf %136, %140 : vector<8x32xf32>
    %142 = vector.extract_strided_slice %114 {offsets = [0, 128], sizes = [8, 128], strides = [1, 1]} : vector<8x256xf32> to vector<8x128xf32>
    %143 = arith.addf %107, %142 : vector<8x128xf32>
    %144 = vector.extract_strided_slice %143 {offsets = [0, 0], sizes = [8, 32], strides = [1, 1]} : vector<8x128xf32> to vector<8x32xf32>
    %145 = arith.negf %144 : vector<8x32xf32>
    %146 = math.exp %145 : vector<8x32xf32>
    %cst_82 = arith.constant 1.000000e+00 : f32
    %147 = vector.broadcast %cst_82 : f32 to vector<8x32xf32>
    %148 = arith.addf %147, %146 : vector<8x32xf32>
    %149 = arith.divf %147, %148 : vector<8x32xf32>
    %150 = vector.extract_strided_slice %143 {offsets = [0, 32], sizes = [8, 32], strides = [1, 1]} : vector<8x128xf32> to vector<8x32xf32>
    %151 = arith.negf %150 : vector<8x32xf32>
    %152 = math.exp %151 : vector<8x32xf32>
    %cst_83 = arith.constant 1.000000e+00 : f32
    %153 = vector.broadcast %cst_83 : f32 to vector<8x32xf32>
    %154 = arith.addf %153, %152 : vector<8x32xf32>
    %155 = arith.divf %153, %154 : vector<8x32xf32>
    %156 = vector.extract_strided_slice %143 {offsets = [0, 64], sizes = [8, 32], strides = [1, 1]} : vector<8x128xf32> to vector<8x32xf32>
    %157 = math.tanh %156 : vector<8x32xf32>
    %158 = vector.extract_strided_slice %143 {offsets = [0, 96], sizes = [8, 32], strides = [1, 1]} : vector<8x128xf32> to vector<8x32xf32>
    %159 = arith.negf %158 : vector<8x32xf32>
    %160 = math.exp %159 : vector<8x32xf32>
    %cst_84 = arith.constant 1.000000e+00 : f32
    %161 = vector.broadcast %cst_84 : f32 to vector<8x32xf32>
    %162 = arith.addf %161, %160 : vector<8x32xf32>
    %163 = arith.divf %161, %162 : vector<8x32xf32>
    %164 = arith.mulf %155, %111 : vector<8x32xf32>
    %165 = arith.mulf %149, %157 : vector<8x32xf32>
    %166 = arith.addf %164, %165 : vector<8x32xf32>
    %167 = math.tanh %166 : vector<8x32xf32>
    %168 = arith.mulf %163, %167 : vector<8x32xf32>
    %169 = tpu.concatenate %141, %168 in 1 : vector<8x32xf32>, vector<8x32xf32> -> vector<8x64xf32>
    %170 = arith.truncf %169 : vector<8x64xf32> to vector<8x64xbf16>
    %cst_85 = arith.constant dense<0.000000e+00> : vector<8x256xf32>
    %171 = tpu.matmul %170, %7, %cst_85 {dimension_numbers = #tpu.dot_dimension_numbers<[1], [0], [0], [1], [0, 0, 1, 1], [], []>} : vector<8x64xbf16>, vector<64x256xbf16>, vector<8x256xf32> -> vector<8x256xf32>
    %172 = vector.extract_strided_slice %171 {offsets = [0, 0], sizes = [8, 128], strides = [1, 1]} : vector<8x256xf32> to vector<8x128xf32>
    %173 = arith.addf %23, %172 : vector<8x128xf32>
    %174 = vector.extract_strided_slice %173 {offsets = [0, 0], sizes = [8, 32], strides = [1, 1]} : vector<8x128xf32> to vector<8x32xf32>
    %175 = arith.negf %174 : vector<8x32xf32>
    %176 = math.exp %175 : vector<8x32xf32>
    %cst_86 = arith.constant 1.000000e+00 : f32
    %177 = vector.broadcast %cst_86 : f32 to vector<8x32xf32>
    %178 = arith.addf %177, %176 : vector<8x32xf32>
    %179 = arith.divf %177, %178 : vector<8x32xf32>
    %180 = vector.extract_strided_slice %173 {offsets = [0, 32], sizes = [8, 32], strides = [1, 1]} : vector<8x128xf32> to vector<8x32xf32>
    %181 = arith.negf %180 : vector<8x32xf32>
    %182 = math.exp %181 : vector<8x32xf32>
    %cst_87 = arith.constant 1.000000e+00 : f32
    %183 = vector.broadcast %cst_87 : f32 to vector<8x32xf32>
    %184 = arith.addf %183, %182 : vector<8x32xf32>
    %185 = arith.divf %183, %184 : vector<8x32xf32>
    %186 = vector.extract_strided_slice %173 {offsets = [0, 64], sizes = [8, 32], strides = [1, 1]} : vector<8x128xf32> to vector<8x32xf32>
    %187 = math.tanh %186 : vector<8x32xf32>
    %188 = vector.extract_strided_slice %173 {offsets = [0, 96], sizes = [8, 32], strides = [1, 1]} : vector<8x128xf32> to vector<8x32xf32>
    %189 = arith.negf %188 : vector<8x32xf32>
    %190 = math.exp %189 : vector<8x32xf32>
    %cst_88 = arith.constant 1.000000e+00 : f32
    %191 = vector.broadcast %cst_88 : f32 to vector<8x32xf32>
    %192 = arith.addf %191, %190 : vector<8x32xf32>
    %193 = arith.divf %191, %192 : vector<8x32xf32>
    %194 = arith.mulf %185, %139 : vector<8x32xf32>
    %195 = arith.mulf %179, %187 : vector<8x32xf32>
    %196 = arith.addf %194, %195 : vector<8x32xf32>
    %197 = math.tanh %196 : vector<8x32xf32>
    %198 = arith.mulf %193, %197 : vector<8x32xf32>
    %199 = vector.extract_strided_slice %171 {offsets = [0, 128], sizes = [8, 128], strides = [1, 1]} : vector<8x256xf32> to vector<8x128xf32>
    %200 = arith.addf %101, %199 : vector<8x128xf32>
    %201 = vector.extract_strided_slice %200 {offsets = [0, 0], sizes = [8, 32], strides = [1, 1]} : vector<8x128xf32> to vector<8x32xf32>
    %202 = arith.negf %201 : vector<8x32xf32>
    %203 = math.exp %202 : vector<8x32xf32>
    %cst_89 = arith.constant 1.000000e+00 : f32
    %204 = vector.broadcast %cst_89 : f32 to vector<8x32xf32>
    %205 = arith.addf %204, %203 : vector<8x32xf32>
    %206 = arith.divf %204, %205 : vector<8x32xf32>
    %207 = vector.extract_strided_slice %200 {offsets = [0, 32], sizes = [8, 32], strides = [1, 1]} : vector<8x128xf32> to vector<8x32xf32>
    %208 = arith.negf %207 : vector<8x32xf32>
    %209 = math.exp %208 : vector<8x32xf32>
    %cst_90 = arith.constant 1.000000e+00 : f32
    %210 = vector.broadcast %cst_90 : f32 to vector<8x32xf32>
    %211 = arith.addf %210, %209 : vector<8x32xf32>
    %212 = arith.divf %210, %211 : vector<8x32xf32>
    %213 = vector.extract_strided_slice %200 {offsets = [0, 64], sizes = [8, 32], strides = [1, 1]} : vector<8x128xf32> to vector<8x32xf32>
    %214 = math.tanh %213 : vector<8x32xf32>
    %215 = vector.extract_strided_slice %200 {offsets = [0, 96], sizes = [8, 32], strides = [1, 1]} : vector<8x128xf32> to vector<8x32xf32>
    %216 = arith.negf %215 : vector<8x32xf32>
    %217 = math.exp %216 : vector<8x32xf32>
    %cst_91 = arith.constant 1.000000e+00 : f32
    %218 = vector.broadcast %cst_91 : f32 to vector<8x32xf32>
    %219 = arith.addf %218, %217 : vector<8x32xf32>
    %220 = arith.divf %218, %219 : vector<8x32xf32>
    %221 = arith.mulf %212, %166 : vector<8x32xf32>
    %222 = arith.mulf %206, %214 : vector<8x32xf32>
    %223 = arith.addf %221, %222 : vector<8x32xf32>
    %224 = math.tanh %223 : vector<8x32xf32>
    %225 = arith.mulf %220, %224 : vector<8x32xf32>
    %226 = tpu.concatenate %198, %225 in 1 : vector<8x32xf32>, vector<8x32xf32> -> vector<8x64xf32>
    %227 = arith.truncf %226 : vector<8x64xf32> to vector<8x64xbf16>
    %cst_92 = arith.constant dense<0.000000e+00> : vector<8x256xf32>
    %228 = tpu.matmul %227, %7, %cst_92 {dimension_numbers = #tpu.dot_dimension_numbers<[1], [0], [0], [1], [0, 0, 1, 1], [], []>} : vector<8x64xbf16>, vector<64x256xbf16>, vector<8x256xf32> -> vector<8x256xf32>
    %229 = vector.extract_strided_slice %228 {offsets = [0, 0], sizes = [8, 128], strides = [1, 1]} : vector<8x256xf32> to vector<8x128xf32>
    %230 = arith.addf %29, %229 : vector<8x128xf32>
    %231 = vector.extract_strided_slice %230 {offsets = [0, 0], sizes = [8, 32], strides = [1, 1]} : vector<8x128xf32> to vector<8x32xf32>
    %232 = arith.negf %231 : vector<8x32xf32>
    %233 = math.exp %232 : vector<8x32xf32>
    %cst_93 = arith.constant 1.000000e+00 : f32
    %234 = vector.broadcast %cst_93 : f32 to vector<8x32xf32>
    %235 = arith.addf %234, %233 : vector<8x32xf32>
    %236 = arith.divf %234, %235 : vector<8x32xf32>
    %237 = vector.extract_strided_slice %230 {offsets = [0, 32], sizes = [8, 32], strides = [1, 1]} : vector<8x128xf32> to vector<8x32xf32>
    %238 = arith.negf %237 : vector<8x32xf32>
    %239 = math.exp %238 : vector<8x32xf32>
    %cst_94 = arith.constant 1.000000e+00 : f32
    %240 = vector.broadcast %cst_94 : f32 to vector<8x32xf32>
    %241 = arith.addf %240, %239 : vector<8x32xf32>
    %242 = arith.divf %240, %241 : vector<8x32xf32>
    %243 = vector.extract_strided_slice %230 {offsets = [0, 64], sizes = [8, 32], strides = [1, 1]} : vector<8x128xf32> to vector<8x32xf32>
    %244 = math.tanh %243 : vector<8x32xf32>
    %245 = vector.extract_strided_slice %230 {offsets = [0, 96], sizes = [8, 32], strides = [1, 1]} : vector<8x128xf32> to vector<8x32xf32>
    %246 = arith.negf %245 : vector<8x32xf32>
    %247 = math.exp %246 : vector<8x32xf32>
    %cst_95 = arith.constant 1.000000e+00 : f32
    %248 = vector.broadcast %cst_95 : f32 to vector<8x32xf32>
    %249 = arith.addf %248, %247 : vector<8x32xf32>
    %250 = arith.divf %248, %249 : vector<8x32xf32>
    %251 = arith.mulf %242, %196 : vector<8x32xf32>
    %252 = arith.mulf %236, %244 : vector<8x32xf32>
    %253 = arith.addf %251, %252 : vector<8x32xf32>
    %254 = math.tanh %253 : vector<8x32xf32>
    %255 = arith.mulf %250, %254 : vector<8x32xf32>
    %256 = vector.extract_strided_slice %228 {offsets = [0, 128], sizes = [8, 128], strides = [1, 1]} : vector<8x256xf32> to vector<8x128xf32>
    %257 = arith.addf %95, %256 : vector<8x128xf32>
    %258 = vector.extract_strided_slice %257 {offsets = [0, 0], sizes = [8, 32], strides = [1, 1]} : vector<8x128xf32> to vector<8x32xf32>
    %259 = arith.negf %258 : vector<8x32xf32>
    %260 = math.exp %259 : vector<8x32xf32>
    %cst_96 = arith.constant 1.000000e+00 : f32
    %261 = vector.broadcast %cst_96 : f32 to vector<8x32xf32>
    %262 = arith.addf %261, %260 : vector<8x32xf32>
    %263 = arith.divf %261, %262 : vector<8x32xf32>
    %264 = vector.extract_strided_slice %257 {offsets = [0, 32], sizes = [8, 32], strides = [1, 1]} : vector<8x128xf32> to vector<8x32xf32>
    %265 = arith.negf %264 : vector<8x32xf32>
    %266 = math.exp %265 : vector<8x32xf32>
    %cst_97 = arith.constant 1.000000e+00 : f32
    %267 = vector.broadcast %cst_97 : f32 to vector<8x32xf32>
    %268 = arith.addf %267, %266 : vector<8x32xf32>
    %269 = arith.divf %267, %268 : vector<8x32xf32>
    %270 = vector.extract_strided_slice %257 {offsets = [0, 64], sizes = [8, 32], strides = [1, 1]} : vector<8x128xf32> to vector<8x32xf32>
    %271 = math.tanh %270 : vector<8x32xf32>
    %272 = vector.extract_strided_slice %257 {offsets = [0, 96], sizes = [8, 32], strides = [1, 1]} : vector<8x128xf32> to vector<8x32xf32>
    %273 = arith.negf %272 : vector<8x32xf32>
    %274 = math.exp %273 : vector<8x32xf32>
    %cst_98 = arith.constant 1.000000e+00 : f32
    %275 = vector.broadcast %cst_98 : f32 to vector<8x32xf32>
    %276 = arith.addf %275, %274 : vector<8x32xf32>
    %277 = arith.divf %275, %276 : vector<8x32xf32>
    %278 = arith.mulf %269, %223 : vector<8x32xf32>
    %279 = arith.mulf %263, %271 : vector<8x32xf32>
    %280 = arith.addf %278, %279 : vector<8x32xf32>
    %281 = math.tanh %280 : vector<8x32xf32>
    %282 = arith.mulf %277, %281 : vector<8x32xf32>
    %283 = tpu.concatenate %255, %282 in 1 : vector<8x32xf32>, vector<8x32xf32> -> vector<8x64xf32>
    %284 = arith.truncf %283 : vector<8x64xf32> to vector<8x64xbf16>
    %cst_99 = arith.constant dense<0.000000e+00> : vector<8x256xf32>
    %285 = tpu.matmul %284, %7, %cst_99 {dimension_numbers = #tpu.dot_dimension_numbers<[1], [0], [0], [1], [0, 0, 1, 1], [], []>} : vector<8x64xbf16>, vector<64x256xbf16>, vector<8x256xf32> -> vector<8x256xf32>
    %286 = vector.extract_strided_slice %285 {offsets = [0, 0], sizes = [8, 128], strides = [1, 1]} : vector<8x256xf32> to vector<8x128xf32>
    %287 = arith.addf %35, %286 : vector<8x128xf32>
    %288 = vector.extract_strided_slice %287 {offsets = [0, 0], sizes = [8, 32], strides = [1, 1]} : vector<8x128xf32> to vector<8x32xf32>
    %289 = arith.negf %288 : vector<8x32xf32>
    %290 = math.exp %289 : vector<8x32xf32>
    %cst_100 = arith.constant 1.000000e+00 : f32
    %291 = vector.broadcast %cst_100 : f32 to vector<8x32xf32>
    %292 = arith.addf %291, %290 : vector<8x32xf32>
    %293 = arith.divf %291, %292 : vector<8x32xf32>
    %294 = vector.extract_strided_slice %287 {offsets = [0, 32], sizes = [8, 32], strides = [1, 1]} : vector<8x128xf32> to vector<8x32xf32>
    %295 = arith.negf %294 : vector<8x32xf32>
    %296 = math.exp %295 : vector<8x32xf32>
    %cst_101 = arith.constant 1.000000e+00 : f32
    %297 = vector.broadcast %cst_101 : f32 to vector<8x32xf32>
    %298 = arith.addf %297, %296 : vector<8x32xf32>
    %299 = arith.divf %297, %298 : vector<8x32xf32>
    %300 = vector.extract_strided_slice %287 {offsets = [0, 64], sizes = [8, 32], strides = [1, 1]} : vector<8x128xf32> to vector<8x32xf32>
    %301 = math.tanh %300 : vector<8x32xf32>
    %302 = vector.extract_strided_slice %287 {offsets = [0, 96], sizes = [8, 32], strides = [1, 1]} : vector<8x128xf32> to vector<8x32xf32>
    %303 = arith.negf %302 : vector<8x32xf32>
    %304 = math.exp %303 : vector<8x32xf32>
    %cst_102 = arith.constant 1.000000e+00 : f32
    %305 = vector.broadcast %cst_102 : f32 to vector<8x32xf32>
    %306 = arith.addf %305, %304 : vector<8x32xf32>
    %307 = arith.divf %305, %306 : vector<8x32xf32>
    %308 = arith.mulf %299, %253 : vector<8x32xf32>
    %309 = arith.mulf %293, %301 : vector<8x32xf32>
    %310 = arith.addf %308, %309 : vector<8x32xf32>
    %311 = math.tanh %310 : vector<8x32xf32>
    %312 = arith.mulf %307, %311 : vector<8x32xf32>
    %313 = vector.extract_strided_slice %285 {offsets = [0, 128], sizes = [8, 128], strides = [1, 1]} : vector<8x256xf32> to vector<8x128xf32>
    %314 = arith.addf %89, %313 : vector<8x128xf32>
    %315 = vector.extract_strided_slice %314 {offsets = [0, 0], sizes = [8, 32], strides = [1, 1]} : vector<8x128xf32> to vector<8x32xf32>
    %316 = arith.negf %315 : vector<8x32xf32>
    %317 = math.exp %316 : vector<8x32xf32>
    %cst_103 = arith.constant 1.000000e+00 : f32
    %318 = vector.broadcast %cst_103 : f32 to vector<8x32xf32>
    %319 = arith.addf %318, %317 : vector<8x32xf32>
    %320 = arith.divf %318, %319 : vector<8x32xf32>
    %321 = vector.extract_strided_slice %314 {offsets = [0, 32], sizes = [8, 32], strides = [1, 1]} : vector<8x128xf32> to vector<8x32xf32>
    %322 = arith.negf %321 : vector<8x32xf32>
    %323 = math.exp %322 : vector<8x32xf32>
    %cst_104 = arith.constant 1.000000e+00 : f32
    %324 = vector.broadcast %cst_104 : f32 to vector<8x32xf32>
    %325 = arith.addf %324, %323 : vector<8x32xf32>
    %326 = arith.divf %324, %325 : vector<8x32xf32>
    %327 = vector.extract_strided_slice %314 {offsets = [0, 64], sizes = [8, 32], strides = [1, 1]} : vector<8x128xf32> to vector<8x32xf32>
    %328 = math.tanh %327 : vector<8x32xf32>
    %329 = vector.extract_strided_slice %314 {offsets = [0, 96], sizes = [8, 32], strides = [1, 1]} : vector<8x128xf32> to vector<8x32xf32>
    %330 = arith.negf %329 : vector<8x32xf32>
    %331 = math.exp %330 : vector<8x32xf32>
    %cst_105 = arith.constant 1.000000e+00 : f32
    %332 = vector.broadcast %cst_105 : f32 to vector<8x32xf32>
    %333 = arith.addf %332, %331 : vector<8x32xf32>
    %334 = arith.divf %332, %333 : vector<8x32xf32>
    %335 = arith.mulf %326, %280 : vector<8x32xf32>
    %336 = arith.mulf %320, %328 : vector<8x32xf32>
    %337 = arith.addf %335, %336 : vector<8x32xf32>
    %338 = math.tanh %337 : vector<8x32xf32>
    %339 = arith.mulf %334, %338 : vector<8x32xf32>
    %340 = tpu.concatenate %312, %339 in 1 : vector<8x32xf32>, vector<8x32xf32> -> vector<8x64xf32>
    %341 = arith.truncf %340 : vector<8x64xf32> to vector<8x64xbf16>
    %cst_106 = arith.constant dense<0.000000e+00> : vector<8x256xf32>
    %342 = tpu.matmul %341, %7, %cst_106 {dimension_numbers = #tpu.dot_dimension_numbers<[1], [0], [0], [1], [0, 0, 1, 1], [], []>} : vector<8x64xbf16>, vector<64x256xbf16>, vector<8x256xf32> -> vector<8x256xf32>
    %343 = vector.extract_strided_slice %342 {offsets = [0, 0], sizes = [8, 128], strides = [1, 1]} : vector<8x256xf32> to vector<8x128xf32>
    %344 = arith.addf %41, %343 : vector<8x128xf32>
    %345 = vector.extract_strided_slice %344 {offsets = [0, 0], sizes = [8, 32], strides = [1, 1]} : vector<8x128xf32> to vector<8x32xf32>
    %346 = arith.negf %345 : vector<8x32xf32>
    %347 = math.exp %346 : vector<8x32xf32>
    %cst_107 = arith.constant 1.000000e+00 : f32
    %348 = vector.broadcast %cst_107 : f32 to vector<8x32xf32>
    %349 = arith.addf %348, %347 : vector<8x32xf32>
    %350 = arith.divf %348, %349 : vector<8x32xf32>
    %351 = vector.extract_strided_slice %344 {offsets = [0, 32], sizes = [8, 32], strides = [1, 1]} : vector<8x128xf32> to vector<8x32xf32>
    %352 = arith.negf %351 : vector<8x32xf32>
    %353 = math.exp %352 : vector<8x32xf32>
    %cst_108 = arith.constant 1.000000e+00 : f32
    %354 = vector.broadcast %cst_108 : f32 to vector<8x32xf32>
    %355 = arith.addf %354, %353 : vector<8x32xf32>
    %356 = arith.divf %354, %355 : vector<8x32xf32>
    %357 = vector.extract_strided_slice %344 {offsets = [0, 64], sizes = [8, 32], strides = [1, 1]} : vector<8x128xf32> to vector<8x32xf32>
    %358 = math.tanh %357 : vector<8x32xf32>
    %359 = vector.extract_strided_slice %344 {offsets = [0, 96], sizes = [8, 32], strides = [1, 1]} : vector<8x128xf32> to vector<8x32xf32>
    %360 = arith.negf %359 : vector<8x32xf32>
    %361 = math.exp %360 : vector<8x32xf32>
    %cst_109 = arith.constant 1.000000e+00 : f32
    %362 = vector.broadcast %cst_109 : f32 to vector<8x32xf32>
    %363 = arith.addf %362, %361 : vector<8x32xf32>
    %364 = arith.divf %362, %363 : vector<8x32xf32>
    %365 = arith.mulf %356, %310 : vector<8x32xf32>
    %366 = arith.mulf %350, %358 : vector<8x32xf32>
    %367 = arith.addf %365, %366 : vector<8x32xf32>
    %368 = math.tanh %367 : vector<8x32xf32>
    %369 = arith.mulf %364, %368 : vector<8x32xf32>
    %370 = vector.extract_strided_slice %342 {offsets = [0, 128], sizes = [8, 128], strides = [1, 1]} : vector<8x256xf32> to vector<8x128xf32>
    %371 = arith.addf %83, %370 : vector<8x128xf32>
    %372 = vector.extract_strided_slice %371 {offsets = [0, 0], sizes = [8, 32], strides = [1, 1]} : vector<8x128xf32> to vector<8x32xf32>
    %373 = arith.negf %372 : vector<8x32xf32>
    %374 = math.exp %373 : vector<8x32xf32>
    %cst_110 = arith.constant 1.000000e+00 : f32
    %375 = vector.broadcast %cst_110 : f32 to vector<8x32xf32>
    %376 = arith.addf %375, %374 : vector<8x32xf32>
    %377 = arith.divf %375, %376 : vector<8x32xf32>
    %378 = vector.extract_strided_slice %371 {offsets = [0, 32], sizes = [8, 32], strides = [1, 1]} : vector<8x128xf32> to vector<8x32xf32>
    %379 = arith.negf %378 : vector<8x32xf32>
    %380 = math.exp %379 : vector<8x32xf32>
    %cst_111 = arith.constant 1.000000e+00 : f32
    %381 = vector.broadcast %cst_111 : f32 to vector<8x32xf32>
    %382 = arith.addf %381, %380 : vector<8x32xf32>
    %383 = arith.divf %381, %382 : vector<8x32xf32>
    %384 = vector.extract_strided_slice %371 {offsets = [0, 64], sizes = [8, 32], strides = [1, 1]} : vector<8x128xf32> to vector<8x32xf32>
    %385 = math.tanh %384 : vector<8x32xf32>
    %386 = vector.extract_strided_slice %371 {offsets = [0, 96], sizes = [8, 32], strides = [1, 1]} : vector<8x128xf32> to vector<8x32xf32>
    %387 = arith.negf %386 : vector<8x32xf32>
    %388 = math.exp %387 : vector<8x32xf32>
    %cst_112 = arith.constant 1.000000e+00 : f32
    %389 = vector.broadcast %cst_112 : f32 to vector<8x32xf32>
    %390 = arith.addf %389, %388 : vector<8x32xf32>
    %391 = arith.divf %389, %390 : vector<8x32xf32>
    %392 = arith.mulf %383, %337 : vector<8x32xf32>
    %393 = arith.mulf %377, %385 : vector<8x32xf32>
    %394 = arith.addf %392, %393 : vector<8x32xf32>
    %395 = math.tanh %394 : vector<8x32xf32>
    %396 = arith.mulf %391, %395 : vector<8x32xf32>
    %397 = tpu.concatenate %369, %396 in 1 : vector<8x32xf32>, vector<8x32xf32> -> vector<8x64xf32>
    %398 = arith.truncf %397 : vector<8x64xf32> to vector<8x64xbf16>
    %cst_113 = arith.constant dense<0.000000e+00> : vector<8x256xf32>
    %399 = tpu.matmul %398, %7, %cst_113 {dimension_numbers = #tpu.dot_dimension_numbers<[1], [0], [0], [1], [0, 0, 1, 1], [], []>} : vector<8x64xbf16>, vector<64x256xbf16>, vector<8x256xf32> -> vector<8x256xf32>
    %400 = vector.extract_strided_slice %399 {offsets = [0, 0], sizes = [8, 128], strides = [1, 1]} : vector<8x256xf32> to vector<8x128xf32>
    %401 = arith.addf %47, %400 : vector<8x128xf32>
    %402 = vector.extract_strided_slice %401 {offsets = [0, 0], sizes = [8, 32], strides = [1, 1]} : vector<8x128xf32> to vector<8x32xf32>
    %403 = arith.negf %402 : vector<8x32xf32>
    %404 = math.exp %403 : vector<8x32xf32>
    %cst_114 = arith.constant 1.000000e+00 : f32
    %405 = vector.broadcast %cst_114 : f32 to vector<8x32xf32>
    %406 = arith.addf %405, %404 : vector<8x32xf32>
    %407 = arith.divf %405, %406 : vector<8x32xf32>
    %408 = vector.extract_strided_slice %401 {offsets = [0, 32], sizes = [8, 32], strides = [1, 1]} : vector<8x128xf32> to vector<8x32xf32>
    %409 = arith.negf %408 : vector<8x32xf32>
    %410 = math.exp %409 : vector<8x32xf32>
    %cst_115 = arith.constant 1.000000e+00 : f32
    %411 = vector.broadcast %cst_115 : f32 to vector<8x32xf32>
    %412 = arith.addf %411, %410 : vector<8x32xf32>
    %413 = arith.divf %411, %412 : vector<8x32xf32>
    %414 = vector.extract_strided_slice %401 {offsets = [0, 64], sizes = [8, 32], strides = [1, 1]} : vector<8x128xf32> to vector<8x32xf32>
    %415 = math.tanh %414 : vector<8x32xf32>
    %416 = vector.extract_strided_slice %401 {offsets = [0, 96], sizes = [8, 32], strides = [1, 1]} : vector<8x128xf32> to vector<8x32xf32>
    %417 = arith.negf %416 : vector<8x32xf32>
    %418 = math.exp %417 : vector<8x32xf32>
    %cst_116 = arith.constant 1.000000e+00 : f32
    %419 = vector.broadcast %cst_116 : f32 to vector<8x32xf32>
    %420 = arith.addf %419, %418 : vector<8x32xf32>
    %421 = arith.divf %419, %420 : vector<8x32xf32>
    %422 = arith.mulf %413, %367 : vector<8x32xf32>
    %423 = arith.mulf %407, %415 : vector<8x32xf32>
    %424 = arith.addf %422, %423 : vector<8x32xf32>
    %425 = math.tanh %424 : vector<8x32xf32>
    %426 = arith.mulf %421, %425 : vector<8x32xf32>
    %427 = vector.extract_strided_slice %399 {offsets = [0, 128], sizes = [8, 128], strides = [1, 1]} : vector<8x256xf32> to vector<8x128xf32>
    %428 = arith.addf %77, %427 : vector<8x128xf32>
    %429 = vector.extract_strided_slice %428 {offsets = [0, 0], sizes = [8, 32], strides = [1, 1]} : vector<8x128xf32> to vector<8x32xf32>
    %430 = arith.negf %429 : vector<8x32xf32>
    %431 = math.exp %430 : vector<8x32xf32>
    %cst_117 = arith.constant 1.000000e+00 : f32
    %432 = vector.broadcast %cst_117 : f32 to vector<8x32xf32>
    %433 = arith.addf %432, %431 : vector<8x32xf32>
    %434 = arith.divf %432, %433 : vector<8x32xf32>
    %435 = vector.extract_strided_slice %428 {offsets = [0, 32], sizes = [8, 32], strides = [1, 1]} : vector<8x128xf32> to vector<8x32xf32>
    %436 = arith.negf %435 : vector<8x32xf32>
    %437 = math.exp %436 : vector<8x32xf32>
    %cst_118 = arith.constant 1.000000e+00 : f32
    %438 = vector.broadcast %cst_118 : f32 to vector<8x32xf32>
    %439 = arith.addf %438, %437 : vector<8x32xf32>
    %440 = arith.divf %438, %439 : vector<8x32xf32>
    %441 = vector.extract_strided_slice %428 {offsets = [0, 64], sizes = [8, 32], strides = [1, 1]} : vector<8x128xf32> to vector<8x32xf32>
    %442 = math.tanh %441 : vector<8x32xf32>
    %443 = vector.extract_strided_slice %428 {offsets = [0, 96], sizes = [8, 32], strides = [1, 1]} : vector<8x128xf32> to vector<8x32xf32>
    %444 = arith.negf %443 : vector<8x32xf32>
    %445 = math.exp %444 : vector<8x32xf32>
    %cst_119 = arith.constant 1.000000e+00 : f32
    %446 = vector.broadcast %cst_119 : f32 to vector<8x32xf32>
    %447 = arith.addf %446, %445 : vector<8x32xf32>
    %448 = arith.divf %446, %447 : vector<8x32xf32>
    %449 = arith.mulf %440, %394 : vector<8x32xf32>
    %450 = arith.mulf %434, %442 : vector<8x32xf32>
    %451 = arith.addf %449, %450 : vector<8x32xf32>
    %452 = math.tanh %451 : vector<8x32xf32>
    %453 = arith.mulf %448, %452 : vector<8x32xf32>
    %454 = tpu.concatenate %426, %453 in 1 : vector<8x32xf32>, vector<8x32xf32> -> vector<8x64xf32>
    %455 = arith.truncf %454 : vector<8x64xf32> to vector<8x64xbf16>
    %cst_120 = arith.constant dense<0.000000e+00> : vector<8x256xf32>
    %456 = tpu.matmul %455, %7, %cst_120 {dimension_numbers = #tpu.dot_dimension_numbers<[1], [0], [0], [1], [0, 0, 1, 1], [], []>} : vector<8x64xbf16>, vector<64x256xbf16>, vector<8x256xf32> -> vector<8x256xf32>
    %457 = vector.extract_strided_slice %456 {offsets = [0, 0], sizes = [8, 128], strides = [1, 1]} : vector<8x256xf32> to vector<8x128xf32>
    %458 = arith.addf %53, %457 : vector<8x128xf32>
    %459 = vector.extract_strided_slice %458 {offsets = [0, 0], sizes = [8, 32], strides = [1, 1]} : vector<8x128xf32> to vector<8x32xf32>
    %460 = arith.negf %459 : vector<8x32xf32>
    %461 = math.exp %460 : vector<8x32xf32>
    %cst_121 = arith.constant 1.000000e+00 : f32
    %462 = vector.broadcast %cst_121 : f32 to vector<8x32xf32>
    %463 = arith.addf %462, %461 : vector<8x32xf32>
    %464 = arith.divf %462, %463 : vector<8x32xf32>
    %465 = vector.extract_strided_slice %458 {offsets = [0, 32], sizes = [8, 32], strides = [1, 1]} : vector<8x128xf32> to vector<8x32xf32>
    %466 = arith.negf %465 : vector<8x32xf32>
    %467 = math.exp %466 : vector<8x32xf32>
    %cst_122 = arith.constant 1.000000e+00 : f32
    %468 = vector.broadcast %cst_122 : f32 to vector<8x32xf32>
    %469 = arith.addf %468, %467 : vector<8x32xf32>
    %470 = arith.divf %468, %469 : vector<8x32xf32>
    %471 = vector.extract_strided_slice %458 {offsets = [0, 64], sizes = [8, 32], strides = [1, 1]} : vector<8x128xf32> to vector<8x32xf32>
    %472 = math.tanh %471 : vector<8x32xf32>
    %473 = vector.extract_strided_slice %458 {offsets = [0, 96], sizes = [8, 32], strides = [1, 1]} : vector<8x128xf32> to vector<8x32xf32>
    %474 = arith.negf %473 : vector<8x32xf32>
    %475 = math.exp %474 : vector<8x32xf32>
    %cst_123 = arith.constant 1.000000e+00 : f32
    %476 = vector.broadcast %cst_123 : f32 to vector<8x32xf32>
    %477 = arith.addf %476, %475 : vector<8x32xf32>
    %478 = arith.divf %476, %477 : vector<8x32xf32>
    %479 = arith.mulf %470, %424 : vector<8x32xf32>
    %480 = arith.mulf %464, %472 : vector<8x32xf32>
    %481 = arith.addf %479, %480 : vector<8x32xf32>
    %482 = math.tanh %481 : vector<8x32xf32>
    %483 = arith.mulf %478, %482 : vector<8x32xf32>
    %484 = vector.extract_strided_slice %456 {offsets = [0, 128], sizes = [8, 128], strides = [1, 1]} : vector<8x256xf32> to vector<8x128xf32>
    %485 = arith.addf %71, %484 : vector<8x128xf32>
    %486 = vector.extract_strided_slice %485 {offsets = [0, 0], sizes = [8, 32], strides = [1, 1]} : vector<8x128xf32> to vector<8x32xf32>
    %487 = arith.negf %486 : vector<8x32xf32>
    %488 = math.exp %487 : vector<8x32xf32>
    %cst_124 = arith.constant 1.000000e+00 : f32
    %489 = vector.broadcast %cst_124 : f32 to vector<8x32xf32>
    %490 = arith.addf %489, %488 : vector<8x32xf32>
    %491 = arith.divf %489, %490 : vector<8x32xf32>
    %492 = vector.extract_strided_slice %485 {offsets = [0, 32], sizes = [8, 32], strides = [1, 1]} : vector<8x128xf32> to vector<8x32xf32>
    %493 = arith.negf %492 : vector<8x32xf32>
    %494 = math.exp %493 : vector<8x32xf32>
    %cst_125 = arith.constant 1.000000e+00 : f32
    %495 = vector.broadcast %cst_125 : f32 to vector<8x32xf32>
    %496 = arith.addf %495, %494 : vector<8x32xf32>
    %497 = arith.divf %495, %496 : vector<8x32xf32>
    %498 = vector.extract_strided_slice %485 {offsets = [0, 64], sizes = [8, 32], strides = [1, 1]} : vector<8x128xf32> to vector<8x32xf32>
    %499 = math.tanh %498 : vector<8x32xf32>
    %500 = vector.extract_strided_slice %485 {offsets = [0, 96], sizes = [8, 32], strides = [1, 1]} : vector<8x128xf32> to vector<8x32xf32>
    %501 = arith.negf %500 : vector<8x32xf32>
    %502 = math.exp %501 : vector<8x32xf32>
    %cst_126 = arith.constant 1.000000e+00 : f32
    %503 = vector.broadcast %cst_126 : f32 to vector<8x32xf32>
    %504 = arith.addf %503, %502 : vector<8x32xf32>
    %505 = arith.divf %503, %504 : vector<8x32xf32>
    %506 = arith.mulf %497, %451 : vector<8x32xf32>
    %507 = arith.mulf %491, %499 : vector<8x32xf32>
    %508 = arith.addf %506, %507 : vector<8x32xf32>
    %509 = math.tanh %508 : vector<8x32xf32>
    %510 = arith.mulf %505, %509 : vector<8x32xf32>
    %511 = tpu.concatenate %483, %510 in 1 : vector<8x32xf32>, vector<8x32xf32> -> vector<8x64xf32>
    %512 = arith.truncf %511 : vector<8x64xf32> to vector<8x64xbf16>
    %cst_127 = arith.constant dense<0.000000e+00> : vector<8x256xf32>
    %513 = tpu.matmul %512, %7, %cst_127 {dimension_numbers = #tpu.dot_dimension_numbers<[1], [0], [0], [1], [0, 0, 1, 1], [], []>} : vector<8x64xbf16>, vector<64x256xbf16>, vector<8x256xf32> -> vector<8x256xf32>
    %514 = vector.extract_strided_slice %513 {offsets = [0, 0], sizes = [8, 128], strides = [1, 1]} : vector<8x256xf32> to vector<8x128xf32>
    %515 = arith.addf %59, %514 : vector<8x128xf32>
    %516 = vector.extract_strided_slice %515 {offsets = [0, 0], sizes = [8, 32], strides = [1, 1]} : vector<8x128xf32> to vector<8x32xf32>
    %517 = arith.negf %516 : vector<8x32xf32>
    %518 = math.exp %517 : vector<8x32xf32>
    %cst_128 = arith.constant 1.000000e+00 : f32
    %519 = vector.broadcast %cst_128 : f32 to vector<8x32xf32>
    %520 = arith.addf %519, %518 : vector<8x32xf32>
    %521 = arith.divf %519, %520 : vector<8x32xf32>
    %522 = vector.extract_strided_slice %515 {offsets = [0, 32], sizes = [8, 32], strides = [1, 1]} : vector<8x128xf32> to vector<8x32xf32>
    %523 = arith.negf %522 : vector<8x32xf32>
    %524 = math.exp %523 : vector<8x32xf32>
    %cst_129 = arith.constant 1.000000e+00 : f32
    %525 = vector.broadcast %cst_129 : f32 to vector<8x32xf32>
    %526 = arith.addf %525, %524 : vector<8x32xf32>
    %527 = arith.divf %525, %526 : vector<8x32xf32>
    %528 = vector.extract_strided_slice %515 {offsets = [0, 64], sizes = [8, 32], strides = [1, 1]} : vector<8x128xf32> to vector<8x32xf32>
    %529 = math.tanh %528 : vector<8x32xf32>
    %530 = vector.extract_strided_slice %515 {offsets = [0, 96], sizes = [8, 32], strides = [1, 1]} : vector<8x128xf32> to vector<8x32xf32>
    %531 = arith.negf %530 : vector<8x32xf32>
    %532 = math.exp %531 : vector<8x32xf32>
    %cst_130 = arith.constant 1.000000e+00 : f32
    %533 = vector.broadcast %cst_130 : f32 to vector<8x32xf32>
    %534 = arith.addf %533, %532 : vector<8x32xf32>
    %535 = arith.divf %533, %534 : vector<8x32xf32>
    %536 = arith.mulf %527, %481 : vector<8x32xf32>
    %537 = arith.mulf %521, %529 : vector<8x32xf32>
    %538 = arith.addf %536, %537 : vector<8x32xf32>
    %539 = math.tanh %538 : vector<8x32xf32>
    %540 = arith.mulf %535, %539 : vector<8x32xf32>
    %541 = vector.extract_strided_slice %513 {offsets = [0, 128], sizes = [8, 128], strides = [1, 1]} : vector<8x256xf32> to vector<8x128xf32>
    %542 = arith.addf %65, %541 : vector<8x128xf32>
    %543 = vector.extract_strided_slice %542 {offsets = [0, 0], sizes = [8, 32], strides = [1, 1]} : vector<8x128xf32> to vector<8x32xf32>
    %544 = arith.negf %543 : vector<8x32xf32>
    %545 = math.exp %544 : vector<8x32xf32>
    %cst_131 = arith.constant 1.000000e+00 : f32
    %546 = vector.broadcast %cst_131 : f32 to vector<8x32xf32>
    %547 = arith.addf %546, %545 : vector<8x32xf32>
    %548 = arith.divf %546, %547 : vector<8x32xf32>
    %549 = vector.extract_strided_slice %542 {offsets = [0, 32], sizes = [8, 32], strides = [1, 1]} : vector<8x128xf32> to vector<8x32xf32>
    %550 = arith.negf %549 : vector<8x32xf32>
    %551 = math.exp %550 : vector<8x32xf32>
    %cst_132 = arith.constant 1.000000e+00 : f32
    %552 = vector.broadcast %cst_132 : f32 to vector<8x32xf32>
    %553 = arith.addf %552, %551 : vector<8x32xf32>
    %554 = arith.divf %552, %553 : vector<8x32xf32>
    %555 = vector.extract_strided_slice %542 {offsets = [0, 64], sizes = [8, 32], strides = [1, 1]} : vector<8x128xf32> to vector<8x32xf32>
    %556 = math.tanh %555 : vector<8x32xf32>
    %557 = vector.extract_strided_slice %542 {offsets = [0, 96], sizes = [8, 32], strides = [1, 1]} : vector<8x128xf32> to vector<8x32xf32>
    %558 = arith.negf %557 : vector<8x32xf32>
    %559 = math.exp %558 : vector<8x32xf32>
    %cst_133 = arith.constant 1.000000e+00 : f32
    %560 = vector.broadcast %cst_133 : f32 to vector<8x32xf32>
    %561 = arith.addf %560, %559 : vector<8x32xf32>
    %562 = arith.divf %560, %561 : vector<8x32xf32>
    %563 = arith.mulf %554, %508 : vector<8x32xf32>
    %564 = arith.mulf %548, %556 : vector<8x32xf32>
    %565 = arith.addf %563, %564 : vector<8x32xf32>
    %566 = math.tanh %565 : vector<8x32xf32>
    %567 = arith.mulf %562, %566 : vector<8x32xf32>
    %c0_134 = arith.constant 0 : index
    %c0_135 = arith.constant 0 : index
    %568 = vector.load %arg10[%c0_134, %c0_135] : memref<8x32xf32, #tpu.memory_space<vmem>>, vector<8x32xf32>
    tpu.vector_store %arg10[%c0_134, %c0_135], %540 {strides = array<i32>} : memref<8x32xf32, #tpu.memory_space<vmem>>, vector<8x32xf32>,
    %c0_136 = arith.constant 0 : index
    %c0_137 = arith.constant 0 : index
    %569 = vector.load %arg11[%c0_136, %c0_137] : memref<8x32xf32, #tpu.memory_space<vmem>>, vector<8x32xf32>
    tpu.vector_store %arg11[%c0_136, %c0_137], %538 {strides = array<i32>} : memref<8x32xf32, #tpu.memory_space<vmem>>, vector<8x32xf32>,
    %c0_138 = arith.constant 0 : index
    %c0_139 = arith.constant 0 : index
    %570 = vector.load %arg12[%c0_138, %c0_139] : memref<8x32xf32, #tpu.memory_space<vmem>>, vector<8x32xf32>
    tpu.vector_store %arg12[%c0_138, %c0_139], %567 {strides = array<i32>} : memref<8x32xf32, #tpu.memory_space<vmem>>, vector<8x32xf32>,
    %c0_140 = arith.constant 0 : index
    %c0_141 = arith.constant 0 : index
    %571 = vector.load %arg13[%c0_140, %c0_141] : memref<8x32xf32, #tpu.memory_space<vmem>>, vector<8x32xf32>
    tpu.vector_store %arg13[%c0_140, %c0_141], %565 {strides = array<i32>} : memref<8x32xf32, #tpu.memory_space<vmem>>, vector<8x32xf32>,
    %572 = tpu.concatenate %141, %198, %255, %312, %369, %426, %483, %540 in 1 : vector<8x32xf32>, vector<8x32xf32>, vector<8x32xf32>, vector<8x32xf32>, vector<8x32xf32>, vector<8x32xf32>, vector<8x32xf32>, vector<8x32xf32> -> vector<8x256xf32>
    %573 = arith.truncf %572 : vector<8x256xf32> to vector<8x256xbf16>
    %574 = tpu.concatenate %567, %510, %453, %396, %339, %282, %225, %168 in 1 : vector<8x32xf32>, vector<8x32xf32>, vector<8x32xf32>, vector<8x32xf32>, vector<8x32xf32>, vector<8x32xf32>, vector<8x32xf32>, vector<8x32xf32> -> vector<8x256xf32>
    %575 = arith.truncf %574 : vector<8x256xf32> to vector<8x256xbf16>
    %c0_142 = arith.constant 0 : index
    %c0_143 = arith.constant 0 : index
    %576 = vector.load %arg14[%c0_142, %c0_143] : memref<8x4xf32, #tpu.memory_space<vmem>>, vector<8x4xf32>
    %c0_144 = arith.constant 0 : index
    %c0_145 = arith.constant 0 : index
    %577 = vector.load %arg6[%c0_144, %c0_145] : memref<256x4xbf16, #tpu.memory_space<vmem>>, vector<256x4xbf16>
    %cst_146 = arith.constant dense<0.000000e+00> : vector<8x4xf32>
    %578 = tpu.matmul %573, %577, %cst_146 {dimension_numbers = #tpu.dot_dimension_numbers<[1], [0], [0], [1], [0, 0, 1, 1], [], []>} : vector<8x256xbf16>, vector<256x4xbf16>, vector<8x4xf32> -> vector<8x4xf32>
    %c0_147 = arith.constant 0 : index
    %c0_148 = arith.constant 0 : index
    %579 = vector.load %arg7[%c0_147, %c0_148] : memref<256x4xbf16, #tpu.memory_space<vmem>>, vector<256x4xbf16>
    %cst_149 = arith.constant dense<0.000000e+00> : vector<8x4xf32>
    %580 = tpu.matmul %575, %579, %cst_149 {dimension_numbers = #tpu.dot_dimension_numbers<[1], [0], [0], [1], [0, 0, 1, 1], [], []>} : vector<8x256xbf16>, vector<256x4xbf16>, vector<8x4xf32> -> vector<8x4xf32>
    %581 = arith.addf %578, %580 : vector<8x4xf32>
    %582 = arith.addf %576, %581 : vector<8x4xf32>
    %c0_150 = arith.constant 0 : index
    %c0_151 = arith.constant 0 : index
    %583 = vector.load %arg14[%c0_150, %c0_151] : memref<8x4xf32, #tpu.memory_space<vmem>>, vector<8x4xf32>
    tpu.vector_store %arg14[%c0_150, %c0_151], %582 {strides = array<i32>} : memref<8x4xf32, #tpu.memory_space<vmem>>, vector<8x4xf32>,
    %c1_i32 = arith.constant 1 : i32
    %584 = arith.cmpi eq, %arg0, %c1_i32 : i32
    %585 = arith.extui %584 : i1 to i32
    %c0_i32_152 = arith.constant 0 : i32
    %586 = arith.cmpi ne, %585, %c0_i32_152 : i32
    scf.if %586 {
      %c0_153 = arith.constant 0 : index
      %c0_154 = arith.constant 0 : index
      %587 = vector.load %arg14[%c0_153, %c0_154] : memref<8x4xf32, #tpu.memory_space<vmem>>, vector<8x4xf32>
      %c0_155 = arith.constant 0 : index
      %c0_156 = arith.constant 0 : index
      %588 = vector.load %arg8[%c0_155, %c0_156] : memref<1x4xf32, #tpu.memory_space<vmem>>, vector<1x4xf32>
      %589 = vector.broadcast %588 : vector<1x4xf32> to vector<8x4xf32>
      %590 = arith.addf %587, %589 : vector<8x4xf32>
      %c0_157 = arith.constant 0 : index
      %c0_158 = arith.constant 0 : index
      %591 = vector.load %arg9[%c0_157, %c0_158] : memref<8x4xf32, #tpu.memory_space<vmem>>, vector<8x4xf32>
      tpu.vector_store %arg9[%c0_157, %c0_158], %590 {strides = array<i32>} : memref<8x4xf32, #tpu.memory_space<vmem>>, vector<8x4xf32>,
    } else {
    }
    return
  }
  func.func @transform_0(%arg0: i32) -> (i32, i32, i32) {
    %c0_i32 = arith.constant 0 : i32
    %c0_i32_0 = arith.constant 0 : i32
    %c0_i32_1 = arith.constant 0 : i32
    return %c0_i32, %arg0, %c0_i32_0 : i32, i32, i32
  }
  func.func @transform_1(%arg0: i32) -> (i32, i32, i32) {
    %c1_i32 = arith.constant 1 : i32
    %0 = arith.subi %c1_i32, %arg0 : i32
    %c0_i32 = arith.constant 0 : i32
    %c0_i32_0 = arith.constant 0 : i32
    %c0_i32_1 = arith.constant 0 : i32
    return %c0_i32, %0, %c0_i32_0 : i32, i32, i32
  }
  func.func @transform_2(%arg0: i32) -> (i32, i32, i32) {
    %c0_i32 = arith.constant 0 : i32
    %c0_i32_0 = arith.constant 0 : i32
    %c0_i32_1 = arith.constant 0 : i32
    %c0_i32_2 = arith.constant 0 : i32
    return %c0_i32, %c0_i32_0, %c0_i32_1 : i32, i32, i32
  }
  func.func @transform_3(%arg0: i32) -> (i32, i32) {
    %c0_i32 = arith.constant 0 : i32
    %c0_i32_0 = arith.constant 0 : i32
    %c0_i32_1 = arith.constant 0 : i32
    return %c0_i32, %c0_i32_0 : i32, i32
  }
  func.func @transform_4(%arg0: i32) -> (i32, i32, i32) {
    %c0_i32 = arith.constant 0 : i32
    %c0_i32_0 = arith.constant 0 : i32
    %c0_i32_1 = arith.constant 0 : i32
    %c0_i32_2 = arith.constant 0 : i32
    return %c0_i32, %c0_i32_0, %c0_i32_1 : i32, i32, i32
  }
  func.func @transform_5(%arg0: i32) -> (i32, i32) {
    %c0_i32 = arith.constant 0 : i32
    %c0_i32_0 = arith.constant 0 : i32
    return %arg0, %c0_i32 : i32, i32
  }
  func.func @transform_6(%arg0: i32) -> (i32, i32) {
    %c1_i32 = arith.constant 1 : i32
    %0 = arith.subi %c1_i32, %arg0 : i32
    %c0_i32 = arith.constant 0 : i32
    %c0_i32_0 = arith.constant 0 : i32
    return %0, %c0_i32 : i32, i32
  }
  func.func @transform_7(%arg0: i32) -> (i32, i32) {
    %c0_i32 = arith.constant 0 : i32
    %c0_i32_0 = arith.constant 0 : i32
    %c0_i32_1 = arith.constant 0 : i32
    return %c0_i32, %c0_i32_0 : i32, i32
  }
  func.func @transform_8(%arg0: i32) -> (i32, i32) {
    %c0_i32 = arith.constant 0 : i32
    %c0_i32_0 = arith.constant 0 : i32
    %c0_i32_1 = arith.constant 0 : i32
    return %c0_i32, %c0_i32_0 : i32, i32
  }
}

</mosaic_0001>

<bundles_post_ra>
// kernel: rnn_forward.1
= control target key start
LH: loop header
LB: loop body
LE: loop exit
PB: predicated region body
PF: predicated region fallthrough
CT: control target
= control target key end

     0   :  { %s5621_s0 = inlined_call_operand.hbm [shape: f32[8,16,16], index: 0, kind: input, shape index: {}, may-alias: {0,1}]   ;;  %s5622_s1 = inlined_call_operand.hbm [shape: f32[8,16,16], index: 1, kind: input, shape index: {}, may-alias: {0,1}]   ;;  %s5623_s2 = inlined_call_operand.hbm [shape: bf16[2,16,128], index: 2, kind: input, shape index: {}]   ;;  %s5624_s3 = inlined_call_operand.hbm [shape: bf16[64,256], index: 3, kind: input, shape index: {}]   ;;  %s5625_s4 = inlined_call_operand.hbm [shape: f32[2,1,128], index: 4, kind: input, shape index: {}]   ;;  %s5626_s5 = inlined_call_operand.hbm [shape: bf16[512,4], index: 5, kind: input, shape index: {}]   ;;  %s5627_s6 = inlined_call_operand.hbm [shape: bf16[512,4], index: 6, kind: input, shape index: {}]   ;;  %s5628_s7 = inlined_call_operand.hbm [shape: f32[1,4], index: 7, kind: input, shape index: {}]   ;;  %s5629_s8 = inlined_call_operand.hbm [shape: f32[8,4], index: 8, kind: output, shape index: {}]  }
   0x1   :  { %5661 = sst [smem:[#allocation37_spill]] %s5623_s2 }
   0x2   :  { %5662 = sst [smem:[#allocation38_spill]] %s5624_s3 }
   0x3   :  { %5663 = sst [smem:[#allocation39_spill]] %s5626_s5 }
   0x4   :  { %5664 = sst [smem:[#allocation40_spill]] %s5629_s8 }
   0x5   :  { %13 = vsyncpa [#allocation8], 0 }
   0x6   :  { %15 = vsyncpa [#allocation8 + $0x1], 0 }
   0x7   :  { %16 = vsyncpa [#allocation11], 0 }
   0x8   :  { %18 = vsyncpa [#allocation11 + $0x1], 0 }
   0x9   :  { %19 = vsyncpa [#allocation14], 0 }
   0xa   :  { %20 = vsyncpa [#allocation17], 0 }
   0xb   :  { %22 = vsyncpa [#allocation17 + $0x1], 0 }
   0xc   :  { %23 = vsyncpa [#allocation20], 0 }
   0xd   :  { %24 = vsyncpa [#allocation9], 0  ;;  %s4482_s27 = smov 0   ;;  %s4484_s28 = smov 0  }
   0xe   :  { %s4486_s29 = smov 0   ;;  %s4488_s30 = smov 0  }
   0xf   :  { %s4490_s9 = smov 0   ;;  %s4492_s10 = smov 0  }
  0x10   :  { %s4494_s11 = smov 0  }
  0x11 LB: > { %5665 = sst [smem:[#allocation30_spill]] %s4404_s9  ;;  %s4516_s12 = sadd.s32 4294967295, %s4412_s11   ;;  %s4412_s11 = sphi %s4494_s11, %s5718_s11   ;;  %s4408_s10 = sphi %s4492_s10, %s5714_s10   ;;  %s4404_s9 = sphi %s4490_s9, %s5713_s9   ;;  %s4400_s30 = sphi %s4488_s30, %s5712_s30   ;;  %s4396_s29 = sphi %s4486_s29, %s5717_s29   ;;  %s4392_s28 = sphi %s4484_s28, %s5716_s28   ;;  %s4388_s27 = sphi %s4482_s27, %s5715_s27  }
  0x12   : > { %5666 = sst [smem:[#allocation31_spill]] %s4408_s10  ;;  %p78_p0 = scmp.ne.s32.totalorder %s4392_s28, %s4388_s27 }
  0x13   : > { %5667 = sst [smem:[#allocation32_spill]] %s4516_s12  ;;  %p5630_p1 = scmp.eq.s32.totalorder %s4516_s12, 0 }
  0x14   : > { %p3449_p2 = scmp.ge.s32.totalorder %s4412_s11, 1  ;;  %p248_p3 = scmp.lt.s32.totalorder %s4412_s11, 3 }
  0x15   : > { %p4525_p5 = por %p78_p0, %p5630_p1  ;;  %s4414_s15 = smov [#allocation12]  }
  0x16   : > { %p4529_p6 = pnand %p3449_p2, %p248_p3  ;;  %s260_s16 = sshll.u32 %s4414_s15, 4  ;;  %s261_s16 = int_to_ptr.vmem [resolvable:$true] %s260_s16 }
  0x17   : > { %s5668_s13 = scalar_select %p4525_p5, 1, 0 }
  0x18   : > { %s5670_s14 = scalar_select %p4529_p6, 1, 0 }
  0x19   : > { %5669 = sst [smem:[#allocation33_spill]] %s5668_s13  ;;  %p3767_p7 = pneg %p4529_p6 }
  0x1a   : > { %5671 = sst [smem:[#allocation34_spill]] %s5670_s14  ;;  %s4415_s18 = smov [#allocation13]  }
  0x1b   : > { %p4537_p8 = pnand %p3767_p7, %p5630_p1  ;;  %s273_s19 = sshll.u32 %s4415_s18, 4  ;;  %s4541_s19 = int_to_ptr.vmem [resolvable:$true] %s273_s19 }
  0x1c   : > { %s5673_s2 = sld [smem:[#allocation37_spill]] }
  0x1d   : > { %s5672_s17 = scalar_select %p4537_p8, 1, 0 }
  0x1e   : > { %p4551_p10 = pneg %p4537_p8 }
  0x22   : > { %s4068_s22 = scalar_lea.hbm %s5673_s2, 256 }
  0x23   : > { %p4069_p9 = scmp.ne.s32.totalorder %s5673_s2, %s4068_s22  ;;  %p4075_p13 = scmp.lt.u32.totalorder %s4068_s22, %s5673_s2 }
  0x25   : > { %p4071_p11 = pnand %p4551_p10, %p4069_p9 }
  0x27   : > { %p4072_p12 = pneg %p4071_p11 }
  0x29   : > { %p4077_p0 = pnand %p4075_p13, %p4072_p12 }
  0x2b   : > { %4080 = shalt.err (!%p4077_p0)
}
  0x2c   : > { %s4081_s15 = scalar_lea.vmem %s261_s16, 256  ;;  %p4089_p4 = scmp.lt.s32.totalorder %s261_s16, %s261_s16 }
  0x2d   : > { %p4082_p2 = scmp.ne.s32.totalorder %s261_s16, %s4081_s15  ;;  %p4090_p1 = scmp.lt.s32.totalorder %s4081_s15, %s4081_s15 }
  0x2f   : > { %p4084_p3 = pnand %p4082_p2, %p4551_p10  ;;  %p4091_p5 = por %p4090_p1, %p4089_p4 }
  0x31   : > { %p4085_p7 = pneg %p4084_p3 }
  0x33   : > { %p4092_p6 = pnand %p4091_p5, %p4085_p7 }
  0x35   : > { %4095 = shalt.err (!%p4092_p6)
}
  0x36   : > { %s5640_s18 = smov 64   ;;  %s5642_s20 = smov 4  }
  0x37   : > { %3770 = dma.hbm_to_vmem [thread:$0]  (!%p4537_p8), %s5673_s2, 256, %s261_s16, [#allocation11], %s5640_s18, %s5640_s18, %s5642_s20  }
  0x38   : > { %s5675_s3 = sld [smem:[#allocation38_spill]] }
  0x3e   : > { %s4096_s26 = scalar_lea.hbm %s5675_s3, 1024 }
  0x3f   : > { %p4097_p1 = scmp.ne.s32.totalorder %s5675_s3, %s4096_s26  ;;  %p4103_p6 = scmp.lt.u32.totalorder %s4096_s26, %s5675_s3 }
  0x41   : > { %p4099_p4 = pnand %p4097_p1, %p4551_p10 }
  0x43   : > { %p4100_p5 = pneg %p4099_p4 }
  0x45   : > { %p4105_p9 = pnand %p4103_p6, %p4100_p5 }
  0x47   : > { %4108 = shalt.err (!%p4105_p9)
}
  0x48   : > { %s4109_s16 = scalar_lea.vmem %s4541_s19, 1024  ;;  %p4117_p0 = scmp.lt.s32.totalorder %s4541_s19, %s4541_s19 }
  0x49   : > { %p4110_p11 = scmp.ne.s32.totalorder %s4541_s19, %s4109_s16  ;;  %p4118_p2 = scmp.lt.s32.totalorder %s4109_s16, %s4109_s16 }
  0x4b   : > { %p4112_p12 = pnand %p4110_p11, %p4551_p10  ;;  %p4119_p3 = por %p4118_p2, %p4117_p0 }
  0x4d   : > { %p4113_p13 = pneg %p4112_p12 }
  0x4f   : > { %p4120_p7 = pnand %p4119_p3, %p4113_p13 }
  0x51   : > { %4123 = shalt.err (!%p4120_p7)
}
  0x52   : > { %s5636_s21 = smov 128   ;;  %s5638_s8 = smov 8  }
  0x53   : > { %3773 = dma.hbm_to_vmem [thread:$0]  (!%p4537_p8), %s5675_s3, 1024, %s4541_s19, [#allocation14], %s5636_s21, %s5636_s21, %s5638_s8  }
  0x54   : > { %s4597_s23 = sadd.s32 1, %s4412_s11   ;;  %s37_s24 = sadd.s32 1, %s4408_s10 }
  0x55   : > { %s34_s26 = ssub.s32 %s4412_s11, %s4597_s23  ;;  %p44_p1 = scmp.ne.s32.totalorder %s4408_s10, %s4404_s9 }
  0x56   : > { %p35_p4 = scmp.eq.s32.totalorder %s34_s26, 0  ;;  %p5645_p5 = scmp.eq.s32.totalorder %s4412_s11, 0 }
  0x57   : > { %p50_p6 = scmp.ne.s32.totalorder %s4404_s9, %s4400_s30  ;;  %p5644_p9 = scmp.lt.s32.totalorder %s4412_s11, 2 }
  0x58   : > { %s4609_s27 = scalar_select %p35_p4, %s4408_s10, %s37_s24  }
  0x59   : > { %p46_p11 = por %p5645_p5, %p44_p1  ;;  %p5677_p12 = scmp.eq.s32.totalorder %s4516_s12, 0 }
  0x5a   : > { %5676 = sst [smem:[#allocation35_spill]] %s4609_s27  ;;  %s4620_s19 = sand.u32 1, %s4408_s10  }
  0x5b   : > { %p4615_p13 = por %p5677_p12, %p50_p6  ;;  %s5646_s16 = sand.u32 1, %s4412_s11  }
  0x5c   : > { %p4625_p0 = pnand %p5644_p9, %p46_p11  ;;  %s3459_s30 = sshll.u32 %s4620_s19, 7 }
  0x5d   : > { %s5678_s15 = scalar_select %p4615_p13, 1, 0 }
  0x5e   : > { %s5680_s13 = scalar_select %p4625_p0, 1, 0 }
  0x5f   : > { %5679 = sst [smem:[#allocation36_spill]] %s5678_s15  ;;  %s3565_s22 = sshll.u32 %s4412_s11, 11 }
  0x60   : > { %s356_s24 = scalar_lea.vmem [#allocation16], %s3459_s30  ;;  %s5681_s5 = sld [smem:[#allocation39_spill]] }
  0x61   : > { %s363_s26 = sshll.u32 %s356_s24, 4  ;;  %s4640_s20 = scalar_lea.sflag [#allocation17], %s5646_s16  ;;  %s4636_s26 = int_to_ptr.vmem [resolvable:$true] %s363_s26 }
  0x62   : > { %p5651_p3 = pneg %p4625_p0 }
  0x66   : > { %s4634_s18 = scalar_lea.hbm %s5681_s5, %s3565_s22  ;;  %s4129_s30 = scalar_lea.hbm %s5681_s5, 4096 }
  0x67   : > { %s4124_s2 = scalar_lea.hbm %s4634_s18, 2048  ;;  %p4130_p4 = scmp.lt.u32.totalorder %s4634_s18, %s5681_s5 }
  0x68   : > { %p4125_p2 = scmp.ne.s32.totalorder %s4634_s18, %s4124_s2  ;;  %p4131_p6 = scmp.lt.u32.totalorder %s4129_s30, %s4124_s2 }
  0x69   : > { %p4133_p12 = scmp.lt.u32.totalorder %s4124_s2, %s4634_s18 }
  0x6a   : > { %p4127_p7 = pnand %p5651_p3, %p4125_p2  ;;  %p4132_p11 = por %p4131_p6, %p4130_p4 }
  0x6c   : > { %p4128_p1 = pneg %p4127_p7  ;;  %p4134_p9 = por %p4133_p12, %p4132_p11 }
  0x6e   : > { %p4135_p5 = pnand %p4134_p9, %p4128_p1 }
  0x70   : > { %4138 = shalt.err (!%p4135_p5)
}
  0x71   : > { %s4139_s16 = scalar_lea.vmem %s4636_s26, 2048  ;;  %s4420_s21 = smov [#allocation16]  }
  0x72   : > { %p4140_p2 = scmp.ne.s32.totalorder %s4636_s26, %s4139_s16  ;;  %s4144_s8 = sshll.u32 %s4420_s21, 4  ;;  %s4145_s8 = int_to_ptr.vmem [resolvable:$false] %s4144_s8 }
  0x73   : > { %s4146_s22 = scalar_lea.vmem %s4145_s8, 4096  ;;  %p4147_p8 = scmp.lt.s32.totalorder %s4636_s26, %s4145_s8 }
  0x74   : > { %p4142_p7 = pnand %p4140_p2, %p5651_p3  ;;  %p4148_p4 = scmp.lt.s32.totalorder %s4146_s22, %s4139_s16 }
  0x76   : > { %p4143_p13 = pneg %p4142_p7  ;;  %p4149_p6 = por %p4148_p4, %p4147_p8 }
  0x78   : > { %p4150_p11 = pnand %p4149_p6, %p4143_p13 }
  0x7a   : > { %4153 = shalt.err (!%p4150_p11)
}
  0x7b   : > { %s5682_s2 = smov 4   ;;  %s5683_s30 = smov 64  }
  0x7c   : > { %3789 = dma.hbm_to_vmem [thread:$0]  (!%p4625_p0), %s4634_s18, 2048, %s4636_s26, %s4640_s20, %s5683_s30, %s5683_s30, %s5682_s2  }
  0x7d   : > { %s4421_s24 = smov [#allocation15]   ;;  %s4154_s16 = scalar_lea.hbm %s5625_s4, 32 }
  0x7e   : > { %s286_s3 = sshll.u32 %s4421_s24, 4  ;;  %p4155_p8 = scmp.ne.s32.totalorder %s5625_s4, %s4154_s16  ;;  %s287_s3 = int_to_ptr.vmem [resolvable:$true] %s286_s3 }
  0x7f   : > { %p4161_p13 = scmp.lt.u32.totalorder %s4154_s16, %s5625_s4 }
  0x80   : > { %p4157_p5 = pnand %p4155_p8, %p4551_p10 }
  0x82   : > { %p4158_p9 = pneg %p4157_p5 }
  0x84   : > { %p4163_p1 = pnand %p4161_p13, %p4158_p9 }
  0x86   : > { %4166 = shalt.err (!%p4163_p1)
}
  0x87   : > { %s4167_s18 = scalar_lea.vmem %s287_s3, 32  ;;  %p4175_p4 = scmp.lt.s32.totalorder %s287_s3, %s287_s3 }
  0x88   : > { %p4168_p12 = scmp.ne.s32.totalorder %s287_s3, %s4167_s18  ;;  %p4176_p6 = scmp.lt.s32.totalorder %s4167_s18, %s4167_s18 }
  0x8a   : > { %p4170_p2 = pnand %p4168_p12, %p4551_p10  ;;  %p4177_p11 = por %p4176_p6, %p4175_p4 }
  0x8c   : > { %p4171_p7 = pneg %p4170_p2 }
  0x8e   : > { %p4178_p3 = pnand %p4177_p11, %p4171_p7 }
  0x90   : > { %4181 = shalt.err (!%p4178_p3)
}
  0x91   : > { %s4422_s5 = smov 16   ;;  %s4423_s26 = smov 1  }
  0x92   : > { %p5684_p8 = scmp.ne.s32.totalorder %s5672_s17, 0  ;;  %s4424_s24 = smov [#allocation19]  }
  0x93   : > { %s300_s21 = sshll.u32 %s4424_s24, 4  ;;  %s3455_s16 = sshll.u32 %s4620_s19, 6  ;;  %s301_s21 = int_to_ptr.vmem [resolvable:$true] %s300_s21 }
  0x94   : > { %3776 = dma.hbm_to_vmem [thread:$0]  (!%p5684_p8), %s5625_s4, 32, %s287_s3, [#allocation14], %s4422_s5, %s4422_s5, %s4423_s26  }
  0x95   : > { %s4182_s18 = scalar_lea.hbm %s5628_s7, 16 }
  0x96   : > { %p4183_p3 = scmp.ne.s32.totalorder %s5628_s7, %s4182_s18  ;;  %p4189_p13 = scmp.lt.u32.totalorder %s4182_s18, %s5628_s7 }
  0x98   : > { %p4185_p5 = pnand %p4183_p3, %p4551_p10 }
  0x9a   : > { %p4186_p9 = pneg %p4185_p5 }
  0x9c   : > { %p4191_p1 = pnand %p4189_p13, %p4186_p9 }
  0x9e   : > { %4194 = shalt.err (!%p4191_p1)
}
  0x9f   : > { %s4195_s3 = scalar_lea.vmem %s301_s21, 16  ;;  %s4202_s5 = scalar_lea.vmem %s301_s21, 32 }
  0xa0   : > { %p4196_p12 = scmp.ne.s32.totalorder %s301_s21, %s4195_s3  ;;  %p4203_p4 = scmp.lt.s32.totalorder %s301_s21, %s301_s21 }
  0xa1   : > { %p4204_p6 = scmp.lt.s32.totalorder %s4202_s5, %s4195_s3 }
  0xa2   : > { %p4198_p2 = pnand %p4196_p12, %p4551_p10 }
  0xa3   : > { %p4205_p11 = por %p4204_p6, %p4203_p4 }
  0xa4   : > { %p4199_p7 = pneg %p4198_p2 }
  0xa6   : > { %p4206_p0 = pnand %p4205_p11, %p4199_p7 }
  0xa8   : > { %4209 = shalt.err (!%p4206_p0)
}
  0xa9   : > { %3779 = dma.hbm_to_vmem [thread:$0]  (!%p5684_p8), %s5628_s7, 16, %s301_s21, [#allocation20]  }
  0xaa   : > { %s3456_s9 = sshll.u32 %s4412_s11, 7  ;;  %s315_s10 = scalar_lea.vmem [#allocation7], %s3455_s16 }
  0xab   : > { %s4712_s26 = scalar_lea.hbm %s5621_s0, %s3456_s9  ;;  %s321_s27 = sshll.u32 %s315_s10, 4  ;;  %s4714_s27 = int_to_ptr.vmem [resolvable:$true] %s321_s27 }
  0xac   : > { %s312_s17 = scalar_lea.sflag [#allocation8], %s4620_s19  ;;  %s4210_s24 = scalar_lea.hbm %s4712_s26, 1024 }
  0xad   : > { %p4211_p10 = scmp.ne.s32.totalorder %s4712_s26, %s4210_s24  ;;  %p5685_p0 = scmp.ne.s32.totalorder %s5680_s13, 0 }
  0xae   : > { %s4215_s22 = scalar_lea.hbm %s5621_s0, 2048  ;;  %p4216_p9 = scmp.lt.u32.totalorder %s4712_s26, %s5621_s0 }
  0xaf   : > { %p5686_p3 = pneg %p5685_p0  ;;  %p4217_p13 = scmp.lt.u32.totalorder %s4215_s22, %s4210_s24 }
  0xb0   : > { %p4219_p12 = scmp.lt.u32.totalorder %s4210_s24, %s4712_s26 }
  0xb1   : > { %p4213_p8 = pnand %p4211_p10, %p5686_p3  ;;  %p4218_p1 = por %p4217_p13, %p4216_p9 }
  0xb3   : > { %p4214_p5 = pneg %p4213_p8  ;;  %p4220_p2 = por %p4219_p12, %p4218_p1 }
  0xb5   : > { %p4221_p7 = pnand %p4220_p2, %p4214_p5 }
  0xb7   : > { %4224 = shalt.err (!%p4221_p7)
}
  0xb8   : > { %s4225_s16 = scalar_lea.vmem %s4714_s27, 1024  ;;  %p5687_p6 = pmov %p5686_p3 }
  0xb9   : > { %p4226_p4 = scmp.ne.s32.totalorder %s4714_s27, %s4225_s16  ;;  %s4425_s5 = smov [#allocation7]  }
  0xba   : > { %s4230_s12 = sshll.u32 %s4425_s5, 4  ;;  %s4231_s12 = int_to_ptr.vmem [resolvable:$false] %s4230_s12 }
  0xbb   : > { %p4228_p11 = pnand %p4226_p4, %p5687_p6  ;;  %s4232_s15 = scalar_lea.vmem %s4231_s12, 2048 }
  0xbc   : > { %p4233_p3 = scmp.lt.s32.totalorder %s4714_s27, %s4231_s12  ;;  %p4234_p8 = scmp.lt.s32.totalorder %s4232_s15, %s4225_s16 }
  0xbd   : > { %p4229_p10 = pneg %p4228_p11 }
  0xbe   : > { %p4235_p9 = por %p4234_p8, %p4233_p3 }
  0xc0   : > { %p4236_p13 = pnand %p4235_p9, %p4229_p10 }
  0xc2   : > { %4239 = shalt.err (!%p4236_p13)
}
  0xc3   : > { %s4426_s9 = smov 256   ;;  %s5688_s14 = smov 8  }
  0xc4   : > { %s5689_s25 = smov 128   ;;  %s4746_s10 = ssub.s32 1, %s4412_s11 }
  0xc5   : > { %3783 = dma.hbm_to_vmem [thread:$0]  (!%p5685_p0), %s4712_s26, 1024, %s4714_s27, %s312_s17, %s4426_s9, %s5689_s25, %s5688_s14  }
  0xc6   : > { %s61_s13 = ssub.s32 1, %s4597_s23  ;;  %s65_s19 = sadd.s32 1, %s4396_s29 }
  0xc7   : > { %s62_s24 = ssub.s32 %s4746_s10, %s61_s13  ;;  %p72_p1 = scmp.ne.s32.totalorder %s4396_s29, %s4392_s28 }
  0xc8   : > { %p63_p5 = scmp.eq.s32.totalorder %s62_s24, 0  ;;  %s333_s21 = sand.u32 1, %s4396_s29  }
  0xc9   : > { %s3458_s8 = sshll.u32 %s4746_s10, 7  ;;  %p5690_p12 = scmp.eq.s32.totalorder %s4412_s11, 0 }
  0xca   : > { %s4756_s22 = scalar_select %p63_p5, %s4396_s29, %s65_s19  }
  0xcb   : > { %p74_p2 = por %p72_p1, %p5690_p12  ;;  %s3457_s18 = sshll.u32 %s333_s21, 6 }
  0xcc   : > { %s4763_s26 = scalar_lea.hbm %s5622_s1, %s3458_s8  ;;  %s335_s27 = scalar_lea.vmem [#allocation10], %s3457_s18 }
  0xcd   : > { %s342_s17 = sshll.u32 %s335_s27, 4  ;;  %p5691_p0 = scmp.lt.s32.totalorder %s4412_s11, 2  ;;  %s4771_s17 = int_to_ptr.vmem [resolvable:$true] %s342_s17 }
  0xce   : > { %s4773_s12 = sshll.u32 %s333_s21, 7  ;;  %s5693_s15 = sand.u32 1, %s4412_s11  }
  0xcf   : > { %p4767_p7 = pnand %p5691_p0, %p74_p2  ;;  %s4777_s13 = scalar_lea.sflag [#allocation11], %s5693_s15 }
  0xd0   : > { %s4240_s24 = scalar_lea.hbm %s4763_s26, 1024  ;;  %s4245_s18 = scalar_lea.hbm %s5622_s1, 2048 }
  0xd1   : > { %p4241_p4 = scmp.ne.s32.totalorder %s4763_s26, %s4240_s24  ;;  %p4242_p6 = pneg %p4767_p7 }
  0xd2   : > { %p4246_p3 = scmp.lt.u32.totalorder %s4763_s26, %s5622_s1  ;;  %p4247_p8 = scmp.lt.u32.totalorder %s4245_s18, %s4240_s24 }
  0xd3   : > { %p4243_p11 = pnand %p4242_p6, %p4241_p4  ;;  %p4249_p13 = scmp.lt.u32.totalorder %s4240_s24, %s4763_s26 }
  0xd4   : > { %p4248_p9 = por %p4247_p8, %p4246_p3 }
  0xd5   : > { %p4244_p10 = pneg %p4243_p11 }
  0xd6   : > { %p4250_p5 = por %p4249_p13, %p4248_p9 }
  0xd8   : > { %p4251_p1 = pnand %p4250_p5, %p4244_p10 }
  0xda   : > { %4254 = shalt.err (!%p4251_p1)
}
  0xdb   : > { %s4255_s11 = scalar_lea.vmem %s4771_s17, 1024  ;;  %s4427_s21 = smov [#allocation10]  }
  0xdc   : > { %p4256_p12 = scmp.ne.s32.totalorder %s4771_s17, %s4255_s11  ;;  %s4260_s27 = sshll.u32 %s4427_s21, 4  ;;  %s4261_s27 = int_to_ptr.vmem [resolvable:$false] %s4260_s27 }
  0xdd   : > { %s4262_s15 = scalar_lea.vmem %s4261_s27, 2048  ;;  %p4263_p4 = scmp.lt.s32.totalorder %s4771_s17, %s4261_s27 }
  0xde   : > { %p4258_p2 = pnand %p4256_p12, %p4242_p6  ;;  %p4264_p11 = scmp.lt.s32.totalorder %s4262_s15, %s4255_s11 }
  0xe0   : > { %p4259_p0 = pneg %p4258_p2  ;;  %p4265_p3 = por %p4264_p11, %p4263_p4 }
  0xe2   : > { %p4266_p8 = pnand %p4265_p3, %p4259_p0 }
  0xe4   : > { %4269 = shalt.err (!%p4266_p8)
}
  0xe5   : > { %3786 = dma.hbm_to_vmem [thread:$0]  (!%p4767_p7), %s4763_s26, 1024, %s4771_s17, %s4777_s13, %s4426_s9, %s5689_s25, %s5688_s14  }
  0xe6   : > { %s3566_s24 = sshll.u32 %s4746_s10, 11  ;;  %s377_s19 = scalar_lea.vmem [#allocation18], %s4773_s12 }
  0xe7   : > { %s385_s8 = sshll.u32 %s377_s19, 4  ;;  %s4813_s16 = scalar_lea.hbm %s5627_s6, %s3566_s24  ;;  %s4815_s8 = int_to_ptr.vmem [resolvable:$true] %s385_s8 }
  0xe8   : > { %s4270_s11 = scalar_lea.hbm %s4813_s16, 2048  ;;  %s4275_s25 = scalar_lea.hbm %s5627_s6, 4096 }
  0xe9   : > { %p4271_p10 = scmp.ne.s32.totalorder %s4813_s16, %s4270_s11  ;;  %p4276_p5 = scmp.lt.u32.totalorder %s4813_s16, %s5627_s6 }
  0xea   : > { %p4277_p1 = scmp.lt.u32.totalorder %s4275_s25, %s4270_s11  ;;  %p4279_p2 = scmp.lt.u32.totalorder %s4270_s11, %s4813_s16 }
  0xeb   : > { %p4273_p9 = pnand %p4271_p10, %p4242_p6 }
  0xec   : > { %p4278_p12 = por %p4277_p1, %p4276_p5 }
  0xed   : > { %p4274_p13 = pneg %p4273_p9 }
  0xee   : > { %p4280_p0 = por %p4279_p2, %p4278_p12 }
  0xf0   : > { %p4281_p4 = pnand %p4280_p0, %p4274_p13 }
  0xf2   : > { %4284 = shalt.err (!%p4281_p4)
}
  0xf3   : > { %s4285_s17 = scalar_lea.vmem %s4815_s8, 2048  ;;  %s4428_s12 = smov [#allocation18]  }
  0xf4   : > { %p4286_p11 = scmp.ne.s32.totalorder %s4815_s8, %s4285_s17  ;;  %s4290_s13 = sshll.u32 %s4428_s12, 4  ;;  %s4291_s13 = int_to_ptr.vmem [resolvable:$false] %s4290_s13 }
  0xf5   : > { %s4292_s21 = scalar_lea.vmem %s4291_s13, 4096  ;;  %p4293_p10 = scmp.lt.s32.totalorder %s4815_s8, %s4291_s13 }
  0xf6   : > { %p4288_p3 = pnand %p4286_p11, %p4242_p6  ;;  %p4294_p9 = scmp.lt.s32.totalorder %s4292_s21, %s4285_s17 }
  0xf8   : > { %p4289_p8 = pneg %p4288_p3  ;;  %p4295_p5 = por %p4294_p9, %p4293_p10 }
  0xfa   : > { %p4296_p1 = pnand %p4295_p5, %p4289_p8 }
  0xfc   : > { %4299 = shalt.err (!%p4296_p1)
}
  0xfd   : > { %3792 = dma.hbm_to_vmem [thread:$0]  (!%p4767_p7), %s4813_s16, 2048, %s4815_s8, %s4640_s20, %s5683_s30, %s5683_s30, %s5682_s2  }
  0xfe   : > { %s5694_s27 = sld [smem:[#allocation34_spill]] }
 0x104   : > { %p5695_p6 = scmp.ne.s32.totalorder %s5694_s27, 0 }
 0x105   : > { %s5696_s15 = sld [smem:[#allocation30_spill]] (!%p5695_p6)  ;;  %s5697_s24 = sld [smem:[#allocation36_spill]] (!%p5695_p6) }
 0x106   : > { %397 = sbr.rel (%p5695_p6) target bundleno = 6360 (0x18d8), region = 52 }
 0x10b   : > { %s399_s19 = sand.u32 (!%p5695_p6), 1, %s5696_s15   ;;  %p5698_p13 = scmp.ne.s32.totalorder (!%p5695_p6), %s5697_s24, 0 }
 0x10c   : > { %s3466_s18 = sshll.u32 (!%p5695_p6), %s399_s19, 6  ;;  %s400_s3 = scalar_lea.sflag (!%p5695_p6), [#allocation8], %s399_s19 }
 0x10d   : > { %s4847_s11 = scalar_lea.vmem [#allocation7], %s3466_s18 }
 0x10e   : > { %4355 = dma.done.wait (%p5698_p13), %s400_s3, 1024  }
 0x10f   : > { %4357 = vsyncadd (%p5698_p13), %s400_s3, 4294966272  ;;  %s5699_s5 = sld [smem:[#allocation32_spill]]  ;;  %s5700_s9 = sld [smem:[#allocation33_spill]] }
 0x110   : > { %s410_s20 = sand.u32 1, %s4392_s28  }
 0x111   : > { %s3467_s2 = sshll.u32 %s410_s20, 6 }
 0x112   : > { %s4855_s8 = scalar_lea.vmem [#allocation10], %s3467_s2 }
 0x115   : > { %s408_s14 = sand.u32 1, %s5699_s5   ;;  %p5701_p7 = scmp.ne.s32.totalorder %s5700_s9, 0 }
 0x116   : > { %s409_s30 = scalar_lea.sflag [#allocation11], %s408_s14 }
 0x117   : > { %4359 = dma.done.wait (%p5701_p7), %s409_s30, 1024  }
 0x118   : > { %4361 = vsyncadd (%p5701_p7), %s409_s30, 4294966272  ;;  %p5702_p12 = scmp.eq.s32.totalorder %s5699_s5, 0 }
 0x11a   : > { %4363 = dma.done.wait (%p5702_p12), [#allocation11], 256   ;;  %p5703_p2 = pmov %p5702_p12 }
 0x11c   : > { %4365 = vsyncadd (%p5703_p2), [#allocation11], 4294967040  ;;  %p5704_p0 = pmov %p5703_p2 }
 0x11e   : > { %4367 = dma.done.wait (%p5704_p0), [#allocation14], 1056   ;;  %p5705_p4 = pmov %p5704_p0 }
 0x11f   : > { %s3471_s16 = sshll.u32 %s399_s19, 7  ;;  %s430_s25 = scalar_lea.sflag [#allocation17], %s408_s14 }
 0x120   : > { %4369 = vsyncadd (%p5705_p4), [#allocation14], 4294966240  ;;  %s4869_s10 = scalar_lea.vmem [#allocation16], %s3471_s16 }
 0x121   : > { %4371 = dma.done.wait (%p5698_p13), %s430_s25, 2048  }
 0x122   : > { %4373 = vsyncadd (%p5698_p13), %s430_s25, 4294965248  ;;  %s3472_s26 = sshll.u32 %s410_s20, 7 }
 0x123   : > { %s4875_s17 = scalar_lea.vmem [#allocation18], %s3472_s26 }
 0x124   : > { %4375 = dma.done.wait (%p5701_p7), %s430_s25, 2048  }
 0x125   : > { %4377 = vsyncadd (%p5701_p7), %s430_s25, 4294965248  ;;  %p5706_p11 = pmov %p5704_p0 }
 0x126   : > { %p5707_p3 = pmov %p5704_p0 }
 0x127   : > { %4379 = dma.done.wait (%p5706_p11), [#allocation20], 16  }
 0x128   : > { %4381 = vsyncadd (%p5707_p3), [#allocation20], 4294967280  ;;  %p5708_p8 = scmp.ne.s32.totalorder %s5699_s5, 0 }
 0x129   : > { %vm498_vm0 = vcmask (!%p5708_p8), 261120   ;;  %vm503_vm1 = vcmask (!%p5708_p8), 31744   ;;  %v4429_v0 = vmov (!%p5708_p8), 0.0  }
 0x12a   : > { %497 = sbr.rel (%p5708_p8) target bundleno = 305 (0x131), region = 88  ;;  %499 = vst.msk [vmem:[#allocation2] sm:$0xff] (!%p5708_p8), %vm498_vm0, %v4429_v0  ;;  %500 = vst.msk [vmem:[#allocation3] sm:$0xff] (!%p5708_p8), %vm498_vm0, %v4429_v0 }
 0x12b   : > { %501 = vst.msk [vmem:[#allocation4] sm:$0xff] (!%p5708_p8), %vm498_vm0, %v4429_v0  ;;  %502 = vst.msk [vmem:[#allocation5] sm:$0xff] (!%p5708_p8), %vm498_vm0, %v4429_v0 }
 0x12c   : > { %504 = vst.msk [vmem:[#allocation6] sm:$0xff] (!%p5708_p8), %vm503_vm1, %v4429_v0 }
 0x131 PF: > { %v4887_v2 = vld [vmem:[#allocation12] sm:$0xff]   ;;  %s4430_s12 = smov 32   ;;  %v4431_v3 = vmov 0.0   ;;  %vm560_vm2 = vcmask 1041409   ;;  %vm4432_vm3 = vmmov 0   ;;  %vm563_vm4 = vcmask 1042434  }
 0x132   : > { %v1995_v1 = vld [vmem:[#allocation4] sm:$0xff]  ;;  %3643 = vmatprep.subr.bf16.mxu0 %v4431_v3  ;;  %v521_v4 = vld [vmem:[%s4847_s11] sm:$0x1]  ;;  %3645 = vmatprep.mubr.msk.bf16.mxu0 %vm4432_vm3, %v4431_v3  ;;  %v523_v6 = vld [vmem:[%s4847_s11 + $0x10] sm:$0x1]  ;;  %vm566_vm5 = vcmask 1043459  }
 0x133   : > { %1998 = vrot.lane.b32.xlu0 %v1995_v1, %s4430_s12  ;;  %3644 = vmatpush3.bf16.msra.mxu0 %v4887_v2  ;;  %v522_v5 = vld [vmem:[%s4847_s11 + $0x8] sm:$0x1]  ;;  %v524_v7 = vld [vmem:[%s4847_s11 + $0x18] sm:$0x1]  ;;  %v529_v8 = vpack.c.bf16 %v521_v4, %v521_v4  ;;  %v525_v9 = vld [vmem:[%s4847_s11 + $0x20] sm:$0x1]  ;;  %v531_v13 = vpack.c.bf16 %v523_v6, %v523_v6 }
 0x134   : > { %v526_v10 = vld [vmem:[%s4847_s11 + $0x28] sm:$0x1]  ;;  %v527_v11 = vld [vmem:[%s4847_s11 + $0x30] sm:$0x1]  ;;  %v530_v12 = vpack.c.bf16 %v522_v5, %v522_v5  ;;  %v532_v14 = vpack.c.bf16 %v524_v7, %v524_v7  ;;  %3655 = vmatprep.subr.bf16.mxu0 %v4431_v3  ;;  %3649 = vmatprep.subr.bf16.mxu1 %v4431_v3  ;;  %v528_v15 = vld [vmem:[%s4847_s11 + $0x38] sm:$0x1]  ;;  %v533_v16 = vpack.c.bf16 %v525_v9, %v525_v9 }
 0x135   : > { %v534_v17 = vpack.c.bf16 %v526_v10, %v526_v10  ;;  %v535_v18 = vpack.c.bf16 %v527_v11, %v527_v11  ;;  %v551_v19 = vunpack.c.l.b16 %v529_v8  ;;  %3650 = vmatpush3.bf16.msra.mxu1 %v4887_v2  ;;  %3651 = vmatprep.mubr.msk.bf16.mxu1 %vm4432_vm3, %v4431_v3  ;;  %v536_v20 = vpack.c.bf16 %v528_v15, %v528_v15  ;;  %v721_v27 = vld [vmem:[%s4847_s11 + $0x2] sm:$0x1]  ;;  %v722_v28 = vld [vmem:[%s4847_s11 + $0xa] sm:$0x1]  ;;  %v723_v29 = vld [vmem:[%s4847_s11 + $0x12] sm:$0x1] }
 0x136   : > { %v552_v21 = vunpack.c.l.b16 %v530_v12  ;;  %v553_v22 = vunpack.c.l.b16 %v531_v13  ;;  %v554_v23 = vunpack.c.l.b16 %v532_v14  ;;  %3661 = vmatprep.subr.bf16.mxu1 %v4431_v3  ;;  %v555_v24 = vunpack.c.l.b16 %v533_v16  ;;  %v724_v34 = vld [vmem:[%s4847_s11 + $0x1a] sm:$0x1]  ;;  %v725_v35 = vld [vmem:[%s4847_s11 + $0x22] sm:$0x1]  ;;  %v726_v38 = vld [vmem:[%s4847_s11 + $0x2a] sm:$0x1] }
 0x137   : > { %v556_v25 = vunpack.c.l.b16 %v534_v17  ;;  %v557_v26 = vunpack.c.l.b16 %v535_v18  ;;  %v558_v30 = vunpack.c.l.b16 %v536_v20  ;;  %vm569_vm6 = vcmask 1044484   ;;  %v727_v41 = vld [vmem:[%s4847_s11 + $0x32] sm:$0x1]  ;;  %v728_v44 = vld [vmem:[%s4847_s11 + $0x3a] sm:$0x1]  ;;  %s4434_s13 = smov 64  }
 0x138   : > { %v559_v31 = vrot.slane %v552_v21, 7  ;;  %v562_v32 = vrot.slane %v553_v22, 6  ;;  %v565_v33 = vrot.slane %v554_v23, 5  ;;  %v568_v36 = vrot.slane %v555_v24, 4  ;;  %v631_v61 = vld [vmem:[%s4847_s11 + $0x1] sm:$0x1] }
 0x139   : > { %v571_v37 = vrot.slane %v556_v25, 3  ;;  %vm572_vm7 = vcmask 1045509   ;;  %v574_v40 = vrot.slane %v557_v26, 2  ;;  %vm575_vm8 = vcmask 1046534   ;;  %v632_v4 = vld [vmem:[%s4847_s11 + $0x9] sm:$0x1] }
 0x13a   : > { %v561_v39 = vsel %vm560_vm2, %v559_v31, %v551_v19  ;;  %v577_v43 = vrot.slane %v558_v30, 1  ;;  %vm578_vm9 = vcmask 1047559   ;;  %vm587_vm10 = vcmask 130048   ;;  %v633_v5 = vld [vmem:[%s4847_s11 + $0x11] sm:$0x1]  ;;  %s4435_s21 = smov 96  }
 0x13b   : > { %v564_v42 = vsel %vm563_vm4, %v562_v32, %v561_v39  ;;  %v729_v46 = vpack.c.bf16 %v721_v27, %v721_v27  ;;  %v730_v47 = vpack.c.bf16 %v722_v28, %v722_v28  ;;  %v731_v48 = vpack.c.bf16 %v723_v29, %v723_v29  ;;  %v634_v6 = vld [vmem:[%s4847_s11 + $0x19] sm:$0x1]  ;;  %v635_v11 = vld [vmem:[%s4847_s11 + $0x21] sm:$0x1]  ;;  %v636_v12 = vld [vmem:[%s4847_s11 + $0x29] sm:$0x1] }
 0x13c   : > { %v567_v45 = vsel %vm566_vm5, %v565_v33, %v564_v42  ;;  %v732_v50 = vpack.c.bf16 %v724_v34, %v724_v34  ;;  %v733_v51 = vpack.c.bf16 %v725_v35, %v725_v35  ;;  %v734_v52 = vpack.c.bf16 %v726_v38, %v726_v38  ;;  %v637_v16 = vld [vmem:[%s4847_s11 + $0x31] sm:$0x1]  ;;  %v638_v19 = vld [vmem:[%s4847_s11 + $0x39] sm:$0x1]  ;;  %v901_v34 = vld [vmem:[%s4847_s11 + $0x4] sm:$0x1] }
 0x13d   : > { %v570_v49 = vsel %vm569_vm6, %v568_v36, %v567_v45  ;;  %v735_v54 = vpack.c.bf16 %v727_v41, %v727_v41  ;;  %v736_v55 = vpack.c.bf16 %v728_v44, %v728_v44  ;;  %v745_v56 = vunpack.c.l.b16 %v729_v46  ;;  %v902_v39 = vld [vmem:[%s4847_s11 + $0xc] sm:$0x1]  ;;  %v903_v44 = vld [vmem:[%s4847_s11 + $0x14] sm:$0x1]  ;;  %v904_v45 = vld [vmem:[%s4847_s11 + $0x1c] sm:$0x1] }
 0x13e   : > { %v573_v53 = vsel %vm572_vm7, %v571_v37, %v570_v49  ;;  %v746_v58 = vunpack.c.l.b16 %v730_v47  ;;  %v747_v59 = vunpack.c.l.b16 %v731_v48  ;;  %v748_v60 = vunpack.c.l.b16 %v732_v50  ;;  %v905_v46 = vld [vmem:[%s4847_s11 + $0x24] sm:$0x1]  ;;  %s5709_s27 = sld [smem:[#allocation32_spill]] }
 0x13f   : > { %v576_v57 = vsel %vm575_vm8, %v574_v40, %v573_v53  ;;  %v749_v63 = vunpack.c.l.b16 %v733_v51  ;;  %v750_v0 = vunpack.c.l.b16 %v734_v52  ;;  %v751_v1 = vunpack.c.l.b16 %v735_v54  ;;  %v906_v51 = vld [vmem:[%s4847_s11 + $0x2c] sm:$0x1] }
 0x140   : > { %v579_v62 = vsel %vm578_vm9, %v577_v43, %v576_v57  ;;  %v752_v8 = vunpack.c.l.b16 %v736_v55  ;;  %v753_v9 = vrot.slane %v746_v58, 7  ;;  %v755_v10 = vrot.slane %v747_v59, 6  ;;  %v908_v59 = vld [vmem:[%s4847_s11 + $0x3c] sm:$0x1] }
 0x141   : > { %v580_v7 = vpack.c.b16 %v579_v62, %v579_v62  ;;  %v757_v13 = vrot.slane %v748_v60, 5  ;;  %v759_v14 = vrot.slane %v749_v63, 4  ;;  %v761_v15 = vrot.slane %v750_v0, 3 }
 0x142   : > { %v754_v17 = vsel %vm560_vm2, %v753_v9, %v745_v56  ;;  %v763_v18 = vrot.slane %v751_v1, 2  ;;  %v639_v20 = vpack.c.bf16 %v631_v61, %v631_v61  ;;  %v640_v21 = vpack.c.bf16 %v632_v4, %v632_v4  ;;  %v907_v56 = vld [vmem:[%s4847_s11 + $0x34] sm:$0x1] }
 0x143   : > { %3646 = vmatmul.mubr.msk.bf16.vlgmr.msra.gmra.mrb[0].mxu0 %vm587_vm10, %v580_v7  ;;  %v756_v22 = vsel %vm563_vm4, %v755_v10, %v754_v17  ;;  %v765_v23 = vrot.slane %v752_v8, 1  ;;  %v641_v24 = vpack.c.bf16 %v633_v5, %v633_v5  ;;  %v642_v25 = vpack.c.bf16 %v634_v6, %v634_v6  ;;  %v812_v17 = vld [vmem:[%s4847_s11 + $0xb] sm:$0x1] }
 0x144   : > { %3656 = vmatpush3.bf16.msra.mxu0 %v4887_v2  ;;  %3657 = vmatprep.mubr.msk.bf16.mxu0 %vm4432_vm3, %v4431_v3  ;;  %v758_v26 = vsel %vm566_vm5, %v757_v13, %v756_v22  ;;  %v643_v27 = vpack.c.bf16 %v635_v11, %v635_v11  ;;  %v644_v28 = vpack.c.bf16 %v636_v12, %v636_v12  ;;  %v655_v32 = vunpack.c.l.b16 %v639_v20  ;;  %v813_v22 = vld [vmem:[%s4847_s11 + $0x13] sm:$0x1]  ;;  %p3559_p10 = scmp.ne.s32.totalorder %s5709_s27, 1 }
 0x145   : > { %3667 = vmatprep.subr.bf16.mxu0 %v4431_v3  ;;  %v645_v29 = vpack.c.bf16 %v637_v16, %v637_v16  ;;  %v760_v30 = vsel %vm569_vm6, %v759_v14, %v758_v26  ;;  %v646_v31 = vpack.c.bf16 %v638_v19, %v638_v19  ;;  %v656_v33 = vunpack.c.l.b16 %v640_v21  ;;  %v811_v16 = vld [vmem:[%s4847_s11 + $0x3] sm:$0x1] }
 0x146   : > { %v762_v35 = vsel %vm572_vm7, %v761_v15, %v760_v30  ;;  %v657_v36 = vunpack.c.l.b16 %v641_v24  ;;  %v658_v37 = vunpack.c.l.b16 %v642_v25  ;;  %v659_v38 = vunpack.c.l.b16 %v643_v27 }
 0x147   : > { %v764_v40 = vsel %vm575_vm8, %v763_v18, %v762_v35  ;;  %v660_v41 = vunpack.c.l.b16 %v644_v28  ;;  %v661_v42 = vunpack.c.l.b16 %v645_v29  ;;  %v662_v43 = vunpack.c.l.b16 %v646_v31  ;;  %v815_v28 = vld [vmem:[%s4847_s11 + $0x23] sm:$0x1] }
 0x148   : > { %v766_v47 = vsel %vm578_vm9, %v765_v23, %v764_v40  ;;  %v663_v48 = vrot.slane %v656_v33, 7  ;;  %v665_v49 = vrot.slane %v657_v36, 6  ;;  %v667_v50 = vrot.slane %v658_v37, 5  ;;  %v814_v23 = vld [vmem:[%s4847_s11 + $0x1b] sm:$0x1] }
 0x149   : > { %v767_v52 = vpack.c.b16 %v766_v47, %v766_v47  ;;  %v669_v53 = vrot.slane %v659_v38, 4  ;;  %v671_v54 = vrot.slane %v660_v41, 3  ;;  %v673_v55 = vrot.slane %v661_v42, 2  ;;  %v816_v33 = vld [vmem:[%s4847_s11 + $0x2b] sm:$0x1] }
 0x14a   : > { %v664_v57 = vsel %vm560_vm2, %v663_v48, %v655_v32  ;;  %v675_v58 = vrot.slane %v662_v43, 1  ;;  %v909_v60 = vpack.c.bf16 %v901_v34, %v901_v34  ;;  %v910_v61 = vpack.c.bf16 %v902_v39, %v902_v39  ;;  %v817_v34 = vld [vmem:[%s4847_s11 + $0x33] sm:$0x1]  ;;  %v818_v37 = vld [vmem:[%s4847_s11 + $0x3b] sm:$0x1] }
 0x14b   : > { %3658 = vmatmul.mubr.msk.bf16.vlgmr.msra.gmra.mrb[4].mxu0 %vm587_vm10, %v767_v52  ;;  %v666_v62 = vsel %vm563_vm4, %v665_v49, %v664_v57  ;;  %v911_v63 = vpack.c.bf16 %v903_v44, %v903_v44  ;;  %v912_v0 = vpack.c.bf16 %v904_v45, %v904_v45  ;;  %v913_v1 = vpack.c.bf16 %v905_v46, %v905_v46  ;;  %v1082_v57 = vld [vmem:[%s4847_s11 + $0xe] sm:$0x1] }
 0x14c   : > { %3668 = vmatpush3.bf16.msra.mxu0 %v4887_v2  ;;  %v668_v4 = vsel %vm566_vm5, %v667_v50, %v666_v62  ;;  %3669 = vmatprep.mubr.msk.bf16.mxu0 %vm4432_vm3, %v4431_v3  ;;  %v914_v5 = vpack.c.bf16 %v906_v51, %v906_v51  ;;  %v915_v6 = vpack.c.bf16 %v907_v56, %v907_v56  ;;  %v925_v7 = vunpack.c.l.b16 %v909_v60  ;;  %v1081_v56 = vld [vmem:[%s4847_s11 + $0x6] sm:$0x1] }
 0x14d   : > { %v670_v8 = vsel %vm569_vm6, %v669_v53, %v668_v4  ;;  %v916_v9 = vpack.c.bf16 %v908_v59, %v908_v59  ;;  %v926_v10 = vunpack.c.l.b16 %v910_v61  ;;  %v927_v11 = vunpack.c.l.b16 %v911_v63  ;;  %3679 = vmatprep.subr.bf16.mxu0 %v4431_v3  ;;  %v1084_v63 = vld [vmem:[%s4847_s11 + $0x1e] sm:$0x1] }
 0x14e   : > { %v672_v12 = vsel %vm572_vm7, %v671_v54, %v670_v8  ;;  %v928_v13 = vunpack.c.l.b16 %v912_v0  ;;  %v929_v14 = vunpack.c.l.b16 %v913_v1  ;;  %v930_v15 = vunpack.c.l.b16 %v914_v5  ;;  %v1085_v0 = vld [vmem:[%s4847_s11 + $0x26] sm:$0x1] }
 0x14f   : > { %v674_v18 = vsel %vm575_vm8, %v673_v55, %v672_v12  ;;  %v931_v19 = vunpack.c.l.b16 %v915_v6  ;;  %v932_v20 = vunpack.c.l.b16 %v916_v9  ;;  %v933_v21 = vrot.slane %v926_v10, 7  ;;  %v1088_v12 = vld [vmem:[%s4847_s11 + $0x3e] sm:$0x1] }
 0x150   : > { %v676_v24 = vsel %vm578_vm9, %v675_v58, %v674_v18  ;;  %v935_v25 = vrot.slane %v927_v11, 6  ;;  %v937_v26 = vrot.slane %v928_v13, 5  ;;  %v939_v27 = vrot.slane %v929_v14, 4  ;;  %v1083_v58 = vld [vmem:[%s4847_s11 + $0x16] sm:$0x1] }
 0x151   : > { %v677_v29 = vpack.c.b16 %v676_v24, %v676_v24  ;;  %v934_v30 = vsel %vm560_vm2, %v933_v21, %v925_v7  ;;  %v941_v31 = vrot.slane %v930_v15, 3  ;;  %v943_v32 = vrot.slane %v931_v19, 2  ;;  %v1086_v7 = vld [vmem:[%s4847_s11 + $0x2e] sm:$0x1]  ;;  %v1087_v11 = vld [vmem:[%s4847_s11 + $0x36] sm:$0x1] }
 0x152   : > { %v936_v35 = vsel %vm563_vm4, %v935_v25, %v934_v30  ;;  %v945_v36 = vrot.slane %v932_v20, 1  ;;  %v819_v38 = vpack.c.bf16 %v811_v16, %v811_v16  ;;  %v820_v39 = vpack.c.bf16 %v812_v17, %v812_v17 }
 0x153   : > { %3652 = vmatmul.mubr.msk.bf16.vlgmr.msra.gmra.mrb[0].mxu1 %vm587_vm10, %v677_v29  ;;  %v938_v40 = vsel %vm566_vm5, %v937_v26, %v936_v35  ;;  %v821_v41 = vpack.c.bf16 %v813_v22, %v813_v22  ;;  %v822_v42 = vpack.c.bf16 %v814_v23, %v814_v23  ;;  %v823_v43 = vpack.c.bf16 %v815_v28, %v815_v28  ;;  %v993_v35 = vld [vmem:[%s4847_s11 + $0x15] sm:$0x1] }
 0x154   : > { %v940_v44 = vsel %vm569_vm6, %v939_v27, %v938_v40  ;;  %3662 = vmatpush3.bf16.msra.mxu1 %v4887_v2  ;;  %3663 = vmatprep.mubr.msk.bf16.mxu1 %vm4432_vm3, %v4431_v3  ;;  %v824_v45 = vpack.c.bf16 %v816_v33, %v816_v33  ;;  %v825_v46 = vpack.c.bf16 %v817_v34, %v817_v34  ;;  %v835_v47 = vunpack.c.l.b16 %v819_v38  ;;  %v991_v33 = vld [vmem:[%s4847_s11 + $0x5] sm:$0x1]  ;;  %v992_v34 = vld [vmem:[%s4847_s11 + $0xd] sm:$0x1]  ;;  %v994_v40 = vld [vmem:[%s4847_s11 + $0x1d] sm:$0x1] }
 0x155   : > { %v942_v48 = vsel %vm572_vm7, %v941_v31, %v940_v44  ;;  %v826_v49 = vpack.c.bf16 %v818_v37, %v818_v37  ;;  %v836_v50 = vunpack.c.l.b16 %v820_v39  ;;  %v837_v51 = vunpack.c.l.b16 %v821_v41  ;;  %3673 = vmatprep.subr.bf16.mxu1 %v4431_v3  ;;  %v995_v41 = vld [vmem:[%s4847_s11 + $0x25] sm:$0x1] }
 0x156   : > { %v944_v52 = vsel %vm575_vm8, %v943_v32, %v942_v48  ;;  %v838_v53 = vunpack.c.l.b16 %v822_v42  ;;  %v839_v54 = vunpack.c.l.b16 %v823_v43  ;;  %v840_v55 = vunpack.c.l.b16 %v824_v45 }
 0x157   : > { %v946_v59 = vsel %vm578_vm9, %v945_v36, %v944_v52  ;;  %v841_v60 = vunpack.c.l.b16 %v825_v46  ;;  %v842_v61 = vunpack.c.l.b16 %v826_v49  ;;  %v843_v62 = vrot.slane %v836_v50, 7  ;;  %v996_v46 = vld [vmem:[%s4847_s11 + $0x2d] sm:$0x1]  ;;  %v997_v50 = vld [vmem:[%s4847_s11 + $0x35] sm:$0x1] }
 0x158   : > { %v947_v1 = vpack.c.b16 %v946_v59, %v946_v59  ;;  %v845_v4 = vrot.slane %v837_v51, 6  ;;  %v847_v5 = vrot.slane %v838_v53, 5  ;;  %v849_v6 = vrot.slane %v839_v54, 4  ;;  %v998_v51 = vld [vmem:[%s4847_s11 + $0x3d] sm:$0x1] }
 0x159   : > { %v844_v8 = vsel %vm560_vm2, %v843_v62, %v835_v47  ;;  %v851_v9 = vrot.slane %v840_v55, 3  ;;  %v853_v10 = vrot.slane %v841_v60, 2  ;;  %v1089_v14 = vpack.c.bf16 %v1081_v56, %v1081_v56 }
 0x15a   : > { %3670 = vmatmul.mubr.msk.bf16.vlgmr.msra.gmra.mrb[8].mxu0 %vm587_vm10, %v947_v1  ;;  %v846_v13 = vsel %vm563_vm4, %v845_v4, %v844_v8  ;;  %v1090_v15 = vpack.c.bf16 %v1082_v57, %v1082_v57  ;;  %v1091_v16 = vpack.c.bf16 %v1083_v58, %v1083_v58  ;;  %v855_v18 = vrot.slane %v842_v61, 1 }
 0x15b   : > { %3680 = vmatpush3.bf16.msra.mxu0 %v4887_v2  ;;  %v848_v17 = vsel %vm566_vm5, %v847_v5, %v846_v13  ;;  %3681 = vmatprep.mubr.msk.bf16.mxu0 %vm4432_vm3, %v4431_v3  ;;  %v1092_v19 = vpack.c.bf16 %v1084_v63, %v1084_v63  ;;  %v1093_v20 = vpack.c.bf16 %v1085_v0, %v1085_v0  ;;  %v1105_v26 = vunpack.c.l.b16 %v1089_v14  ;;  %v5026_v14 = vld [vmem:[#allocation12 + $0x8] sm:$0xff]  }
 0x15c   : > { %v850_v21 = vsel %vm569_vm6, %v849_v6, %v848_v17  ;;  %v1094_v22 = vpack.c.bf16 %v1086_v7, %v1086_v7  ;;  %v1095_v23 = vpack.c.bf16 %v1087_v11, %v1087_v11  ;;  %v1096_v24 = vpack.c.bf16 %v1088_v12, %v1088_v12  ;;  %3691 = vmatprep.subr.bf16.mxu0 %v4431_v3  ;;  %v1262_v11 = vld [vmem:[%s4855_s8 + $0x8] sm:$0x1]  ;;  %v1263_v12 = vld [vmem:[%s4855_s8 + $0x10] sm:$0x1] }
 0x15d   : > { %v852_v25 = vsel %vm572_vm7, %v851_v9, %v850_v21  ;;  %v1106_v27 = vunpack.c.l.b16 %v1090_v15  ;;  %v1107_v28 = vunpack.c.l.b16 %v1091_v16  ;;  %v1108_v30 = vunpack.c.l.b16 %v1092_v19  ;;  %v1265_v19 = vld [vmem:[%s4855_s8 + $0x20] sm:$0x1] }
 0x15e   : > { %v854_v29 = vsel %vm575_vm8, %v853_v10, %v852_v25  ;;  %v1109_v31 = vunpack.c.l.b16 %v1093_v20  ;;  %v1110_v32 = vunpack.c.l.b16 %v1094_v22  ;;  %v1111_v37 = vunpack.c.l.b16 %v1095_v23  ;;  %v1261_v10 = vld [vmem:[%s4855_s8] sm:$0x1] }
 0x15f   : > { %v856_v36 = vsel %vm578_vm9, %v855_v18, %v854_v29  ;;  %v1112_v38 = vunpack.c.l.b16 %v1096_v24  ;;  %v1113_v39 = vrot.slane %v1106_v27, 7  ;;  %v1115_v43 = vrot.slane %v1107_v28, 6  ;;  %v1264_v18 = vld [vmem:[%s4855_s8 + $0x18] sm:$0x1]  ;;  %v1266_v24 = vld [vmem:[%s4855_s8 + $0x28] sm:$0x1] }
 0x160   : > { %v857_v42 = vpack.c.b16 %v856_v36, %v856_v36  ;;  %v1117_v44 = vrot.slane %v1108_v30, 5  ;;  %v1119_v45 = vrot.slane %v1109_v31, 4  ;;  %v1121_v48 = vrot.slane %v1110_v32, 3  ;;  %v1267_v28 = vld [vmem:[%s4855_s8 + $0x30] sm:$0x1] }
 0x161   : > { %v1114_v47 = vsel %vm560_vm2, %v1113_v39, %v1105_v26  ;;  %v1123_v49 = vrot.slane %v1111_v37, 2  ;;  %v999_v53 = vpack.c.bf16 %v991_v33, %v991_v33  ;;  %v1000_v54 = vpack.c.bf16 %v992_v34, %v992_v34  ;;  %v1268_v29 = vld [vmem:[%s4855_s8 + $0x38] sm:$0x1] }
 0x162   : > { %3664 = vmatmul.mubr.msk.bf16.vlgmr.msra.gmra.mrb[4].mxu1 %vm587_vm10, %v857_v42  ;;  %v1116_v52 = vsel %vm563_vm4, %v1115_v43, %v1114_v47  ;;  %v1001_v55 = vpack.c.bf16 %v993_v35, %v993_v35  ;;  %v1125_v57 = vrot.slane %v1112_v38, 1  ;;  %v1002_v58 = vpack.c.bf16 %v994_v40, %v994_v40  ;;  %v1172_v47 = vld [vmem:[%s4847_s11 + $0xf] sm:$0x1] }
 0x163   : > { %v1118_v56 = vsel %vm566_vm5, %v1117_v44, %v1116_v52  ;;  %3674 = vmatpush3.bf16.msra.mxu1 %v4887_v2  ;;  %3675 = vmatprep.mubr.msk.bf16.mxu1 %vm4432_vm3, %v4431_v3  ;;  %v1003_v59 = vpack.c.bf16 %v995_v41, %v995_v41  ;;  %v1004_v61 = vpack.c.bf16 %v996_v46, %v996_v46  ;;  %v1015_v1 = vunpack.c.l.b16 %v999_v53  ;;  %v1171_v46 = vld [vmem:[%s4847_s11 + $0x7] sm:$0x1]  ;;  %v1174_v53 = vld [vmem:[%s4847_s11 + $0x1f] sm:$0x1] }
 0x164   : > { %v1120_v60 = vsel %vm569_vm6, %v1119_v45, %v1118_v56  ;;  %v1005_v62 = vpack.c.bf16 %v997_v50, %v997_v50  ;;  %v1006_v63 = vpack.c.bf16 %v998_v51, %v998_v51  ;;  %3685 = vmatprep.subr.bf16.mxu1 %v4431_v3  ;;  %v1016_v4 = vunpack.c.l.b16 %v1000_v54  ;;  %v1175_v54 = vld [vmem:[%s4847_s11 + $0x27] sm:$0x1] }
 0x165   : > { %v1122_v0 = vsel %vm572_vm7, %v1121_v48, %v1120_v60  ;;  %v1017_v5 = vunpack.c.l.b16 %v1001_v55  ;;  %v1018_v7 = vunpack.c.l.b16 %v1002_v58  ;;  %v1019_v8 = vunpack.c.l.b16 %v1003_v59  ;;  %v1173_v48 = vld [vmem:[%s4847_s11 + $0x17] sm:$0x1]  ;;  %v1176_v59 = vld [vmem:[%s4847_s11 + $0x2f] sm:$0x1] }
 0x166   : > { %v1124_v6 = vsel %vm575_vm8, %v1123_v49, %v1122_v0  ;;  %v1020_v9 = vunpack.c.l.b16 %v1004_v61  ;;  %v1021_v15 = vunpack.c.l.b16 %v1005_v62  ;;  %v1022_v16 = vunpack.c.l.b16 %v1006_v63  ;;  %v1177_v60 = vld [vmem:[%s4847_s11 + $0x37] sm:$0x1] }
 0x167   : > { %v1126_v13 = vsel %vm578_vm9, %v1125_v57, %v1124_v6  ;;  %v1023_v17 = vrot.slane %v1016_v4, 7  ;;  %v1025_v21 = vrot.slane %v1017_v5, 6  ;;  %v1027_v22 = vrot.slane %v1018_v7, 5  ;;  %v1178_v6 = vld [vmem:[%s4847_s11 + $0x3f] sm:$0x1] }
 0x168   : > { %v1127_v20 = vpack.c.b16 %v1126_v13, %v1126_v13  ;;  %v1029_v23 = vrot.slane %v1019_v8, 4  ;;  %v1031_v26 = vrot.slane %v1020_v9, 3  ;;  %v1033_v27 = vrot.slane %v1021_v15, 2 }
 0x169   : > { %v1024_v25 = vsel %vm560_vm2, %v1023_v17, %v1015_v1  ;;  %v1269_v31 = vpack.c.bf16 %v1261_v10, %v1261_v10  ;;  %v1270_v32 = vpack.c.bf16 %v1262_v11, %v1262_v11  ;;  %v1271_v33 = vpack.c.bf16 %v1263_v12, %v1263_v12 }
 0x16a   : > { %3682 = vmatmul.mubr.msk.bf16.vlgmr.msra.gmra.mrb[12].mxu0 %vm587_vm10, %v1127_v20  ;;  %v1026_v30 = vsel %vm563_vm4, %v1025_v21, %v1024_v25  ;;  %v1035_v35 = vrot.slane %v1022_v16, 1  ;;  %v1272_v36 = vpack.c.bf16 %v1264_v18, %v1264_v18  ;;  %v1273_v37 = vpack.c.bf16 %v1265_v19, %v1265_v19  ;;  %v1455_v25 = vld [vmem:[%s4855_s8 + $0x12] sm:$0x1] }
 0x16b   : > { %3692 = vmatpush3.bf16.msra.mxu0 %v5026_v14  ;;  %v1028_v34 = vsel %vm566_vm5, %v1027_v22, %v1026_v30  ;;  %3693 = vmatprep.mubr.msk.bf16.mxu0 %vm4432_vm3, %v4431_v3  ;;  %v1274_v39 = vpack.c.bf16 %v1266_v24, %v1266_v24  ;;  %v1275_v40 = vpack.c.bf16 %v1267_v28, %v1267_v28  ;;  %v1291_v43 = vunpack.c.l.b16 %v1269_v31  ;;  %v1454_v24 = vld [vmem:[%s4855_s8 + $0xa] sm:$0x1]  ;;  %v1456_v30 = vld [vmem:[%s4855_s8 + $0x1a] sm:$0x1]  ;;  %v1457_v31 = vld [vmem:[%s4855_s8 + $0x22] sm:$0x1] }
 0x16c   : > { %v1030_v38 = vsel %vm569_vm6, %v1029_v23, %v1028_v34  ;;  %v1276_v41 = vpack.c.bf16 %v1268_v29, %v1268_v29  ;;  %3703 = vmatprep.subr.bf16.mxu0 %v4431_v3  ;;  %v1292_v44 = vunpack.c.l.b16 %v1270_v32  ;;  %v1293_v45 = vunpack.c.l.b16 %v1271_v33  ;;  %v1453_v23 = vld [vmem:[%s4855_s8 + $0x2] sm:$0x1] }
 0x16d   : > { %v1032_v42 = vsel %vm572_vm7, %v1031_v26, %v1030_v38  ;;  %v1294_v50 = vunpack.c.l.b16 %v1272_v36  ;;  %v1295_v51 = vunpack.c.l.b16 %v1273_v37  ;;  %v1296_v52 = vunpack.c.l.b16 %v1274_v39  ;;  %v1458_v36 = vld [vmem:[%s4855_s8 + $0x2a] sm:$0x1]  ;;  %v1459_v37 = vld [vmem:[%s4855_s8 + $0x32] sm:$0x1] }
 0x16e   : > { %v1034_v49 = vsel %vm575_vm8, %v1033_v27, %v1032_v42  ;;  %v1297_v56 = vunpack.c.l.b16 %v1275_v40  ;;  %v1298_v57 = vunpack.c.l.b16 %v1276_v41  ;;  %v1299_v58 = vrot.slane %v1292_v44, 7 }
 0x16f   : > { %v1036_v55 = vsel %vm578_vm9, %v1035_v35, %v1034_v49  ;;  %v1301_v62 = vrot.slane %v1293_v45, 6  ;;  %v1303_v63 = vrot.slane %v1294_v50, 5  ;;  %v1305_v0 = vrot.slane %v1295_v51, 4  ;;  %v1460_v45 = vld [vmem:[%s4855_s8 + $0x3a] sm:$0x1] }
 0x170   : > { %v1037_v61 = vpack.c.b16 %v1036_v55, %v1036_v55  ;;  %v1300_v1 = vsel %vm560_vm2, %v1299_v58, %v1291_v43  ;;  %v1307_v4 = vrot.slane %v1296_v52, 3  ;;  %v1309_v5 = vrot.slane %v1297_v56, 2 }
 0x171   : > { %v1302_v7 = vsel %vm563_vm4, %v1301_v62, %v1300_v1  ;;  %v1179_v8 = vpack.c.bf16 %v1171_v46, %v1171_v46  ;;  %v1180_v9 = vpack.c.bf16 %v1172_v47, %v1172_v47  ;;  %v1181_v10 = vpack.c.bf16 %v1173_v48, %v1173_v48  ;;  %v1363_v62 = vld [vmem:[%s4855_s8 + $0x1] sm:$0x1] }
 0x172   : > { %3676 = vmatmul.mubr.msk.bf16.vlgmr.msra.gmra.mrb[8].mxu1 %vm587_vm10, %v1037_v61  ;;  %v1304_v11 = vsel %vm566_vm5, %v1303_v63, %v1302_v7  ;;  %v1311_v12 = vrot.slane %v1298_v57, 1  ;;  %v1182_v13 = vpack.c.bf16 %v1174_v53, %v1174_v53  ;;  %v1183_v15 = vpack.c.bf16 %v1175_v54, %v1175_v54  ;;  %v1364_v63 = vld [vmem:[%s4855_s8 + $0x9] sm:$0x1]  ;;  %v1366_v7 = vld [vmem:[%s4855_s8 + $0x19] sm:$0x1] }
 0x173   : > { %3686 = vmatpush3.bf16.msra.mxu1 %v4887_v2  ;;  %3687 = vmatprep.mubr.msk.bf16.mxu1 %vm4432_vm3, %v4431_v3  ;;  %v1306_v16 = vsel %vm569_vm6, %v1305_v0, %v1304_v11  ;;  %v1184_v17 = vpack.c.bf16 %v1176_v59, %v1176_v59  ;;  %v1185_v18 = vpack.c.bf16 %v1177_v60, %v1177_v60  ;;  %v1195_v21 = vunpack.c.l.b16 %v1179_v8  ;;  %v1365_v0 = vld [vmem:[%s4855_s8 + $0x11] sm:$0x1]  ;;  %v1367_v8 = vld [vmem:[%s4855_s8 + $0x21] sm:$0x1] }
 0x174   : > { %v1186_v19 = vpack.c.bf16 %v1178_v6, %v1178_v6  ;;  %3697 = vmatprep.subr.bf16.mxu1 %v4431_v3  ;;  %v1308_v20 = vsel %vm572_vm7, %v1307_v4, %v1306_v16  ;;  %v1196_v22 = vunpack.c.l.b16 %v1180_v9  ;;  %v1197_v2 = vunpack.c.l.b16 %v1181_v10  ;;  %v1370_v16 = vld [vmem:[%s4855_s8 + $0x39] sm:$0x1] }
 0x175   : > { %v1310_v26 = vsel %vm575_vm8, %v1309_v5, %v1308_v20  ;;  %v1198_v27 = vunpack.c.l.b16 %v1182_v13  ;;  %v1199_v28 = vunpack.c.l.b16 %v1183_v15  ;;  %v1200_v29 = vunpack.c.l.b16 %v1184_v17  ;;  %v1368_v13 = vld [vmem:[%s4855_s8 + $0x29] sm:$0x1]  ;;  %v1369_v15 = vld [vmem:[%s4855_s8 + $0x31] sm:$0x1] }
 0x176   : > { %v1312_v32 = vsel %vm578_vm9, %v1311_v12, %v1310_v26  ;;  %v1201_v33 = vunpack.c.l.b16 %v1185_v18  ;;  %v1202_v34 = vunpack.c.l.b16 %v1186_v19  ;;  %v1203_v35 = vrot.slane %v1196_v22, 7 }
 0x177   : > { %v1313_v38 = vpack.c.b16 %v1312_v32, %v1312_v32  ;;  %v1205_v39 = vrot.slane %v1197_v2, 6  ;;  %v1207_v40 = vrot.slane %v1198_v27, 5  ;;  %v1209_v41 = vrot.slane %v1199_v28, 4 }
 0x178   : > { %v1204_v42 = vsel %vm560_vm2, %v1203_v35, %v1195_v21  ;;  %v1211_v43 = vrot.slane %v1200_v29, 3  ;;  %v1213_v44 = vrot.slane %v1201_v33, 2  ;;  %v1461_v47 = vpack.c.bf16 %v1453_v23, %v1453_v23 }
 0x179   : > { %3694 = vmatmul.mubr.msk.bf16.vlgmr.msra.gmra.mrb[16].mxu0 %vm587_vm10, %v1313_v38  ;;  %v1206_v46 = vsel %vm563_vm4, %v1205_v39, %v1204_v42  ;;  %v1462_v48 = vpack.c.bf16 %v1454_v24, %v1454_v24  ;;  %v1463_v49 = vpack.c.bf16 %v1455_v25, %v1455_v25  ;;  %v1215_v51 = vrot.slane %v1202_v34, 1  ;;  %v1633_v39 = vld [vmem:[%s4855_s8 + $0x4] sm:$0x1] }
 0x17a   : > { %3704 = vmatpush3.bf16.msra.mxu0 %v5026_v14  ;;  %v1208_v50 = vsel %vm566_vm5, %v1207_v40, %v1206_v46  ;;  %3705 = vmatprep.mubr.msk.bf16.mxu0 %vm4432_vm3, %v4431_v3  ;;  %v1464_v52 = vpack.c.bf16 %v1456_v30, %v1456_v30  ;;  %v1465_v53 = vpack.c.bf16 %v1457_v31, %v1457_v31  ;;  %v1477_v59 = vunpack.c.l.b16 %v1461_v47  ;;  %v1634_v40 = vld [vmem:[%s4855_s8 + $0xc] sm:$0x1]  ;;  %v1636_v46 = vld [vmem:[%s4855_s8 + $0x1c] sm:$0x1]  ;;  %v1637_v47 = vld [vmem:[%s4855_s8 + $0x24] sm:$0x1] }
 0x17b   : > { %v1210_v54 = vsel %vm569_vm6, %v1209_v41, %v1208_v50  ;;  %v1466_v55 = vpack.c.bf16 %v1458_v36, %v1458_v36  ;;  %v1467_v56 = vpack.c.bf16 %v1459_v37, %v1459_v37  ;;  %v1468_v57 = vpack.c.bf16 %v1460_v45, %v1460_v45  ;;  %3715 = vmatprep.subr.bf16.mxu0 %v4431_v3  ;;  %v1635_v41 = vld [vmem:[%s4855_s8 + $0x14] sm:$0x1] }
 0x17c   : > { %v1212_v58 = vsel %vm572_vm7, %v1211_v43, %v1210_v54  ;;  %v1478_v60 = vunpack.c.l.b16 %v1462_v48  ;;  %v1479_v61 = vunpack.c.l.b16 %v1463_v49  ;;  %v1480_v4 = vunpack.c.l.b16 %v1464_v52  ;;  %v1638_v52 = vld [vmem:[%s4855_s8 + $0x2c] sm:$0x1] }
 0x17d   : > { %v1214_v1 = vsel %vm575_vm8, %v1213_v44, %v1212_v58  ;;  %v1481_v5 = vunpack.c.l.b16 %v1465_v53  ;;  %v1482_v6 = vunpack.c.l.b16 %v1466_v55  ;;  %v1483_v10 = vunpack.c.l.b16 %v1467_v56 }
 0x17e   : > { %v1216_v9 = vsel %vm578_vm9, %v1215_v51, %v1214_v1  ;;  %v1484_v11 = vunpack.c.l.b16 %v1468_v57  ;;  %v1485_v12 = vrot.slane %v1478_v60, 7  ;;  %v1487_v18 = vrot.slane %v1479_v61, 6  ;;  %v1639_v60 = vld [vmem:[%s4855_s8 + $0x34] sm:$0x1]  ;;  %v1640_v61 = vld [vmem:[%s4855_s8 + $0x3c] sm:$0x1] }
 0x17f   : > { %v1217_v17 = vpack.c.b16 %v1216_v9, %v1216_v9  ;;  %v1489_v19 = vrot.slane %v1480_v4, 5  ;;  %v1491_v20 = vrot.slane %v1481_v5, 4  ;;  %v1493_v22 = vrot.slane %v1482_v6, 3 }
 0x180   : > { %v1486_v21 = vsel %vm560_vm2, %v1485_v12, %v1477_v59  ;;  %v1495_v2 = vrot.slane %v1483_v10, 2  ;;  %v1497_v23 = vrot.slane %v1484_v11, 1  ;;  %v1371_v25 = vpack.c.bf16 %v1363_v62, %v1363_v62 }
 0x181   : > { %3688 = vmatmul.mubr.msk.bf16.vlgmr.msra.gmra.mrb[12].mxu1 %vm587_vm10, %v1217_v17  ;;  %v1488_v24 = vsel %vm563_vm4, %v1487_v18, %v1486_v21  ;;  %v1372_v26 = vpack.c.bf16 %v1364_v63, %v1364_v63  ;;  %v1373_v27 = vpack.c.bf16 %v1365_v0, %v1365_v0  ;;  %v1374_v29 = vpack.c.bf16 %v1366_v7, %v1366_v7  ;;  %v1543_v21 = vld [vmem:[%s4855_s8 + $0x3] sm:$0x1] }
 0x182   : > { %v1490_v28 = vsel %vm566_vm5, %v1489_v19, %v1488_v24  ;;  %3698 = vmatpush3.bf16.msra.mxu1 %v5026_v14  ;;  %3699 = vmatprep.mubr.msk.bf16.mxu1 %vm4432_vm3, %v4431_v3  ;;  %v1375_v30 = vpack.c.bf16 %v1367_v8, %v1367_v8  ;;  %v1376_v32 = vpack.c.bf16 %v1368_v13, %v1368_v13  ;;  %v1387_v36 = vunpack.c.l.b16 %v1371_v25 }
 0x183   : > { %v1492_v31 = vsel %vm569_vm6, %v1491_v20, %v1490_v28  ;;  %v1377_v33 = vpack.c.bf16 %v1369_v15, %v1369_v15  ;;  %v1378_v34 = vpack.c.bf16 %v1370_v16, %v1370_v16  ;;  %3709 = vmatprep.subr.bf16.mxu1 %v4431_v3  ;;  %v1388_v37 = vunpack.c.l.b16 %v1372_v26  ;;  %v1547_v28 = vld [vmem:[%s4855_s8 + $0x23] sm:$0x1] }
 0x184   : > { %v1494_v35 = vsel %vm572_vm7, %v1493_v22, %v1492_v31  ;;  %v1389_v38 = vunpack.c.l.b16 %v1373_v27  ;;  %v1390_v43 = vunpack.c.l.b16 %v1374_v29  ;;  %v1391_v44 = vunpack.c.l.b16 %v1375_v30  ;;  %v1544_v22 = vld [vmem:[%s4855_s8 + $0xb] sm:$0x1]  ;;  %v1546_v27 = vld [vmem:[%s4855_s8 + $0x1b] sm:$0x1] }
 0x185   : > { %v1496_v42 = vsel %vm575_vm8, %v1495_v2, %v1494_v35  ;;  %v1392_v45 = vunpack.c.l.b16 %v1376_v32  ;;  %v1393_v49 = vunpack.c.l.b16 %v1377_v33  ;;  %v1394_v50 = vunpack.c.l.b16 %v1378_v34  ;;  %v1545_v2 = vld [vmem:[%s4855_s8 + $0x13] sm:$0x1]  ;;  %v1548_v33 = vld [vmem:[%s4855_s8 + $0x2b] sm:$0x1] }
 0x186   : > { %v1498_v48 = vsel %vm578_vm9, %v1497_v23, %v1496_v42  ;;  %v1395_v51 = vrot.slane %v1388_v37, 7  ;;  %v1397_v54 = vrot.slane %v1389_v38, 6  ;;  %v1399_v55 = vrot.slane %v1390_v43, 5  ;;  %v1549_v37 = vld [vmem:[%s4855_s8 + $0x33] sm:$0x1] }
 0x187   : > { %v1499_v53 = vpack.c.b16 %v1498_v48, %v1498_v48  ;;  %v1401_v56 = vrot.slane %v1391_v44, 4  ;;  %v1403_v58 = vrot.slane %v1392_v45, 3  ;;  %v1405_v59 = vrot.slane %v1393_v49, 2  ;;  %v1550_v38 = vld [vmem:[%s4855_s8 + $0x3b] sm:$0x1] }
 0x188   : > { %v1396_v57 = vsel %vm560_vm2, %v1395_v51, %v1387_v36  ;;  %v1641_v63 = vpack.c.bf16 %v1633_v39, %v1633_v39  ;;  %v1642_v0 = vpack.c.bf16 %v1634_v40, %v1634_v40  ;;  %v1643_v1 = vpack.c.bf16 %v1635_v41, %v1635_v41 }
 0x189   : > { %3706 = vmatmul.mubr.msk.bf16.vlgmr.msra.gmra.mrb[20].mxu0 %vm587_vm10, %v1499_v53  ;;  %v1398_v62 = vsel %vm563_vm4, %v1397_v54, %v1396_v57  ;;  %v1407_v5 = vrot.slane %v1394_v50, 1  ;;  %v1644_v6 = vpack.c.bf16 %v1636_v46, %v1636_v46  ;;  %v1645_v7 = vpack.c.bf16 %v1637_v47, %v1637_v47 }
 0x18a   : > { %3716 = vmatpush3.bf16.msra.mxu0 %v5026_v14  ;;  %v1400_v4 = vsel %vm566_vm5, %v1399_v55, %v1398_v62  ;;  %3717 = vmatprep.mubr.msk.bf16.mxu0 %vm4432_vm3, %v4431_v3  ;;  %v1646_v9 = vpack.c.bf16 %v1638_v52, %v1638_v52  ;;  %v1647_v10 = vpack.c.bf16 %v1639_v60, %v1639_v60  ;;  %v1657_v13 = vunpack.c.l.b16 %v1641_v63  ;;  %v1813_v55 = vld [vmem:[%s4855_s8 + $0x6] sm:$0x1]  ;;  %v1814_v60 = vld [vmem:[%s4855_s8 + $0xe] sm:$0x1]  ;;  %v1816_v62 = vld [vmem:[%s4855_s8 + $0x1e] sm:$0x1] }
 0x18b   : > { %v1402_v8 = vsel %vm569_vm6, %v1401_v56, %v1400_v4  ;;  %v1648_v11 = vpack.c.bf16 %v1640_v61, %v1640_v61  ;;  %3727 = vmatprep.subr.bf16.mxu0 %v4431_v3  ;;  %v1658_v15 = vunpack.c.l.b16 %v1642_v0  ;;  %v1659_v16 = vunpack.c.l.b16 %v1643_v1  ;;  %v1815_v61 = vld [vmem:[%s4855_s8 + $0x16] sm:$0x1] }
 0x18c   : > { %v1404_v12 = vsel %vm572_vm7, %v1403_v58, %v1402_v8  ;;  %v1660_v18 = vunpack.c.l.b16 %v1644_v6  ;;  %v1661_v19 = vunpack.c.l.b16 %v1645_v7  ;;  %v1662_v20 = vunpack.c.l.b16 %v1646_v9  ;;  %v1818_v6 = vld [vmem:[%s4855_s8 + $0x2e] sm:$0x1] }
 0x18d   : > { %v1406_v17 = vsel %vm575_vm8, %v1405_v59, %v1404_v12  ;;  %v1663_v24 = vunpack.c.l.b16 %v1647_v10  ;;  %v1664_v25 = vunpack.c.l.b16 %v1648_v11  ;;  %v1665_v26 = vrot.slane %v1658_v15, 7  ;;  %v5151_v11 = vld [vmem:[#allocation13 + $0x4] ss:$8 sps:$4 sm:$0xff]  }
 0x18e   : > { %v1408_v23 = vsel %vm578_vm9, %v1407_v5, %v1406_v17  ;;  %v1667_v30 = vrot.slane %v1659_v16, 6  ;;  %v1669_v31 = vrot.slane %v1660_v18, 5  ;;  %v1671_v32 = vrot.slane %v1661_v19, 4  ;;  %v1817_v5 = vld [vmem:[%s4855_s8 + $0x26] sm:$0x1] }
 0x18f   : > { %v1409_v29 = vpack.c.b16 %v1408_v23, %v1408_v23  ;;  %v1666_v34 = vsel %vm560_vm2, %v1665_v26, %v1657_v13  ;;  %v1673_v35 = vrot.slane %v1662_v20, 3  ;;  %v1675_v36 = vrot.slane %v1663_v24, 2  ;;  %v1819_v16 = vld [vmem:[%s4855_s8 + $0x36] sm:$0x1]  ;;  %v1820_v17 = vld [vmem:[%s4855_s8 + $0x3e] sm:$0x1] }
 0x190   : > { %v1668_v39 = vsel %vm563_vm4, %v1667_v30, %v1666_v34  ;;  %v1551_v40 = vpack.c.bf16 %v1543_v21, %v1543_v21  ;;  %v1552_v41 = vpack.c.bf16 %v1544_v22, %v1544_v22  ;;  %v1553_v42 = vpack.c.bf16 %v1545_v2, %v1545_v2 }
 0x191   : > { %3700 = vmatmul.mubr.msk.bf16.vlgmr.msra.gmra.mrb[16].mxu1 %vm587_vm10, %v1409_v29  ;;  %v1670_v43 = vsel %vm566_vm5, %v1669_v31, %v1668_v39  ;;  %v1677_v44 = vrot.slane %v1664_v25, 1  ;;  %v1554_v45 = vpack.c.bf16 %v1546_v27, %v1546_v27  ;;  %v1555_v46 = vpack.c.bf16 %v1547_v28, %v1547_v28  ;;  %v1725_v39 = vld [vmem:[%s4855_s8 + $0x15] sm:$0x1] }
 0x192   : > { %3710 = vmatpush3.bf16.msra.mxu1 %v5026_v14  ;;  %3711 = vmatprep.mubr.msk.bf16.mxu1 %vm4432_vm3, %v4431_v3  ;;  %v1672_v47 = vsel %vm569_vm6, %v1671_v32, %v1670_v43  ;;  %v1556_v48 = vpack.c.bf16 %v1548_v33, %v1548_v33  ;;  %v1557_v49 = vpack.c.bf16 %v1549_v37, %v1549_v37  ;;  %v1567_v52 = vunpack.c.l.b16 %v1551_v40  ;;  %v1723_v37 = vld [vmem:[%s4855_s8 + $0x5] sm:$0x1] }
 0x193   : > { %v1558_v50 = vpack.c.bf16 %v1550_v38, %v1550_v38  ;;  %3721 = vmatprep.subr.bf16.mxu1 %v4431_v3  ;;  %v1674_v51 = vsel %vm572_vm7, %v1673_v35, %v1672_v47  ;;  %v1568_v53 = vunpack.c.l.b16 %v1552_v41  ;;  %v1569_v54 = vunpack.c.l.b16 %v1553_v42  ;;  %v1724_v38 = vld [vmem:[%s4855_s8 + $0xd] sm:$0x1] }
 0x194   : > { %v1676_v56 = vsel %vm575_vm8, %v1675_v36, %v1674_v51  ;;  %v1570_v57 = vunpack.c.l.b16 %v1554_v45  ;;  %v1571_v58 = vunpack.c.l.b16 %v1555_v46  ;;  %v1572_v59 = vunpack.c.l.b16 %v1556_v48  ;;  %v1727_v45 = vld [vmem:[%s4855_s8 + $0x25] sm:$0x1] }
 0x195   : > { %v1678_v63 = vsel %vm578_vm9, %v1677_v44, %v1676_v56  ;;  %v1573_v0 = vunpack.c.l.b16 %v1557_v49  ;;  %v1574_v1 = vunpack.c.l.b16 %v1558_v50  ;;  %v1575_v4 = vrot.slane %v1568_v53, 7  ;;  %v1726_v44 = vld [vmem:[%s4855_s8 + $0x1d] sm:$0x1]  ;;  %v1728_v50 = vld [vmem:[%s4855_s8 + $0x2d] sm:$0x1] }
 0x196   : > { %v1679_v7 = vpack.c.b16 %v1678_v63, %v1678_v63  ;;  %v1577_v8 = vrot.slane %v1569_v54, 6  ;;  %v1579_v9 = vrot.slane %v1570_v57, 5  ;;  %v1581_v10 = vrot.slane %v1571_v58, 4  ;;  %v1729_v54 = vld [vmem:[%s4855_s8 + $0x35] sm:$0x1] }
 0x197   : > { %v1576_v12 = vsel %vm560_vm2, %v1575_v4, %v1567_v52  ;;  %v1583_v13 = vrot.slane %v1572_v59, 3  ;;  %v1585_v15 = vrot.slane %v1573_v0, 2  ;;  %v1821_v19 = vpack.c.bf16 %v1813_v55, %v1813_v55  ;;  %v1730_v55 = vld [vmem:[%s4855_s8 + $0x3d] sm:$0x1] }
 0x198   : > { %3718 = vmatmul.mubr.msk.bf16.vlgmr.msra.gmra.mrb[24].mxu0 %vm587_vm10, %v1679_v7  ;;  %v1578_v18 = vsel %vm563_vm4, %v1577_v8, %v1576_v12  ;;  %v1822_v20 = vpack.c.bf16 %v1814_v60, %v1814_v60  ;;  %v1823_v21 = vpack.c.bf16 %v1815_v61, %v1815_v61  ;;  %v1587_v2 = vrot.slane %v1574_v1, 1  ;;  %v5185_v7 = vld [vmem:[#allocation13] ss:$8 sps:$4 sm:$0xff]  }
 0x199   : > { %3728 = vmatpush3.bf16.msra.mxu0 %v5026_v14  ;;  %v1580_v22 = vsel %vm566_vm5, %v1579_v9, %v1578_v18  ;;  %3729 = vmatprep.mubr.msk.bf16.mxu0 %vm4432_vm3, %v4431_v3  ;;  %v1824_v23 = vpack.c.bf16 %v1816_v62, %v1816_v62  ;;  %v1825_v24 = vpack.c.bf16 %v1817_v5, %v1817_v5  ;;  %v1837_v30 = vunpack.c.l.b16 %v1821_v19  ;;  %v1903_v18 = vld [vmem:[%s4855_s8 + $0x7] sm:$0x1]  ;;  %v1904_v19 = vld [vmem:[%s4855_s8 + $0xf] sm:$0x1] }
 0x19a   : > { %v1582_v25 = vsel %vm569_vm6, %v1581_v10, %v1580_v22  ;;  %v1826_v26 = vpack.c.bf16 %v1818_v6, %v1818_v6  ;;  %v1827_v27 = vpack.c.bf16 %v1819_v16, %v1819_v16  ;;  %v1828_v28 = vpack.c.bf16 %v1820_v17, %v1820_v17  ;;  %2048 = vmatprep.subr.bf16.mxu0 %v5151_v11  ;;  %v5188_v17 = vld [vmem:[#allocation13 + $0x14] ss:$8 sps:$4 sm:$0xff]  }
 0x19b   : > { %v1584_v29 = vsel %vm572_vm7, %v1583_v13, %v1582_v25  ;;  %v1838_v31 = vunpack.c.l.b16 %v1822_v20  ;;  %v1839_v32 = vunpack.c.l.b16 %v1823_v21  ;;  %v1840_v34 = vunpack.c.l.b16 %v1824_v23  ;;  %v1905_v20 = vld [vmem:[%s4855_s8 + $0x17] sm:$0x1]  ;;  %v1907_v25 = vld [vmem:[%s4855_s8 + $0x27] sm:$0x1] }
 0x19c   : > { %v1586_v33 = vsel %vm575_vm8, %v1585_v15, %v1584_v29  ;;  %v1841_v35 = vunpack.c.l.b16 %v1825_v24  ;;  %v1842_v36 = vunpack.c.l.b16 %v1826_v26  ;;  %v1843_v41 = vunpack.c.l.b16 %v1827_v27  ;;  %v1906_v24 = vld [vmem:[%s4855_s8 + $0x1f] sm:$0x1] }
 0x19d   : > { %v1588_v40 = vsel %vm578_vm9, %v1587_v2, %v1586_v33  ;;  %v1844_v42 = vunpack.c.l.b16 %v1828_v28  ;;  %v1845_v43 = vrot.slane %v1838_v31, 7  ;;  %v1847_v47 = vrot.slane %v1839_v32, 6  ;;  %v1909_v33 = vld [vmem:[%s4855_s8 + $0x37] sm:$0x1] }
 0x19e   : > { %v1589_v46 = vpack.c.b16 %v1588_v40, %v1588_v40  ;;  %v1849_v48 = vrot.slane %v1840_v34, 5  ;;  %v1851_v49 = vrot.slane %v1841_v35, 4  ;;  %v1853_v52 = vrot.slane %v1842_v36, 3  ;;  %v1910_v36 = vld [vmem:[%s4855_s8 + $0x3f] sm:$0x1] }
 0x19f   : > { %v1846_v51 = vsel %vm560_vm2, %v1845_v43, %v1837_v30  ;;  %v1855_v53 = vrot.slane %v1843_v41, 2  ;;  %v1731_v57 = vpack.c.bf16 %v1723_v37, %v1723_v37  ;;  %v1732_v58 = vpack.c.bf16 %v1724_v38, %v1724_v38  ;;  %v1908_v30 = vld [vmem:[%s4855_s8 + $0x2f] sm:$0x1]  ;;  %v5204_v41 = vld [vmem:[#allocation13 + $0x10] ss:$8 sps:$4 sm:$0xff]  }
 0x1a0   : > { %3712 = vmatmul.mubr.msk.bf16.vlgmr.msra.gmra.mrb[20].mxu1 %vm587_vm10, %v1589_v46  ;;  %v1848_v56 = vsel %vm563_vm4, %v1847_v47, %v1846_v51  ;;  %v1733_v59 = vpack.c.bf16 %v1725_v39, %v1725_v39  ;;  %v1857_v61 = vrot.slane %v1844_v42, 1  ;;  %v1734_v62 = vpack.c.bf16 %v1726_v44, %v1726_v44 }
 0x1a1   : > { %v1850_v60 = vsel %vm566_vm5, %v1849_v48, %v1848_v56  ;;  %3722 = vmatpush3.bf16.msra.mxu1 %v5026_v14  ;;  %3723 = vmatprep.mubr.msk.bf16.mxu1 %vm4432_vm3, %v4431_v3  ;;  %v1735_v63 = vpack.c.bf16 %v1727_v45, %v1727_v45  ;;  %v1736_v1 = vpack.c.bf16 %v1728_v50, %v1728_v50  ;;  %v1747_v8 = vunpack.c.l.b16 %v1731_v57  ;;  %v5208_v45 = vld [vmem:[#allocation13 + $0x24] ss:$8 sps:$4 sm:$0xff]  }
 0x1a2   : > { %v1852_v0 = vsel %vm569_vm6, %v1851_v49, %v1850_v60  ;;  %v1737_v4 = vpack.c.bf16 %v1729_v54, %v1729_v54  ;;  %v1738_v5 = vpack.c.bf16 %v1730_v55, %v1730_v55  ;;  %3733 = vmatprep.subr.bf16.mxu1 %v4431_v3  ;;  %v1748_v9 = vunpack.c.l.b16 %v1732_v58 }
 0x1a3   : > { %v1854_v6 = vsel %vm572_vm7, %v1853_v52, %v1852_v0  ;;  %v1749_v10 = vunpack.c.l.b16 %v1733_v59  ;;  %v1750_v13 = vunpack.c.l.b16 %v1734_v62  ;;  %v1751_v15 = vunpack.c.l.b16 %v1735_v63  ;;  %v5215_v59 = vld [vmem:[#allocation13 + $0x20] ss:$8 sps:$4 sm:$0xff]  }
 0x1a4   : > { %v1856_v12 = vsel %vm575_vm8, %v1855_v53, %v1854_v6  ;;  %v1752_v16 = vunpack.c.l.b16 %v1736_v1  ;;  %v1753_v22 = vunpack.c.l.b16 %v1737_v4  ;;  %v1754_v2 = vunpack.c.l.b16 %v1738_v5  ;;  %v1993_v1 = vld [vmem:[#allocation2] sm:$0xff] }
 0x1a5   : > { %v1858_v21 = vsel %vm578_vm9, %v1857_v61, %v1856_v12  ;;  %v1755_v23 = vrot.slane %v1748_v9, 7  ;;  %v1757_v27 = vrot.slane %v1749_v10, 6  ;;  %v1759_v28 = vrot.slane %v1750_v13, 5  ;;  %v1999_v0 = vpop.permute.xlu0 %1998 }
 0x1a6   : > { %v1859_v26 = vpack.c.b16 %v1858_v21, %v1858_v21  ;;  %v1761_v29 = vrot.slane %v1751_v15, 4  ;;  %v1763_v32 = vrot.slane %v1752_v16, 3  ;;  %vm2001_vm11 = vcmask 261120  }
 0x1a7   : > { %v1756_v31 = vsel %vm560_vm2, %v1755_v23, %v1747_v8  ;;  %v1765_v35 = vrot.slane %v1753_v22, 2  ;;  %v1911_v37 = vpack.c.bf16 %v1903_v18, %v1903_v18  ;;  %v1912_v38 = vpack.c.bf16 %v1904_v19, %v1904_v19  ;;  %v5218_v8 = vld [vmem:[#allocation13 + $0x34] ss:$8 sps:$4 sm:$0xff]   ;;  %v5226_v18 = vld [vmem:[#allocation13 + $0x30] ss:$8 sps:$4 sm:$0xff]  }
 0x1a8   : > { %3730 = vmatmul.mubr.msk.bf16.vlgmr.msra.gmra.mrb[28].mxu0 %vm587_vm10, %v1859_v26  ;;  %v1758_v34 = vsel %vm563_vm4, %v1757_v27, %v1756_v31  ;;  %v1767_v40 = vrot.slane %v1754_v2, 1  ;;  %v1913_v42 = vpack.c.bf16 %v1905_v20, %v1905_v20  ;;  %v1914_v43 = vpack.c.bf16 %v1906_v24, %v1906_v24 }
 0x1a9   : > { %2049 = vmatpush1.bf16.msra.mxu0 %v5185_v7  ;;  %v1760_v39 = vsel %vm566_vm5, %v1759_v28, %v1758_v34  ;;  %v1915_v46 = vpack.c.bf16 %v1907_v25, %v1907_v25  ;;  %v1916_v47 = vpack.c.bf16 %v1908_v30, %v1908_v30  ;;  %v1917_v48 = vpack.c.bf16 %v1909_v33, %v1909_v33  ;;  %v5261_v28 = vld [vmem:[#allocation15] ss:$0 sm:$0xff] }
 0x1aa   : > { %v1762_v44 = vsel %vm569_vm6, %v1761_v29, %v1760_v39  ;;  %2050 = vmatprep.subr.bf16.mxu0 %v5188_v17  ;;  %v1918_v50 = vpack.c.bf16 %v1910_v36, %v1910_v36  ;;  %v1927_v51 = vunpack.c.l.b16 %v1911_v37  ;;  %v1928_v52 = vunpack.c.l.b16 %v1912_v38 }
 0x1ab   : > { %v1764_v49 = vsel %vm572_vm7, %v1763_v32, %v1762_v44  ;;  %v4433_v53 = vmov 0   ;;  %v1929_v55 = vunpack.c.l.b16 %v1913_v42  ;;  %v1930_v56 = vunpack.c.l.b16 %v1914_v43 }
 0x1ac   : > { %2080 = vmatprep.mubr.bf16.mxu0 %v4433_v53  ;;  %v1766_v54 = vsel %vm575_vm8, %v1765_v35, %v1764_v49  ;;  %v1931_v57 = vunpack.c.l.b16 %v1915_v46  ;;  %v1932_v60 = vunpack.c.l.b16 %v1916_v47  ;;  %v1933_v61 = vunpack.c.l.b16 %v1917_v48 }
 0x1ad   : > { %v1768_v58 = vsel %vm578_vm9, %v1767_v40, %v1766_v54  ;;  %2051 = vmatpush1.bf16.msra.mxu0 %v5204_v41  ;;  %v1934_v62 = vunpack.c.l.b16 %v1918_v50  ;;  %v1935_v4 = vrot.slane %v1928_v52, 7  ;;  %v1937_v5 = vrot.slane %v1929_v55, 6 }
 0x1ae   : > { %v1769_v63 = vpack.c.b16 %v1768_v58, %v1768_v58  ;;  %2052 = vmatprep.subr.bf16.mxu0 %v5208_v45  ;;  %v1939_v6 = vrot.slane %v1930_v56, 5  ;;  %v1941_v9 = vrot.slane %v1931_v57, 4  ;;  %v1943_v12 = vrot.slane %v1932_v60, 3 }
 0x1af   : > { %v1936_v10 = vsel %vm560_vm2, %v1935_v4, %v1927_v51  ;;  %v2002_v13 = vsel %vm2001_vm11, %v1993_v1, %v1999_v0  ;;  %v1945_v16 = vrot.slane %v1933_v61, 2  ;;  %v1947_v20 = vrot.slane %v1934_v62, 1 }
 0x1b0   : > { %3724 = vmatmul.mubr.msk.bf16.vlgmr.msra.gmra.mrb[24].mxu1 %vm587_vm10, %v1769_v63  ;;  %v1938_v15 = vsel %vm563_vm4, %v1937_v5, %v1936_v10  ;;  %vm2044_vm12 = vcmask 523264   ;;  %vm2909_vm13 = vcmask 785408   ;;  %vm3271_vm14 = vcmask 31744  }
 0x1b1   : > { %3734 = vmatpush3.bf16.msra.mxu1 %v5026_v14  ;;  %2053 = vmatpush1.bf16.msra.mxu0 %v5215_v59  ;;  %v1940_v19 = vsel %vm566_vm5, %v1939_v6, %v1938_v15  ;;  %v2003_v14 = vpack.c.bf16 %v2002_v13, %v2002_v13 }
 0x1b2   : > { %3735 = vmatprep.mubr.msk.bf16.mxu1 %vm4432_vm3, %v4431_v3  ;;  %2054 = vmatprep.subr.bf16.mxu0 %v5218_v8  ;;  %v1942_v21 = vsel %vm569_vm6, %v1941_v9, %v1940_v19 }
 0x1b3   : > { %2160 = vmatprep.subr.bf16.mxu1 %v5151_v11  ;;  %v1944_v22 = vsel %vm572_vm7, %v1943_v12, %v1942_v21 }
 0x1b4   : > { %v1946_v2 = vsel %vm575_vm8, %v1945_v16, %v1944_v22 }
 0x1b5   : > { %2055 = vmatpush1.bf16.msra.mxu0 %v5226_v18  ;;  %v1948_v23 = vsel %vm578_vm9, %v1947_v20, %v1946_v2 }
 0x1b6   : > { %2264 = vmatprep.subr.bf16.mxu0 %v5151_v11  ;;  %v1949_v3 = vpack.c.b16 %v1948_v23, %v1948_v23 }
 0x1b8   : > { %3503 = vmatmul.mubr.msk.bf16.vlgmr.msra.gmra.mrb[32].mxu0 %vm2044_vm12, %v2003_v14  ;;  %3736 = vmatmul.mubr.msk.bf16.vlgmr.msra.gmra.mrb[28].mxu1 %vm587_vm10, %v1949_v3 }
 0x1b9   : > { %2265 = vmatpush1.bf16.msra.mxu0 %v5185_v7  ;;  %2161 = vmatpush1.bf16.msra.mxu1 %v5185_v7 }
 0x1ba   : > { %2192 = vmatprep.mubr.bf16.mxu1 %v4433_v53  ;;  %2162 = vmatprep.subr.bf16.mxu1 %v5188_v17 }
 0x1bb   : > { %2266 = vmatprep.subr.bf16.mxu0 %v5188_v17  ;;  %2296 = vmatprep.mubr.bf16.mxu0 %v4433_v53 }
 0x1bd   : > { %2267 = vmatpush1.bf16.msra.mxu0 %v5204_v41  ;;  %2163 = vmatpush1.bf16.msra.mxu1 %v5204_v41 }
 0x1be   : > { %2268 = vmatprep.subr.bf16.mxu0 %v5208_v45  ;;  %2164 = vmatprep.subr.bf16.mxu1 %v5208_v45 }
 0x1c1   : > { %2269 = vmatpush1.bf16.msra.mxu0 %v5215_v59  ;;  %2165 = vmatpush1.bf16.msra.mxu1 %v5215_v59 }
 0x1c2   : > { %2270 = vmatprep.subr.bf16.mxu0 %v5218_v8  ;;  %2166 = vmatprep.subr.bf16.mxu1 %v5218_v8 }
 0x1c5   : > { %2271 = vmatpush1.bf16.msra.mxu0 %v5226_v18  ;;  %2167 = vmatpush1.bf16.msra.mxu1 %v5226_v18 }
 0x1c6   : > { %2472 = vmatprep.subr.bf16.mxu0 %v5151_v11  ;;  %2368 = vmatprep.subr.bf16.mxu1 %v5151_v11 }
 0x216   : > { %v5259_v24 = vpop.f32.mrb[0].mxu0 }
 0x217   : > { %v3647_v25 = vpop.f32.mrb[1].mxu0 }
 0x218   : > { %v628_v26 = vpop.f32.mrb[2].mxu0 }
 0x219   : > { %v3648_v27 = vpop.f32.mrb[3].mxu0 }
 0x21e   : > { %v805_v29 = vpop.f32.mrb[4].mxu0 }
 0x21f   : > { %v5264_v30 = vadd.f32 %v5261_v28, %v805_v29  ;;  %v3659_v31 = vpop.f32.mrb[5].mxu0 }
 0x220   : > { %v808_v32 = vpop.f32.mrb[6].mxu0 }
 0x221   : > { %v3660_v33 = vpop.f32.mrb[7].mxu0 }
 0x226   : > { %v715_v34 = vpop.f32.mrb[0].mxu1 }
 0x227   : > { %v5267_v35 = vadd.f32 %v5261_v28, %v715_v34  ;;  %v3653_v36 = vpop.f32.mrb[1].mxu1 }
 0x228   : > { %v718_v37 = vpop.f32.mrb[2].mxu1 }
 0x229   : > { %v3654_v38 = vpop.f32.mrb[3].mxu1 }
 0x22d   : > { %v985_v39 = vpop.f32.mrb[8].mxu0 }
 0x22e   : > { %v5270_v40 = vadd.f32 %v5261_v28, %v985_v39  ;;  %v3671_v42 = vpop.f32.mrb[9].mxu0 }
 0x22f   : > { %v988_v43 = vpop.f32.mrb[10].mxu0 }
 0x230   : > { %v3672_v44 = vpop.f32.mrb[11].mxu0  ;;  %v626_v43 = vadd.f32 %v5261_v28, %v5259_v24  ;;  %v1996_v24 = vld [vmem:[#allocation5] sm:$0xff] }
 0x235   : > { %v895_v46 = vpop.f32.mrb[4].mxu1 }
 0x236   : > { %v5273_v47 = vadd.f32 %v5261_v28, %v895_v46  ;;  %v3665_v48 = vpop.f32.mrb[5].mxu1  ;;  %v5300_v46 = vld [vmem:[#allocation15 + $0x1] ss:$0 sm:$0xff] }
 0x237   : > { %v898_v49 = vpop.f32.mrb[6].mxu1 }
 0x238   : > { %v3666_v50 = vpop.f32.mrb[7].mxu1 }
 0x23d   : > { %v1165_v51 = vpop.f32.mrb[12].mxu0 }
 0x23e   : > { %v5276_v52 = vadd.f32 %v5261_v28, %v1165_v51  ;;  %v3683_v54 = vpop.f32.mrb[13].mxu0 }
 0x23f   : > { %v1168_v55 = vpop.f32.mrb[14].mxu0 }
 0x240   : > { %v3684_v56 = vpop.f32.mrb[15].mxu0 }
 0x245   : > { %v1075_v57 = vpop.f32.mrb[8].mxu1 }
 0x246   : > { %v5279_v58 = vadd.f32 %v5261_v28, %v1075_v57  ;;  %v3677_v60 = vpop.f32.mrb[9].mxu1 }
 0x247   : > { %v1078_v61 = vpop.f32.mrb[10].mxu1 }
 0x248   : > { %v3678_v62 = vpop.f32.mrb[11].mxu1 }
 0x24c   : > { %v5281_v63 = vpop.f32.mrb[16].mxu0 }
 0x24d   : > { %v3695_v0 = vpop.f32.mrb[17].mxu0 }
 0x24e   : > { %v1360_v1 = vpop.f32.mrb[18].mxu0  ;;  %v1994_v0 = vld [vmem:[#allocation3] sm:$0xff] }
 0x24f   : > { %v3696_v4 = vpop.f32.mrb[19].mxu0 }
 0x254   : > { %v1255_v5 = vpop.f32.mrb[12].mxu1 }
 0x255   : > { %v5284_v6 = vadd.f32 %v5261_v28, %v1255_v5  ;;  %v3689_v9 = vpop.f32.mrb[13].mxu1 }
 0x256   : > { %v1258_v10 = vpop.f32.mrb[14].mxu1 }
 0x257   : > { %v3690_v12 = vpop.f32.mrb[15].mxu1 }
 0x25c   : > { %v5286_v13 = vpop.f32.mrb[20].mxu0 }
 0x25d   : > { %v3707_v15 = vpop.f32.mrb[21].mxu0 }
 0x25e   : > { %v1540_v16 = vpop.f32.mrb[22].mxu0 }
 0x25f   : > { %v3708_v19 = vpop.f32.mrb[23].mxu0 }
 0x264   : > { %v5288_v20 = vpop.f32.mrb[16].mxu1 }
 0x265   : > { %v3701_v21 = vpop.f32.mrb[17].mxu1 }
 0x266   : > { %v1450_v14 = vpop.f32.mrb[18].mxu1 }
 0x267   : > { %v3702_v22 = vpop.f32.mrb[19].mxu1 }
 0x26b   : > { %v5290_v2 = vpop.f32.mrb[24].mxu0 }
 0x26c   : > { %v3719_v23 = vpop.f32.mrb[25].mxu0 }
 0x26d   : > { %v1720_v3 = vpop.f32.mrb[26].mxu0 }
 0x26e   : > { %v3720_v25 = vpop.f32.mrb[27].mxu0 }
 0x273   : > { %v5292_v26 = vpop.f32.mrb[20].mxu1 }
 0x274   : > { %v3713_v27 = vpop.f32.mrb[21].mxu1 }
 0x275   : > { %v1630_v29 = vpop.f32.mrb[22].mxu1 }
 0x276   : > { %v3714_v31 = vpop.f32.mrb[23].mxu1 }
 0x27b   : > { %v5294_v32 = vpop.f32.mrb[28].mxu0 }
 0x27c   : > { %v3731_v33 = vpop.f32.mrb[29].mxu0 }
 0x27d   : > { %v1900_v34 = vpop.f32.mrb[30].mxu0 }
 0x27e   : > { %v3732_v36 = vpop.f32.mrb[31].mxu0 }
 0x283   : > { %v5296_v37 = vpop.f32.mrb[24].mxu1 }
 0x284   : > { %v3725_v38 = vpop.f32.mrb[25].mxu1 }
 0x285   : > { %v1810_v39 = vpop.f32.mrb[26].mxu1 }
 0x286   : > { %v3726_v42 = vpop.f32.mrb[27].mxu1 }
 0x28b   : > { %v2082_v44 = vpop.f32.mrb[32].mxu0  ;;  %v1987_v48 = vpop.f32.mrb[28].mxu1 }
 0x28c   : > { %v2089_v49 = vadd.f32 %v2082_v44, %v626_v43  ;;  %v2084_v50 = vpop.f32.mrb[33].mxu0  ;;  %v1988_v51 = vadd.f32 %v5300_v46, %v1987_v48  ;;  %v3737_v54 = vpop.f32.mrb[29].mxu1 }
 0x28d   : > { %v2086_v55 = vpop.f32.mrb[34].mxu0  ;;  %v1990_v56 = vpop.f32.mrb[30].mxu1  ;;  %v1898_v54 = vadd.f32 %v5300_v46, %v5294_v32 }
 0x28e   : > { %3940 = vtanh.f32 %v2089_v49  ;;  %v2087_v57 = vpop.f32.mrb[35].mxu0  ;;  %v3738_v60 = vpop.f32.mrb[31].mxu1  ;;  %v2118_v61 = vadd.f32 %v2084_v50, %v1988_v51  ;;  %v3504_v1 = vmul.f32 -1.442695, %v2089_v49 }
 0x290   : > { %3942 = vtanh.f32 %v2118_v61  ;;  %v3505_v4 = vmul.f32 -1.442695, %v2118_v61 }
 0x291   : > { %3944 = vpow2.f32 %v3504_v1 }
 0x292   : > { %3946 = vpow2.f32 %v3505_v4 }
 0x298   : > { %v3941_v62 = vpop.eup %3940 }
 0x299   : > { %2103 = vrot.lane.b32.xlu0 %v3941_v62, %s4434_s13 }
 0x29a   : > { %v3943_v28 = vpop.eup %3942 }
 0x29b   : > { %2132 = vrot.lane.b32.xlu1 %v3943_v28, %s4434_s13  ;;  %v3945_v5 = vpop.eup %3944 }
 0x29c   : > { %v3947_v9 = vpop.eup %3946  ;;  %v2093_v10 = vadd.f32 1.0, %v3945_v5 }
 0x29d   : > { %2127 = vrot.lane.b32.xlu0 %v1996_v24, %s4430_s12  ;;  %v2122_v12 = vadd.f32 1.0, %v3947_v9 }
 0x29e   : > { %3948 = vrcp.f32 %v2093_v10 }
 0x29f   : > { %2098 = vrot.lane.b32.xlu1 %v1994_v0, %s4430_s12  ;;  %3950 = vrcp.f32 %v2122_v12 }
 0x2a8   : > { %v3949_v15 = vpop.eup %3948 }
 0x2a9   : > { %v3951_v21 = vpop.eup %3950 }
 0x30b   : > { %v2104_v16 = vpop.permute.xlu0 %2103 }
 0x30c   : > { %v2106_v19 = vmul.f32 %v3949_v15, %v2104_v16 }
 0x30d   : > { %v2133_v14 = vpop.permute.xlu1 %2132 }
 0x30e   : > { %2108 = vrot.lane.b32.xlu1 %v2106_v19, %s4430_s12  ;;  %v2135_v22 = vmul.f32 %v3951_v21, %v2133_v14 }
 0x30f   : > { %v2128_v3 = vpop.permute.xlu0 %2127 }
 0x310   : > { %2137 = vrot.lane.b32.xlu0 %v2135_v22, %s4430_s12  ;;  %v2130_v31 = vmul.f32 %v3951_v21, %v2128_v3 }
 0x311   : > { %v2099_v23 = vpop.permute.xlu1 %2098 }
 0x312   : > { %v2101_v25 = vmul.f32 %v3949_v15, %v2099_v23 }
 0x380   : > { %v2109_v27 = vpop.permute.xlu1 %2108 }
 0x381   : > { %v2111_v29 = vadd.f32 %v2109_v27, %v2101_v25 }
 0x382   : > { %v2138_v33 = vpop.permute.xlu0 %2137 }
 0x383   : > { %3952 = vtanh.f32 %v2111_v29  ;;  %v2140_v34 = vadd.f32 %v2138_v33, %v2130_v31 }
 0x385   : > { %3954 = vtanh.f32 %v2140_v34 }
 0x38d   : > { %v3953_v36 = vpop.eup %3952 }
 0x38e   : > { %2114 = vrot.lane.b32.xlu1 %v3953_v36, %s4434_s13 }
 0x38f   : > { %v3955_v38 = vpop.eup %3954 }
 0x390   : > { %2143 = vrot.lane.b32.xlu0 %v3955_v38, %s4434_s13 }
 0x400   : > { %v2115_v39 = vpop.permute.xlu1 %2114 }
 0x401   : > { %v2117_v42 = vmul.f32 %v3949_v15, %v2115_v39 }
 0x402   : > { %v2144_v43 = vpop.permute.xlu0 %2143 }
 0x403   : > { %2148 = vrot.lane.b32.xlu1 %v2117_v42, %s4430_s12  ;;  %v5312_v44 = vmul.f32 %v3951_v21, %v2144_v43 }
 0x405   : > { %2152 = vrot.lane.b32.xlu0 %v5312_v44, %s4434_s13 }
 0x475   : > { %v5316_v48 = vpop.permute.xlu1 %2148 }
 0x477   : > { %v2153_v49 = vpop.permute.xlu0 %2152 }
 0x478   : > { %v2155_v50 = vsel %vm2001_vm11, %v5316_v48, %v2153_v49  ;;  %v1808_v49 = vadd.f32 %v5300_v46, %v5296_v37 }
 0x479   : > { %v2156_v51 = vpack.c.bf16 %v2155_v50, %v2155_v50 }
 0x47b   : > { %3506 = vmatmul.mubr.msk.bf16.vlgmr.msra.gmra.mrb[32].mxu1 %vm2044_vm12, %v2156_v51 }
 0x47c   : > { %2369 = vmatpush1.bf16.msra.mxu1 %v5185_v7  ;;  %2400 = vmatprep.mubr.bf16.mxu1 %v4433_v53 }
 0x47d   : > { %2370 = vmatprep.subr.bf16.mxu1 %v5188_v17 }
 0x480   : > { %2371 = vmatpush1.bf16.msra.mxu1 %v5204_v41 }
 0x481   : > { %2372 = vmatprep.subr.bf16.mxu1 %v5208_v45 }
 0x484   : > { %2373 = vmatpush1.bf16.msra.mxu1 %v5215_v59 }
 0x485   : > { %2374 = vmatprep.subr.bf16.mxu1 %v5218_v8 }
 0x488   : > { %2375 = vmatpush1.bf16.msra.mxu1 %v5226_v18 }
 0x489   : > { %2576 = vmatprep.subr.bf16.mxu1 %v5151_v11 }
 0x54e   : > { %v2194_v55 = vpop.f32.mrb[32].mxu1 }
 0x54f   : > { %v2201_v56 = vadd.f32 %v2194_v55, %v5267_v35  ;;  %v2196_v57 = vpop.f32.mrb[33].mxu1 }
 0x550   : > { %v2226_v60 = vadd.f32 %v2196_v57, %v1898_v54  ;;  %v2198_v61 = vpop.f32.mrb[34].mxu1 }
 0x551   : > { %3956 = vtanh.f32 %v2201_v56  ;;  %v2199_v62 = vpop.f32.mrb[35].mxu1  ;;  %v3507_v0 = vmul.f32 -1.442695, %v2201_v56 }
 0x552   : > { %3958 = vtanh.f32 %v2226_v60  ;;  %v3508_v1 = vmul.f32 -1.442695, %v2226_v60 }
 0x553   : > { %3960 = vpow2.f32 %v3507_v0 }
 0x554   : > { %3962 = vpow2.f32 %v3508_v1 }
 0x55b   : > { %v3957_v24 = vpop.eup %3956 }
 0x55c   : > { %v3959_v28 = vpop.eup %3958  ;;  %2211 = vrot.lane.b32.xlu1 %v3957_v24, %s4434_s13 }
 0x55d   : > { %2236 = vrot.lane.b32.xlu0 %v3959_v28, %s4434_s13  ;;  %v3961_v32 = vpop.eup %3960 }
 0x55e   : > { %v3963_v4 = vpop.eup %3962  ;;  %v2205_v5 = vadd.f32 1.0, %v3961_v32 }
 0x55f   : > { %v2230_v35 = vadd.f32 1.0, %v3963_v4 }
 0x560   : > { %3964 = vrcp.f32 %v2205_v5 }
 0x561   : > { %3966 = vrcp.f32 %v2230_v35 }
 0x56a   : > { %v3965_v9 = vpop.eup %3964 }
 0x56b   : > { %v3967_v12 = vpop.eup %3966  ;;  %v2209_v21 = vmul.f32 %v3965_v9, %v2111_v29 }
 0x56c   : > { %v2234_v22 = vmul.f32 %v3967_v12, %v2140_v34 }
 0x5ce   : > { %v2212_v10 = vpop.permute.xlu1 %2211 }
 0x5cf   : > { %v2214_v15 = vmul.f32 %v3965_v9, %v2212_v10  ;;  %v2237_v16 = vpop.permute.xlu0 %2236 }
 0x5d0   : > { %v2239_v19 = vmul.f32 %v3967_v12, %v2237_v16 }
 0x5d1   : > { %2216 = vrot.lane.b32.xlu1 %v2214_v15, %s4430_s12 }
 0x5d2   : > { %2241 = vrot.lane.b32.xlu0 %v2239_v19, %s4430_s12 }
 0x643   : > { %v2217_v14 = vpop.permute.xlu1 %2216 }
 0x644   : > { %v2219_v23 = vadd.f32 %v2217_v14, %v2209_v21  ;;  %v2242_v3 = vpop.permute.xlu0 %2241 }
 0x645   : > { %v2244_v25 = vadd.f32 %v2242_v3, %v2234_v22 }
 0x646   : > { %3968 = vtanh.f32 %v2219_v23 }
 0x647   : > { %3970 = vtanh.f32 %v2244_v25 }
 0x650   : > { %v3969_v27 = vpop.eup %3968 }
 0x651   : > { %v3971_v31 = vpop.eup %3970  ;;  %2222 = vrot.lane.b32.xlu1 %v3969_v27, %s4434_s13 }
 0x652   : > { %2247 = vrot.lane.b32.xlu0 %v3971_v31, %s4434_s13 }
 0x6c3   : > { %v2223_v33 = vpop.permute.xlu1 %2222 }
 0x6c4   : > { %v5339_v36 = vmul.f32 %v3965_v9, %v2223_v33  ;;  %v2248_v38 = vpop.permute.xlu0 %2247 }
 0x6c5   : > { %v5341_v39 = vmul.f32 %v3967_v12, %v2248_v38 }
 0x6c6   : > { %2252 = vrot.lane.b32.xlu1 %v5339_v36, %s4430_s12 }
 0x6c7   : > { %2256 = vrot.lane.b32.xlu0 %v5341_v39, %s4434_s13 }
 0x738   : > { %v2253_v29 = vpop.permute.xlu1 %2252 }
 0x739   : > { %v2257_v34 = vpop.permute.xlu0 %2256 }
 0x73a   : > { %v2259_v42 = vsel %vm2001_vm11, %v2253_v29, %v2257_v34  ;;  %v1718_v34 = vadd.f32 %v5300_v46, %v5290_v2 }
 0x73b   : > { %v2260_v43 = vpack.c.bf16 %v2259_v42, %v2259_v42 }
 0x73d   : > { %3509 = vmatmul.mubr.msk.bf16.vlgmr.msra.gmra.mrb[36].mxu0 %vm2044_vm12, %v2260_v43 }
 0x73e   : > { %2473 = vmatpush1.bf16.msra.mxu0 %v5185_v7  ;;  %2504 = vmatprep.mubr.bf16.mxu0 %v4433_v53 }
 0x73f   : > { %2474 = vmatprep.subr.bf16.mxu0 %v5188_v17 }
 0x742   : > { %2475 = vmatpush1.bf16.msra.mxu0 %v5204_v41 }
 0x743   : > { %2476 = vmatprep.subr.bf16.mxu0 %v5208_v45 }
 0x746   : > { %2477 = vmatpush1.bf16.msra.mxu0 %v5215_v59 }
 0x747   : > { %2478 = vmatprep.subr.bf16.mxu0 %v5218_v8 }
 0x74a   : > { %2479 = vmatpush1.bf16.msra.mxu0 %v5226_v18 }
 0x74b   : > { %2680 = vmatprep.subr.bf16.mxu0 %v5151_v11 }
 0x810   : > { %v2298_v50 = vpop.f32.mrb[36].mxu0 }
 0x811   : > { %v2305_v51 = vadd.f32 %v2298_v50, %v5264_v30  ;;  %v2300_v54 = vpop.f32.mrb[37].mxu0 }
 0x812   : > { %v2330_v55 = vadd.f32 %v2300_v54, %v1808_v49  ;;  %v2302_v56 = vpop.f32.mrb[38].mxu0 }
 0x813   : > { %3972 = vtanh.f32 %v2305_v51  ;;  %v2303_v57 = vpop.f32.mrb[39].mxu0  ;;  %v3510_v62 = vmul.f32 -1.442695, %v2305_v51 }
 0x814   : > { %3974 = vtanh.f32 %v2330_v55  ;;  %v3511_v24 = vmul.f32 -1.442695, %v2330_v55 }
 0x815   : > { %3976 = vpow2.f32 %v3510_v62 }
 0x816   : > { %3978 = vpow2.f32 %v3511_v24 }
 0x81d   : > { %v3973_v60 = vpop.eup %3972 }
 0x81e   : > { %v3975_v61 = vpop.eup %3974  ;;  %2315 = vrot.lane.b32.xlu1 %v3973_v60, %s4434_s13 }
 0x81f   : > { %2340 = vrot.lane.b32.xlu0 %v3975_v61, %s4434_s13  ;;  %v3977_v37 = vpop.eup %3976 }
 0x820   : > { %v3979_v28 = vpop.eup %3978  ;;  %v2309_v0 = vadd.f32 1.0, %v3977_v37 }
 0x821   : > { %v2334_v30 = vadd.f32 1.0, %v3979_v28 }
 0x822   : > { %3980 = vrcp.f32 %v2309_v0 }
 0x823   : > { %3982 = vrcp.f32 %v2334_v30 }
 0x82c   : > { %v3981_v1 = vpop.eup %3980 }
 0x82d   : > { %v3983_v4 = vpop.eup %3982  ;;  %v2313_v10 = vmul.f32 %v3981_v1, %v2219_v23 }
 0x82e   : > { %v2338_v15 = vmul.f32 %v3983_v4, %v2244_v25 }
 0x890   : > { %v2316_v32 = vpop.permute.xlu1 %2315 }
 0x891   : > { %v2318_v5 = vmul.f32 %v3981_v1, %v2316_v32  ;;  %v2341_v35 = vpop.permute.xlu0 %2340 }
 0x892   : > { %v2343_v9 = vmul.f32 %v3983_v4, %v2341_v35 }
 0x893   : > { %2320 = vrot.lane.b32.xlu1 %v2318_v5, %s4430_s12 }
 0x894   : > { %2345 = vrot.lane.b32.xlu0 %v2343_v9, %s4430_s12 }
 0x905   : > { %v2321_v12 = vpop.permute.xlu1 %2320 }
 0x906   : > { %v2323_v16 = vadd.f32 %v2321_v12, %v2313_v10  ;;  %v2346_v19 = vpop.permute.xlu0 %2345 }
 0x907   : > { %v2348_v21 = vadd.f32 %v2346_v19, %v2338_v15 }
 0x908   : > { %3984 = vtanh.f32 %v2323_v16 }
 0x909   : > { %3986 = vtanh.f32 %v2348_v21 }
 0x912   : > { %v3985_v14 = vpop.eup %3984 }
 0x913   : > { %v3987_v22 = vpop.eup %3986  ;;  %2326 = vrot.lane.b32.xlu1 %v3985_v14, %s4434_s13 }
 0x914   : > { %2351 = vrot.lane.b32.xlu0 %v3987_v22, %s4434_s13 }
 0x985   : > { %v2327_v3 = vpop.permute.xlu1 %2326 }
 0x986   : > { %v5367_v27 = vmul.f32 %v3981_v1, %v2327_v3  ;;  %v2352_v31 = vpop.permute.xlu0 %2351 }
 0x987   : > { %v2354_v33 = vmul.f32 %v3983_v4, %v2352_v31 }
 0x988   : > { %2356 = vrot.lane.b32.xlu1 %v5367_v27, %s4430_s12 }
 0x989   : > { %2360 = vrot.lane.b32.xlu0 %v2354_v33, %s4434_s13  ;;  %v1628_v33 = vadd.f32 %v5300_v46, %v5292_v26 }
 0x9fa   : > { %v2357_v23 = vpop.permute.xlu1 %2356 }
 0x9fb   : > { %v5372_v25 = vpop.permute.xlu0 %2360 }
 0x9fc   : > { %v2363_v38 = vsel %vm2001_vm11, %v2357_v23, %v5372_v25 }
 0x9fd   : > { %v2364_v29 = vpack.c.bf16 %v2363_v38, %v2363_v38 }
 0x9ff   : > { %3512 = vmatmul.mubr.msk.bf16.vlgmr.msra.gmra.mrb[36].mxu1 %vm2044_vm12, %v2364_v29 }
 0xa00   : > { %2577 = vmatpush1.bf16.msra.mxu1 %v5185_v7  ;;  %2608 = vmatprep.mubr.bf16.mxu1 %v4433_v53 }
 0xa01   : > { %2578 = vmatprep.subr.bf16.mxu1 %v5188_v17 }
 0xa04   : > { %2579 = vmatpush1.bf16.msra.mxu1 %v5204_v41 }
 0xa05   : > { %2580 = vmatprep.subr.bf16.mxu1 %v5208_v45 }
 0xa08   : > { %2581 = vmatpush1.bf16.msra.mxu1 %v5215_v59 }
 0xa09   : > { %2582 = vmatprep.subr.bf16.mxu1 %v5218_v8 }
 0xa0c   : > { %2583 = vmatpush1.bf16.msra.mxu1 %v5226_v18 }
 0xa0d   : > { %2784 = vmatprep.subr.bf16.mxu1 %v5151_v11 }
 0xad2   : > { %v2402_v42 = vpop.f32.mrb[36].mxu1 }
 0xad3   : > { %v2409_v43 = vadd.f32 %v2402_v42, %v5273_v47  ;;  %v2404_v49 = vpop.f32.mrb[37].mxu1 }
 0xad4   : > { %v2434_v50 = vadd.f32 %v2404_v49, %v1718_v34  ;;  %v2406_v51 = vpop.f32.mrb[38].mxu1 }
 0xad5   : > { %3988 = vtanh.f32 %v2409_v43  ;;  %v2407_v54 = vpop.f32.mrb[39].mxu1  ;;  %v3513_v57 = vmul.f32 -1.442695, %v2409_v43 }
 0xad6   : > { %3990 = vtanh.f32 %v2434_v50  ;;  %v3514_v11 = vmul.f32 -1.442695, %v2434_v50 }
 0xad7   : > { %3992 = vpow2.f32 %v3513_v57 }
 0xad8   : > { %3994 = vpow2.f32 %v3514_v11 }
 0xadf   : > { %v3989_v55 = vpop.eup %3988 }
 0xae0   : > { %v3991_v56 = vpop.eup %3990  ;;  %2419 = vrot.lane.b32.xlu1 %v3989_v55, %s4434_s13 }
 0xae1   : > { %2444 = vrot.lane.b32.xlu0 %v3991_v56, %s4434_s13  ;;  %v3993_v2 = vpop.eup %3992 }
 0xae2   : > { %v3995_v60 = vpop.eup %3994  ;;  %v2413_v61 = vadd.f32 1.0, %v3993_v2 }
 0xae3   : > { %v2438_v47 = vadd.f32 1.0, %v3995_v60 }
 0xae4   : > { %3996 = vrcp.f32 %v2413_v61 }
 0xae5   : > { %3998 = vrcp.f32 %v2438_v47 }
 0xaee   : > { %v3997_v62 = vpop.eup %3996 }
 0xaef   : > { %v3999_v37 = vpop.eup %3998  ;;  %v2417_v1 = vmul.f32 %v3997_v62, %v2323_v16 }
 0xaf0   : > { %v2442_v4 = vmul.f32 %v3999_v37, %v2348_v21 }
 0xb52   : > { %v2420_v24 = vpop.permute.xlu1 %2419 }
 0xb53   : > { %v2422_v28 = vmul.f32 %v3997_v62, %v2420_v24  ;;  %v2445_v0 = vpop.permute.xlu0 %2444 }
 0xb54   : > { %v2447_v30 = vmul.f32 %v3999_v37, %v2445_v0 }
 0xb55   : > { %2424 = vrot.lane.b32.xlu1 %v2422_v28, %s4430_s12 }
 0xb56   : > { %2449 = vrot.lane.b32.xlu0 %v2447_v30, %s4430_s12 }
 0xbc7   : > { %v2425_v32 = vpop.permute.xlu1 %2424 }
 0xbc8   : > { %v2427_v5 = vadd.f32 %v2425_v32, %v2417_v1  ;;  %v2450_v35 = vpop.permute.xlu0 %2449 }
 0xbc9   : > { %v2452_v9 = vadd.f32 %v2450_v35, %v2442_v4 }
 0xbca   : > { %4000 = vtanh.f32 %v2427_v5 }
 0xbcb   : > { %4002 = vtanh.f32 %v2452_v9 }
 0xbd4   : > { %v4001_v10 = vpop.eup %4000 }
 0xbd5   : > { %v4003_v12 = vpop.eup %4002  ;;  %2430 = vrot.lane.b32.xlu1 %v4001_v10, %s4434_s13 }
 0xbd6   : > { %2455 = vrot.lane.b32.xlu0 %v4003_v12, %s4434_s13 }
 0xc47   : > { %v2431_v15 = vpop.permute.xlu1 %2430 }
 0xc48   : > { %v5395_v19 = vmul.f32 %v3997_v62, %v2431_v15  ;;  %v2456_v14 = vpop.permute.xlu0 %2455 }
 0xc49   : > { %v5397_v22 = vmul.f32 %v3999_v37, %v2456_v14 }
 0xc4a   : > { %2460 = vrot.lane.b32.xlu1 %v5395_v19, %s4430_s12 }
 0xc4b   : > { %2464 = vrot.lane.b32.xlu0 %v5397_v22, %s4434_s13 }
 0xcbc   : > { %v2461_v16 = vpop.permute.xlu1 %2460 }
 0xcbd   : > { %v2465_v21 = vpop.permute.xlu0 %2464 }
 0xcbe   : > { %v2467_v3 = vsel %vm2001_vm11, %v2461_v16, %v2465_v21  ;;  %v1538_v16 = vadd.f32 %v5300_v46, %v5286_v13 }
 0xcbf   : > { %v2468_v31 = vpack.c.bf16 %v2467_v3, %v2467_v3 }
 0xcc1   : > { %3515 = vmatmul.mubr.msk.bf16.vlgmr.msra.gmra.mrb[40].mxu0 %vm2044_vm12, %v2468_v31 }
 0xcc2   : > { %2681 = vmatpush1.bf16.msra.mxu0 %v5185_v7  ;;  %2712 = vmatprep.mubr.bf16.mxu0 %v4433_v53 }
 0xcc3   : > { %2682 = vmatprep.subr.bf16.mxu0 %v5188_v17 }
 0xcc6   : > { %2683 = vmatpush1.bf16.msra.mxu0 %v5204_v41 }
 0xcc7   : > { %2684 = vmatprep.subr.bf16.mxu0 %v5208_v45 }
 0xcca   : > { %2685 = vmatpush1.bf16.msra.mxu0 %v5215_v59 }
 0xccb   : > { %2686 = vmatprep.subr.bf16.mxu0 %v5218_v8 }
 0xcce   : > { %2687 = vmatpush1.bf16.msra.mxu0 %v5226_v18 }
 0xd94   : > { %v2506_v23 = vpop.f32.mrb[40].mxu0 }
 0xd95   : > { %v2513_v38 = vadd.f32 %v2506_v23, %v5270_v40  ;;  %v2508_v29 = vpop.f32.mrb[41].mxu0 }
 0xd96   : > { %v2538_v34 = vadd.f32 %v2508_v29, %v1628_v33  ;;  %v2510_v42 = vpop.f32.mrb[42].mxu0 }
 0xd97   : > { %4004 = vtanh.f32 %v2513_v38  ;;  %v2511_v43 = vpop.f32.mrb[43].mxu0  ;;  %v3516_v51 = vmul.f32 -1.442695, %v2513_v38 }
 0xd98   : > { %4006 = vtanh.f32 %v2538_v34  ;;  %v3517_v54 = vmul.f32 -1.442695, %v2538_v34 }
 0xd99   : > { %4008 = vpow2.f32 %v3516_v51 }
 0xd9a   : > { %4010 = vpow2.f32 %v3517_v54 }
 0xda1   : > { %v4005_v49 = vpop.eup %4004 }
 0xda2   : > { %v4007_v50 = vpop.eup %4006  ;;  %2523 = vrot.lane.b32.xlu1 %v4005_v49, %s4434_s13 }
 0xda3   : > { %2548 = vrot.lane.b32.xlu0 %v4007_v50, %s4434_s13  ;;  %v4009_v26 = vpop.eup %4008 }
 0xda4   : > { %v4011_v55 = vpop.eup %4010  ;;  %v2517_v56 = vadd.f32 1.0, %v4009_v26 }
 0xda5   : > { %v2542_v40 = vadd.f32 1.0, %v4011_v55 }
 0xda6   : > { %4012 = vrcp.f32 %v2517_v56 }
 0xda7   : > { %4014 = vrcp.f32 %v2542_v40 }
 0xdb0   : > { %v4013_v57 = vpop.eup %4012 }
 0xdb1   : > { %v4015_v2 = vpop.eup %4014  ;;  %v2521_v62 = vmul.f32 %v4013_v57, %v2427_v5 }
 0xdb2   : > { %v2546_v37 = vmul.f32 %v4015_v2, %v2452_v9 }
 0xe14   : > { %v2524_v11 = vpop.permute.xlu1 %2523 }
 0xe15   : > { %v2526_v60 = vmul.f32 %v4013_v57, %v2524_v11  ;;  %v2549_v61 = vpop.permute.xlu0 %2548 }
 0xe16   : > { %v2551_v47 = vmul.f32 %v4015_v2, %v2549_v61 }
 0xe17   : > { %2528 = vrot.lane.b32.xlu1 %v2526_v60, %s4430_s12 }
 0xe18   : > { %2553 = vrot.lane.b32.xlu0 %v2551_v47, %s4430_s12 }
 0xe89   : > { %v2529_v24 = vpop.permute.xlu1 %2528 }
 0xe8a   : > { %v2531_v28 = vadd.f32 %v2529_v24, %v2521_v62  ;;  %v2554_v0 = vpop.permute.xlu0 %2553 }
 0xe8b   : > { %v2556_v30 = vadd.f32 %v2554_v0, %v2546_v37  ;;  %v1448_v37 = vadd.f32 %v5300_v46, %v5288_v20 }
 0xe8c   : > { %4016 = vtanh.f32 %v2531_v28 }
 0xe8d   : > { %4018 = vtanh.f32 %v2556_v30 }
 0xe96   : > { %v4017_v1 = vpop.eup %4016 }
 0xe97   : > { %v4019_v32 = vpop.eup %4018  ;;  %2534 = vrot.lane.b32.xlu1 %v4017_v1, %s4434_s13 }
 0xe98   : > { %2559 = vrot.lane.b32.xlu0 %v4019_v32, %s4434_s13 }
 0xf09   : > { %v2535_v4 = vpop.permute.xlu1 %2534 }
 0xf0a   : > { %v2537_v35 = vmul.f32 %v4013_v57, %v2535_v4  ;;  %v2560_v10 = vpop.permute.xlu0 %2559 }
 0xf0b   : > { %v5422_v12 = vmul.f32 %v4015_v2, %v2560_v10 }
 0xf0c   : > { %2564 = vrot.lane.b32.xlu1 %v2537_v35, %s4430_s12 }
 0xf0d   : > { %2568 = vrot.lane.b32.xlu0 %v5422_v12, %s4434_s13 }
 0xf7e   : > { %v5427_v5 = vpop.permute.xlu1 %2564 }
 0xf7f   : > { %v2569_v9 = vpop.permute.xlu0 %2568 }
 0xf80   : > { %v2571_v15 = vsel %vm2001_vm11, %v5427_v5, %v2569_v9 }
 0xf81   : > { %v2572_v14 = vpack.c.bf16 %v2571_v15, %v2571_v15 }
 0xf83   : > { %3518 = vmatmul.mubr.msk.bf16.vlgmr.msra.gmra.mrb[40].mxu1 %vm2044_vm12, %v2572_v14 }
 0xf84   : > { %2785 = vmatpush1.bf16.msra.mxu1 %v5185_v7  ;;  %2816 = vmatprep.mubr.bf16.mxu1 %v4433_v53 }
 0xf85   : > { %2786 = vmatprep.subr.bf16.mxu1 %v5188_v17 }
 0xf88   : > { %2787 = vmatpush1.bf16.msra.mxu1 %v5204_v41 }
 0xf89   : > { %2788 = vmatprep.subr.bf16.mxu1 %v5208_v45 }
 0xf8c   : > { %2789 = vmatpush1.bf16.msra.mxu1 %v5215_v59 }
 0xf8d   : > { %2790 = vmatprep.subr.bf16.mxu1 %v5218_v8 }
 0xf90   : > { %2791 = vmatpush1.bf16.msra.mxu1 %v5226_v18 }
0x1056   : > { %v2610_v21 = vpop.f32.mrb[40].mxu1 }
0x1057   : > { %v2617_v7 = vadd.f32 %v2610_v21, %v5279_v58  ;;  %v2612_v3 = vpop.f32.mrb[41].mxu1 }
0x1058   : > { %v2642_v53 = vadd.f32 %v2612_v3, %v1538_v16  ;;  %v2614_v31 = vpop.f32.mrb[42].mxu1 }
0x1059   : > { %4020 = vtanh.f32 %v2617_v7  ;;  %v2615_v17 = vpop.f32.mrb[43].mxu1  ;;  %v3519_v59 = vmul.f32 -1.442695, %v2617_v7 }
0x105a   : > { %4022 = vtanh.f32 %v2642_v53  ;;  %v3520_v8 = vmul.f32 -1.442695, %v2642_v53 }
0x105b   : > { %4024 = vpow2.f32 %v3519_v59 }
0x105c   : > { %4026 = vpow2.f32 %v3520_v8 }
0x1063   : > { %v4021_v41 = vpop.eup %4020 }
0x1064   : > { %v4023_v45 = vpop.eup %4022  ;;  %2627 = vrot.lane.b32.xlu1 %v4021_v41, %s4434_s13 }
0x1065   : > { %2652 = vrot.lane.b32.xlu0 %v4023_v45, %s4434_s13  ;;  %v4025_v18 = vpop.eup %4024 }
0x1066   : > { %v4027_v13 = vpop.eup %4026  ;;  %v2621_v33 = vadd.f32 1.0, %v4025_v18 }
0x1067   : > { %v2646_v58 = vadd.f32 1.0, %v4027_v13 }
0x1068   : > { %4028 = vrcp.f32 %v2621_v33 }
0x1069   : > { %4030 = vrcp.f32 %v2646_v58 }
0x1072   : > { %v4029_v23 = vpop.eup %4028 }
0x1073   : > { %v4031_v29 = vpop.eup %4030  ;;  %v2625_v49 = vmul.f32 %v4029_v23, %v2531_v28 }
0x1074   : > { %v2650_v51 = vmul.f32 %v4031_v29, %v2556_v30 }
0x10d6   : > { %v2628_v38 = vpop.permute.xlu1 %2627 }
0x10d7   : > { %v2630_v34 = vmul.f32 %v4029_v23, %v2628_v38  ;;  %v2653_v42 = vpop.permute.xlu0 %2652 }
0x10d8   : > { %v2655_v43 = vmul.f32 %v4031_v29, %v2653_v42 }
0x10d9   : > { %2632 = vrot.lane.b32.xlu1 %v2630_v34, %s4430_s12 }
0x10da   : > { %2657 = vrot.lane.b32.xlu0 %v2655_v43, %s4430_s12 }
0x114b   : > { %v2633_v50 = vpop.permute.xlu1 %2632 }
0x114c   : > { %v2635_v54 = vadd.f32 %v2633_v50, %v2625_v49  ;;  %v2658_v26 = vpop.permute.xlu0 %2657 }
0x114d   : > { %v2660_v55 = vadd.f32 %v2658_v26, %v2650_v51  ;;  %v1358_v51 = vadd.f32 %v5300_v46, %v5281_v63 }
0x114e   : > { %4032 = vtanh.f32 %v2635_v54 }
0x114f   : > { %4034 = vtanh.f32 %v2660_v55 }
0x1158   : > { %v4033_v56 = vpop.eup %4032 }
0x1159   : > { %v4035_v40 = vpop.eup %4034  ;;  %2638 = vrot.lane.b32.xlu1 %v4033_v56, %s4434_s13 }
0x115a   : > { %2663 = vrot.lane.b32.xlu0 %v4035_v40, %s4434_s13 }
0x11cb   : > { %v2639_v57 = vpop.permute.xlu1 %2638 }
0x11cc   : > { %v5449_v11 = vmul.f32 %v4029_v23, %v2639_v57  ;;  %v2664_v2 = vpop.permute.xlu0 %2663 }
0x11cd   : > { %v5451_v60 = vmul.f32 %v4031_v29, %v2664_v2 }
0x11ce   : > { %2668 = vrot.lane.b32.xlu1 %v5449_v11, %s4430_s12 }
0x11cf   : > { %2672 = vrot.lane.b32.xlu0 %v5451_v60, %s4434_s13 }
0x1240   : > { %v2669_v61 = vpop.permute.xlu1 %2668 }
0x1241   : > { %v2673_v47 = vpop.permute.xlu0 %2672 }
0x1242   : > { %v2675_v62 = vsel %vm2001_vm11, %v2669_v61, %v2673_v47 }
0x1243   : > { %v2676_v24 = vpack.c.bf16 %v2675_v62, %v2675_v62 }
0x1245   : > { %3521 = vmatmul.mubr.msk.bf16.vlgmr.msra.gmra.mrb[44].mxu0 %vm2044_vm12, %v2676_v24 }
0x1318   : > { %v2714_v28 = vpop.f32.mrb[44].mxu0 }
0x1319   : > { %v2721_v0 = vadd.f32 %v2714_v28, %v5276_v52  ;;  %v2716_v30 = vpop.f32.mrb[45].mxu0 }
0x131a   : > { %v2746_v1 = vadd.f32 %v2716_v30, %v1448_v37  ;;  %v2718_v32 = vpop.f32.mrb[46].mxu0 }
0x131b   : > { %4036 = vtanh.f32 %v2721_v0  ;;  %v2719_v4 = vpop.f32.mrb[47].mxu0  ;;  %v3522_v9 = vmul.f32 -1.442695, %v2721_v0 }
0x131c   : > { %4038 = vtanh.f32 %v2746_v1  ;;  %v3523_v15 = vmul.f32 -1.442695, %v2746_v1 }
0x131d   : > { %4040 = vpow2.f32 %v3522_v9 }
0x131e   : > { %4042 = vpow2.f32 %v3523_v15 }
0x1325   : > { %v4037_v35 = vpop.eup %4036 }
0x1326   : > { %v4039_v10 = vpop.eup %4038  ;;  %2731 = vrot.lane.b32.xlu1 %v4037_v35, %s4434_s13 }
0x1327   : > { %2756 = vrot.lane.b32.xlu0 %v4039_v10, %s4434_s13  ;;  %v4041_v20 = vpop.eup %4040 }
0x1328   : > { %v4043_v14 = vpop.eup %4042  ;;  %v2725_v16 = vadd.f32 1.0, %v4041_v20 }
0x1329   : > { %v2750_v52 = vadd.f32 1.0, %v4043_v14 }
0x132a   : > { %4044 = vrcp.f32 %v2725_v16 }
0x132b   : > { %4046 = vrcp.f32 %v2750_v52  ;;  %v3908_v52 = vld [vmem:[%s4875_s17 + $0x40] sm:$0xff]  }
0x132c   : > { %3599 = vmatprep.subr.bf16.mxu0 %v3908_v52 }
0x1334   : > { %v4045_v21 = vpop.eup %4044 }
0x1335   : > { %v4047_v3 = vpop.eup %4046  ;;  %v2729_v41 = vmul.f32 %v4045_v21, %v2635_v54 }
0x1336   : > { %v2754_v59 = vmul.f32 %v4047_v3, %v2660_v55 }
0x1398   : > { %v2732_v7 = vpop.permute.xlu1 %2731 }
0x1399   : > { %v2734_v53 = vmul.f32 %v4045_v21, %v2732_v7  ;;  %v2757_v31 = vpop.permute.xlu0 %2756  ;;  %v3910_v7 = vld [vmem:[%s4875_s17] sm:$0xff]  }
0x139a   : > { %v2759_v17 = vmul.f32 %v4047_v3, %v2757_v31  ;;  %v3913_v31 = vld [vmem:[%s4869_s10 + $0x48] sm:$0xff]   ;;  %3600 = vmatpush3.bf16.msra.mxu0 %v3910_v7 }
0x139b   : > { %2736 = vrot.lane.b32.xlu1 %v2734_v53, %s4430_s12  ;;  %v3912_v53 = vld [vmem:[%s4875_s17 + $0x48] sm:$0xff]  }
0x139c   : > { %2761 = vrot.lane.b32.xlu0 %v2759_v17, %s4430_s12  ;;  %v3879_v17 = vpack.i.bf16 %v5339_v36, %v5449_v11  ;;  %3601 = vmatprep.subr.bf16.mxu0 %v3912_v53  ;;  %v3917_v11 = vld [vmem:[%s4869_s10 + $0x50] sm:$0xff]  }
0x140d   : > { %v2737_v45 = vpop.permute.xlu1 %2736 }
0x140e   : > { %v2739_v8 = vadd.f32 %v2737_v45, %v2729_v41  ;;  %v2762_v18 = vpop.permute.xlu0 %2761  ;;  %v3914_v41 = vld [vmem:[%s4875_s17 + $0x8] sm:$0xff]  }
0x140f   : > { %v2764_v13 = vadd.f32 %v2762_v18, %v2754_v59  ;;  %v3915_v45 = vld [vmem:[%s4869_s10 + $0x8] sm:$0xff]   ;;  %v3916_v59 = vld [vmem:[%s4875_s17 + $0x50] sm:$0xff]   ;;  %3602 = vmatpush3.bf16.msra.mxu0 %v3914_v41  ;;  %v3920_v18 = vld [vmem:[%s4875_s17 + $0x58] sm:$0xff]  }
0x1410   : > { %4048 = vtanh.f32 %v2739_v8  ;;  %3603 = vmatprep.subr.bf16.mxu0 %v3916_v59 }
0x1411   : > { %4050 = vtanh.f32 %v2764_v13 }
0x141a   : > { %v4049_v33 = vpop.eup %4048 }
0x141b   : > { %v4051_v58 = vpop.eup %4050  ;;  %2742 = vrot.lane.b32.xlu1 %v4049_v33, %s4434_s13  ;;  %v3923_v33 = vld [vmem:[%s4869_s10 + $0x18] sm:$0xff]  }
0x141c   : > { %2767 = vrot.lane.b32.xlu0 %v4051_v58, %s4434_s13  ;;  %v3924_v58 = vld [vmem:[%s4875_s17 + $0x60] sm:$0xff]  }
0x148d   : > { %v2743_v23 = vpop.permute.xlu1 %2742 }
0x148e   : > { %v5468_v38 = vmul.f32 %v4045_v21, %v2743_v23  ;;  %v2768_v29 = vpop.permute.xlu0 %2767  ;;  %v3909_v21 = vld [vmem:[%s4869_s10 + $0x40] sm:$0xff]  }
0x148f   : > { %v2770_v34 = vmul.f32 %v4047_v3, %v2768_v29  ;;  %v3911_v3 = vld [vmem:[%s4869_s10] sm:$0xff]   ;;  %3621 = vmatprep.subr.bf16.mxu1 %v3909_v21 }
0x1490   : > { %2772 = vrot.lane.b32.xlu1 %v5468_v38, %s4430_s12  ;;  %v3884_v36 = vpack.i.bf16 %v5341_v39, %v5468_v38  ;;  %v3921_v39 = vld [vmem:[%s4869_s10 + $0x58] sm:$0xff]   ;;  %v3925_v23 = vld [vmem:[%s4869_s10 + $0x60] sm:$0xff]  }
0x1491   : > { %2776 = vrot.lane.b32.xlu0 %v2770_v34, %s4434_s13  ;;  %v3926_v38 = vld [vmem:[%s4875_s17 + $0x20] sm:$0xff]   ;;  %v3928_v34 = vld [vmem:[%s4875_s17 + $0x68] sm:$0xff]  }
0x1492   : > { %v3927_v29 = vld [vmem:[%s4869_s10 + $0x20] sm:$0xff]  }
0x1502   : > { %v2773_v42 = vpop.permute.xlu1 %2772 }
0x1503   : > { %v5473_v43 = vpop.permute.xlu0 %2776 }
0x1504   : > { %v2779_v49 = vsel %vm2001_vm11, %v2773_v42, %v5473_v43  ;;  %v3929_v42 = vld [vmem:[%s4869_s10 + $0x68] sm:$0xff]  }
0x1505   : > { %v2780_v50 = vpack.c.bf16 %v2779_v49, %v2779_v49  ;;  %v3930_v49 = vld [vmem:[%s4875_s17 + $0x28] sm:$0xff]  }
0x1507   : > { %3524 = vmatmul.mubr.msk.bf16.vlgmr.msra.gmra.mrb[44].mxu1 %vm2044_vm12, %v2780_v50  ;;  %v3931_v50 = vld [vmem:[%s4869_s10 + $0x28] sm:$0xff]  }
0x1508   : > { %3622 = vmatpush3.bf16.msra.mxu1 %v3911_v3 }
0x1509   : > { %3623 = vmatprep.subr.bf16.mxu1 %v3913_v31 }
0x150c   : > { %3624 = vmatpush3.bf16.msra.mxu1 %v3915_v45 }
0x150d   : > { %3625 = vmatprep.subr.bf16.mxu1 %v3917_v11 }
0x15da   : > { %v2818_v54 = vpop.f32.mrb[44].mxu1 }
0x15db   : > { %v2825_v26 = vadd.f32 %v2818_v54, %v5284_v6  ;;  %v2820_v55 = vpop.f32.mrb[45].mxu1  ;;  %v3933_v54 = vld [vmem:[%s4869_s10 + $0x70] sm:$0xff]  }
0x15dc   : > { %v2850_v56 = vadd.f32 %v2820_v55, %v1358_v51  ;;  %v2822_v40 = vpop.f32.mrb[46].mxu1  ;;  %v3932_v51 = vld [vmem:[%s4875_s17 + $0x70] sm:$0xff]  }
0x15dd   : > { %4052 = vtanh.f32 %v2825_v26  ;;  %v2823_v57 = vpop.f32.mrb[47].mxu1  ;;  %v3525_v47 = vmul.f32 -1.442695, %v2825_v26  ;;  %v3934_v26 = vld [vmem:[%s4875_s17 + $0x30] sm:$0xff]   ;;  %v3937_v40 = vld [vmem:[%s4869_s10 + $0x78] sm:$0xff]  }
0x15de   : > { %4054 = vtanh.f32 %v2850_v56  ;;  %v3526_v62 = vmul.f32 -1.442695, %v2850_v56  ;;  %v3935_v55 = vld [vmem:[%s4869_s10 + $0x30] sm:$0xff]   ;;  %v3936_v56 = vld [vmem:[%s4875_s17 + $0x78] sm:$0xff]  }
0x15df   : > { %4056 = vpow2.f32 %v3525_v47  ;;  %v3938_v57 = vld [vmem:[%s4875_s17 + $0x38] sm:$0xff]  }
0x15e0   : > { %4058 = vpow2.f32 %v3526_v62 }
0x15e7   : > { %v4053_v2 = vpop.eup %4052 }
0x15e8   : > { %v4055_v61 = vpop.eup %4054  ;;  %2835 = vrot.lane.b32.xlu0 %v4053_v2, %s4434_s13  ;;  %v3939_v2 = vld [vmem:[%s4869_s10 + $0x38] sm:$0xff]  }
0x15e9   : > { %2860 = vrot.lane.b32.xlu1 %v4055_v61, %s4434_s13  ;;  %v4057_v63 = vpop.eup %4056 }
0x15ea   : > { %v4059_v46 = vpop.eup %4058  ;;  %v2829_v24 = vadd.f32 1.0, %v4057_v63 }
0x15eb   : > { %v2854_v6 = vadd.f32 1.0, %v4059_v46 }
0x15ec   : > { %4060 = vrcp.f32 %v2829_v24 }
0x15ed   : > { %4062 = vrcp.f32 %v2854_v6  ;;  %v3889_v6 = vpack.i.bf16 %v5451_v60, %v5367_v27 }
0x15f6   : > { %v5483_v37 = vpop.eup %4060 }
0x15f7   : > { %v5485_v0 = vpop.eup %4062  ;;  %v2833_v4 = vmul.f32 %v5483_v37, %v2739_v8  ;;  %v3919_v8 = vld [vmem:[%s4869_s10 + $0x10] sm:$0xff]  }
0x15f8   : > { %v2858_v10 = vmul.f32 %v5485_v0, %v2764_v13  ;;  %v3922_v13 = vld [vmem:[%s4875_s17 + $0x18] sm:$0xff]   ;;  %3626 = vmatpush3.bf16.msra.mxu1 %v3919_v8 }
0x15f9   : > { %3627 = vmatprep.subr.bf16.mxu1 %v3921_v39  ;;  %v2933_v39 = vld [vmem:[#allocation6] sm:$0xff] }
0x15fc   : > { %3628 = vmatpush3.bf16.msra.mxu1 %v3923_v33 }
0x15fd   : > { %3629 = vmatprep.subr.bf16.mxu1 %v3925_v23  ;;  %v3560_v23 = vld [vmem:[#allocation19] ss:$0 sm:$0xff] (!%p3559_p10) }
0x1600   : > { %3630 = vmatpush3.bf16.msra.mxu1 %v3927_v29 }
0x1601   : > { %3631 = vmatprep.subr.bf16.mxu1 %v3929_v42 }
0x1604   : > { %3632 = vmatpush3.bf16.msra.mxu1 %v3931_v50 }
0x1605   : > { %3633 = vmatprep.subr.bf16.mxu1 %v3933_v54 }
0x1608   : > { %3634 = vmatpush3.bf16.msra.mxu1 %v3935_v55 }
0x1609   : > { %3635 = vmatprep.subr.bf16.mxu1 %v3937_v40 }
0x160c   : > { %3636 = vmatpush3.bf16.msra.mxu1 %v3939_v2 }
0x165a   : > { %v2836_v28 = vpop.permute.xlu0 %2835 }
0x165b   : > { %v2838_v30 = vmul.f32 %v5483_v37, %v2836_v28  ;;  %v2861_v1 = vpop.permute.xlu1 %2860 }
0x165c   : > { %v2863_v32 = vmul.f32 %v5485_v0, %v2861_v1 }
0x165d   : > { %2840 = vrot.lane.b32.xlu0 %v2838_v30, %s4430_s12 }
0x165e   : > { %2865 = vrot.lane.b32.xlu1 %v2863_v32, %s4430_s12 }
0x16cf   : > { %v2841_v35 = vpop.permute.xlu0 %2840 }
0x16d0   : > { %v5493_v9 = vadd.f32 %v2841_v35, %v2833_v4  ;;  %v2866_v15 = vpop.permute.xlu1 %2865 }
0x16d1   : > { %v5495_v20 = vadd.f32 %v2866_v15, %v2858_v10 }
0x16d2   : > { %4064 = vtanh.f32 %v5493_v9 }
0x16d3   : > { %4066 = vtanh.f32 %v5495_v20 }
0x16dc   : > { %v4065_v14 = vpop.eup %4064 }
0x16dd   : > { %v4067_v16 = vpop.eup %4066  ;;  %2846 = vrot.lane.b32.xlu0 %v4065_v14, %s4434_s13 }
0x16de   : > { %2871 = vrot.lane.b32.xlu1 %v4067_v16, %s4434_s13 }
0x16e1   : > { %2919 = vrot.lane.b32.xlu0 %v5397_v22, %s4430_s12  ;;  %v3918_v22 = vld [vmem:[%s4875_s17 + $0x10] sm:$0xff]  }
0x16e2   : > { %3880 = vrot.lane.b32.xlu1 %v3879_v17, %s4434_s13  ;;  %3604 = vmatpush3.bf16.msra.mxu0 %v3918_v22 }
0x16e3   : > { %3605 = vmatprep.subr.bf16.mxu0 %v3920_v18 }
0x16e5   : > { %3885 = vrot.lane.b32.xlu0 %v3884_v36, %s4435_s21 }
0x16e6   : > { %3606 = vmatpush3.bf16.msra.mxu0 %v3922_v13 }
0x16e7   : > { %3607 = vmatprep.subr.bf16.mxu0 %v3924_v58 }
0x16ea   : > { %3608 = vmatpush3.bf16.msra.mxu0 %v3926_v38 }
0x16eb   : > { %3609 = vmatprep.subr.bf16.mxu0 %v3928_v34 }
0x16ee   : > { %3610 = vmatpush3.bf16.msra.mxu0 %v3930_v49 }
0x16ef   : > { %3611 = vmatprep.subr.bf16.mxu0 %v3932_v51 }
0x16f2   : > { %3612 = vmatpush3.bf16.msra.mxu0 %v3934_v26 }
0x16f3   : > { %3613 = vmatprep.subr.bf16.mxu0 %v3936_v56 }
0x16f6   : > { %3614 = vmatpush3.bf16.msra.mxu0 %v3938_v57 }
0x174f   : > { %v2847_v61 = vpop.permute.xlu0 %2846 }
0x1750   : > { %v2849_v47 = vmul.f32 %v5483_v37, %v2847_v61  ;;  %v2872_v62 = vpop.permute.xlu1 %2871 }
0x1751   : > { %v2874_v63 = vmul.f32 %v5485_v0, %v2872_v62 }
0x1752   : > { %2876 = vrot.lane.b32.xlu0 %v2849_v47, %s4430_s12 }
0x1753   : > { %v2920_v46 = vpop.permute.xlu0 %2919  ;;  %2886 = vrot.lane.b32.xlu1 %v2874_v63, %s4430_s12 }
0x1754   : > { %v3881_v24 = vpop.permute.xlu1 %3880  ;;  %v2928_v0 = vsel %vm2001_vm11, %v2920_v46, %v5372_v25 }
0x1755   : > { %v3882_v28 = vunpack.i.l.bf16 %v3881_v24 }
0x1756   : > { %2891 = vrot.lane.b32.xlu0 %v5495_v20, %s4435_s21  ;;  %v3883_v20 = vunpack.i.h.bf16 %v3881_v24 }
0x1757   : > { %v3886_v30 = vpop.permute.xlu0 %3885  ;;  %3890 = vrot.lane.b32.xlu1 %v3889_v6, %s4435_s21  ;;  %v2911_v32 = vsel %vm2001_vm11, %v5427_v5, %v3882_v28 }
0x1758   : > { %v3888_v37 = vunpack.i.h.bf16 %v3886_v30  ;;  %v3887_v1 = vunpack.i.l.bf16 %v3886_v30 }
0x175a   : > { %v2929_v4 = vsel %vm2044_vm12, %v2928_v0, %v3888_v37  ;;  %v2912_v27 = vsel %vm2044_vm12, %v2911_v32, %v3887_v1 }
0x175b   : > { %2881 = vrot.lane.b32.xlu1 %v5493_v9, %s4435_s21  ;;  %v2930_v60 = vsel %vm2909_vm13, %v2929_v4, %v5312_v44  ;;  %v2913_v35 = vsel %vm2909_vm13, %v2912_v27, %v2849_v47  ;;  %v2907_v44 = vsel %vm2001_vm11, %v5316_v48, %v3883_v20 }
0x175c   : > { %v2932_v10 = vpack.c.bf16 %v2930_v60, %v2930_v60  ;;  %v2915_v15 = vpack.c.bf16 %v2913_v35, %v2913_v35 }
0x175e   : > { %3126 = vmatprep.mubr.bf16.mxu0 %v2932_v10  ;;  %3262 = vmatprep.mubr.bf16.mxu1 %v2915_v15 }
0x17c4   : > { %v2877_v25 = vpop.permute.xlu0 %2876 }
0x17c5   : > { %2879 = vst.msk [vmem:[#allocation2] sm:$0xff] %vm2001_vm11, %v2877_v25  ;;  %v2887_v5 = vpop.permute.xlu1 %2886 }
0x17c6   : > { %2889 = vst.msk [vmem:[#allocation4] sm:$0xff] %vm2001_vm11, %v2887_v5  ;;  %v2925_v21 = vsel %vm2001_vm11, %v2887_v5, %v5473_v43 }
0x17c8   : > { %v2892_v14 = vpop.permute.xlu0 %2891 }
0x17c9   : > { %2894 = vst.msk [vmem:[#allocation5] sm:$0xff] %vm2001_vm11, %v2892_v14  ;;  %v3891_v9 = vpop.permute.xlu1 %3890 }
0x17ca   : > { %v3893_v16 = vunpack.i.h.bf16 %v3891_v9  ;;  %v3892_v52 = vunpack.i.l.bf16 %v3891_v9 }
0x17cc   : > { %v2926_v7 = vsel %vm2044_vm12, %v2925_v21, %v3893_v16  ;;  %v2908_v3 = vsel %vm2044_vm12, %v2907_v44, %v3892_v52 }
0x17cd   : > { %v2882_v53 = vpop.permute.xlu1 %2881  ;;  %v2927_v31 = vsel %vm2909_vm13, %v2926_v7, %v5422_v12  ;;  %v2910_v17 = vsel %vm2909_vm13, %v2908_v3, %v5395_v19 }
0x17ce   : > { %2884 = vst.msk [vmem:[#allocation3] sm:$0xff] %vm2001_vm11, %v2882_v53  ;;  %v2931_v41 = vpack.c.bf16 %v2927_v31, %v2927_v31  ;;  %v2914_v45 = vpack.c.bf16 %v2910_v17, %v2910_v17 }
0x17d0   : > { %3127 = vmatmul.mubr.bf16.vlgmr.msra.gmra.mrb[48].mxu0 %v2931_v41  ;;  %3263 = vmatmul.mubr.bf16.vlgmr.msra.gmra.mrb[48].mxu1 %v2914_v45 }
0x18a3   : > { %v3615_v48 = vpop.f32.mrb[48].mxu0  ;;  %v3637_v59 = vpop.f32.mrb[48].mxu1 }
0x18a4   : > { %v3616_v43 = vpop.f32.mrb[49].mxu0  ;;  %v3638_v36 = vpop.f32.mrb[49].mxu1 }
0x18a5   : > { %v3617_v11 = vadd.f32 %v3616_v43, %v3615_v48  ;;  %v3639_v22 = vadd.f32 %v3638_v36, %v3637_v59  ;;  %v3618_v8 = vpop.f32.mrb[50].mxu0  ;;  %v3640_v18 = vpop.f32.mrb[50].mxu1  ;;  %3276 = sbr.rel (%p3559_p10) target bundleno = 6326 (0x18b6), region = 92 }
0x18a6   : > { %v3619_v13 = vpop.f32.mrb[51].mxu0  ;;  %v3641_v12 = vpop.f32.mrb[51].mxu1 }
0x18a7   : > { %v3265_v33 = vadd.f32 %v3639_v22, %v3617_v11 }
0x18a9   : > { %v3270_v19 = vadd.f32 %v3265_v33, %v2933_v39 }
0x18ab   : > { %3272 = vst.msk [vmem:[#allocation6] sm:$0xff] %vm3271_vm14, %v3270_v19 }
0x18b2   : > { %v3277_v58 = vld [vmem:[#allocation6] sm:$0xff] }
0x18b3   : > { %v3285_v38 = vadd.f32 %v3560_v23, %v3277_v58 }
0x18b5   : > { %3286 = vst.msk [vmem:[#allocation21] sm:$0xff] %vm3271_vm14, %v3285_v38 }
0x18b6 PF: > { %s5710_s15 = sld [smem:[#allocation32_spill]]  ;;  %s4436_s24 = smov [#allocation21]  }
0x18b7   : > { %s3294_s19 = sshll.u32 %s4436_s24, 4  ;;  %s3295_s19 = int_to_ptr.vmem [resolvable:$true] %s3294_s19 }
0x18b8   : > { %s4300_s18 = scalar_lea.vmem %s3295_s19, 128  ;;  %p4307_p13 = scmp.lt.s32.totalorder %s3295_s19, %s3295_s19 }
0x18b9   : > { %p4301_p5 = scmp.ne.s32.totalorder %s3295_s19, %s4300_s18  ;;  %p4308_p7 = scmp.lt.s32.totalorder %s4300_s18, %s4300_s18 }
0x18bb   : > { %p4309_p12 = por %p4308_p7, %p4307_p13 }
0x18bc   : > { %p3802_p9 = scmp.eq.s32.totalorder %s5710_s15, 1 }
0x18be   : > { %p4302_p1 = pnand %p4301_p5, %p3802_p9 }
0x18c0   : > { %p4303_p6 = pneg %p4302_p1 }
0x18c2   : > { %p4310_p2 = pnand %p4309_p12, %p4303_p6 }
0x18c4   : > { %4313 = shalt.err (!%p4310_p2)
}
0x18c5   : > { %s5711_s5 = sld [smem:[#allocation40_spill]] }
0x18cb   : > { %s4314_s9 = scalar_lea.hbm %s5711_s5, 128 }
0x18cc   : > { %p4315_p0 = scmp.ne.s32.totalorder %s5711_s5, %s4314_s9  ;;  %p4320_p3 = scmp.lt.u32.totalorder %s4314_s9, %s5711_s5 }
0x18ce   : > { %p4316_p4 = pnand %p4315_p0, %p3802_p9 }
0x18d0   : > { %p4317_p11 = pneg %p4316_p4 }
0x18d2   : > { %p4322_p8 = pnand %p4320_p3, %p4317_p11 }
0x18d4   : > { %4325 = shalt.err (!%p4322_p8)
}
0x18d5   : > { %3764 = dma.vmem_to_hbm [thread:$0]  (%p3802_p9), %s3295_s19, 128, %s5711_s5, [#allocation9]  }
0x18d6   : > { %4383 = dma.done.wait (%p3802_p9), [#allocation9], 128  }
0x18d7   : > { %4385 = vsyncadd (%p3802_p9), [#allocation9], 4294967168 }
0x18d8 PF: > { %s5712_s30 = sld [smem:[#allocation30_spill]]  ;;  %s5713_s9 = sld [smem:[#allocation31_spill]] }
0x18d9   : > { %s5714_s10 = sld [smem:[#allocation35_spill]]  ;;  %p27_p10 = scmp.ge.s32.totalorder %s4597_s23, 4  }
0x18da   : > { %s5715_s27 = smov %s4392_s28  ;;  %s5716_s28 = smov %s4396_s29 }
0x18db   : > { %s5717_s29 = smov %s4756_s22  ;;  %s5718_s11 = smov %s4597_s23 }
0x18dc   :  { %29 = sbr.rel (!%p27_p10) target bundleno = 17 (0x11), region = 152 }
0x18e3   :  { %3307 = vsyncpa [#allocation8], 1 }
0x18e4   :  { %3309 = vsyncpa [#allocation8 + $0x1], 1 }
0x18e5   :  { %3310 = vsyncpa [#allocation11], 1 }
0x18e6   :  { %3312 = vsyncpa [#allocation11 + $0x1], 1 }
0x18e7   :  { %3313 = vsyncpa [#allocation14], 1 }
0x18e8   :  { %3314 = vsyncpa [#allocation17], 1 }
0x18e9   :  { %3316 = vsyncpa [#allocation17 + $0x1], 1 }
0x18ea   :  { %3317 = vsyncpa [#allocation20], 1 }
0x18eb   :  { %3318 = vsyncpa [#allocation9], 1 }
0x18ec   :  { %3320 = vsyncpa [#allocation9 + $0x1], 1 }

</bundles_post_ra>
